<compile_context>
chip_gen: v5e
topology: v5e:2x2
jax: 0.10.0
libtpu: 0.0.40
codegen_flags: <defaults>
</compile_context>

<pallas_src>
import functools
from typing import Any, NamedTuple, Tuple

import jax
import jax.numpy as jnp
from jax import lax
from jax.experimental import pallas as pl
from jax.experimental.pallas import tpu as pltpu


def _round_up(x, m):
    return (x + m - 1) // m * m


# Gate blocks are stored in order (i, f, o, g): the three sigmoid gates are a
# single contiguous (Bp, 3*Hp) lane slab and the cell-candidate tanh is the
# last (Bp, Hp) slab.  PyTorch stores gates as (i, f, g, o).
_GATE_PERM = (0, 1, 3, 2)


# ---------------------------------------------------------------------------
# Fused kernel
# ---------------------------------------------------------------------------
def _make_fused_lstm_kernel(num_layers, T, Bp, Hp, matmul_dtype):
    """Fused num_layers-deep LSTM + FC head; everything resident in VMEM.

    Positional refs:
      inputs : x (T*Bp, Dp) [matmul_dtype],
               [w_ih_l (Din_p, 4*Hp), w_hh_l (Hp, 4*Hp) [matmul_dtype],
                b_l (1, 4*Hp) f32] * num_layers,
               fc_w (Hp, Cp) [matmul_dtype], fc_b (1, Cp) f32
      outputs: out (Bp, Cp) f32
      scratch: pre (T*Bp, 4*Hp) f32, seq (T*Bp, Hp) matmul_dtype
    Gate blocks laid out (i, f, o, g), each Hp lanes wide (lane-aligned).
    """
    unroll = True if T <= 64 else 8  # serial deps: full unroll only helps small T

    def kernel(*refs):
        x_ref = refs[0]
        lstm_refs = []
        idx = 1
        for _ in range(num_layers):
            lstm_refs.append((refs[idx], refs[idx + 1], refs[idx + 2]))
            idx += 3
        fcw_ref, fcb_ref = refs[idx], refs[idx + 1]
        out_ref = refs[idx + 2]
        pre_ref, seq_ref = refs[idx + 3], refs[idx + 4]

        h_last = jnp.zeros((Bp, Hp), jnp.float32)

        for layer_idx, (wih_ref, whh_ref, b_ref) in enumerate(lstm_refs):
            is_last = layer_idx == num_layers - 1

            # ---- Hoisted input projection: ONE (T*Bp, Din_p)x(Din_p, 4*Hp)
            # MXU matmul per layer (inputs already in matmul_dtype); bias in f32.
            seq_in = x_ref[...] if layer_idx == 0 else seq_ref[...]
            pre_ref[...] = (
                jnp.dot(seq_in, wih_ref[...],
                        preferred_element_type=jnp.float32)
                + b_ref[...]
            )
            w_hh = whh_ref[...]  # resident for the whole recurrence
            # TODO(synk): if the Mosaic dump shows W_hh re-pushed into the MXU
            # each timestep, stage it explicitly with pltpu.matmul_push_rhs
            # once before the loop + pltpu.matmul_acc_lhs/matmul_pop per step.

            # ---- Serial recurrence: only h @ W_hh + elementwise per step.
            def step(t, carry, *, _is_last=is_last, _w_hh=w_hh):
                h, c = carry
                row = pl.multiple_of(t * Bp, Bp)
                gates = pre_ref[pl.ds(row, Bp), :] + jnp.dot(
                    h.astype(matmul_dtype), _w_hh,
                    preferred_element_type=jnp.float32)
                # Three sigmoids (i, f, o) as ONE tanh on a contiguous lane
                # slab: sigmoid(x) = 0.5*tanh(0.5*x) + 0.5.
                sig = 0.5 * jnp.tanh(0.5 * gates[:, 0:3 * Hp]) + 0.5
                i_g = sig[:, 0 * Hp:1 * Hp]
                f_g = sig[:, 1 * Hp:2 * Hp]
                o_g = sig[:, 2 * Hp:3 * Hp]
                g_g = jnp.tanh(gates[:, 3 * Hp:4 * Hp])
                c_new = f_g * c + i_g * g_g
                h_new = o_g * jnp.tanh(c_new)        # tanh(c_new) computed once
                if not _is_last:
                    # Only intermediate layers feed the next layer's input proj.
                    seq_ref[pl.ds(row, Bp), :] = h_new.astype(seq_ref.dtype)
                return (h_new, c_new)

            zeros = jnp.zeros((Bp, Hp), jnp.float32)
            h_last, _ = lax.fori_loop(0, T, step, (zeros, zeros),
                                      unroll=unroll)

        # ---- FC head on the final timestep's hidden state (lane-dense store).
        out_ref[...] = (
            jnp.dot(h_last.astype(matmul_dtype), fcw_ref[...],
                    preferred_element_type=jnp.float32)
            + fcb_ref[...]
        )

    return kernel


# ---------------------------------------------------------------------------
# Parameter preparation (done ONCE, hoisted out of the per-call forward)
# ---------------------------------------------------------------------------
def _pad_gate_matrix(w, rows, H, rows_p, Hp, dtype):
    """(rows, 4H) blocks (i,f,g,o) -> (rows_p, 4*Hp) blocks (i,f,o,g)."""
    w4 = w.astype(jnp.float32).reshape(rows, 4, H)
    w4 = w4[:, _GATE_PERM, :]
    w4 = jnp.pad(w4, ((0, rows_p - rows), (0, 0), (0, Hp - H)))
    return w4.reshape(rows_p, 4 * Hp).astype(dtype)


def _pad_gate_bias(b, H, Hp):
    """(1, 4H) blocks (i,f,g,o) -> (1, 4*Hp) blocks (i,f,o,g); stays f32."""
    b4 = b.astype(jnp.float32).reshape(1, 4, H)
    b4 = b4[:, _GATE_PERM, :]
    b4 = jnp.pad(b4, ((0, 0), (0, 0), (0, Hp - H)))
    return b4.reshape(1, 4 * Hp)


class PreparedParams(NamedTuple):
    weights: Tuple[jax.Array, ...]
    num_layers: int
    H: int
    C: int
    Hp: int
    Dp: int
    Cp: int
    matmul_dtype: Any


def prepare_params(params, *, matmul_dtype=jnp.bfloat16):
    """Pad / gate-reorder / cast all weights once.

    bf16 matmul operands halve weight DMA and per-step MXU pushes on
    v5e/v6e/v7x (the MXU is bf16-native on all three; only v5e's VPU/EUP lack
    bf16, and all elementwise/state math here stays float32 regardless).
    Use matmul_dtype=jnp.float32 for bit-tight numerics.
    """
    lstm = params["lstm"]
    num_layers = len(lstm)
    D = lstm[0]["w_ih"].shape[0]
    H = lstm[0]["w_hh"].shape[0]
    C = params["fc_w"].shape[1]
    Hp = _round_up(H, 128)   # lane tile -> each gate slice is lane-aligned
    Dp = _round_up(D, 128)
    Cp = _round_up(C, 128)   # lane-dense output store

    weights = []
    for li, layer in enumerate(lstm):
        d_in, d_in_p = (D, Dp) if li == 0 else (H, Hp)
        weights.append(_pad_gate_matrix(layer["w_ih"], d_in, H, d_in_p, Hp,
                                        matmul_dtype))
        weights.append(_pad_gate_matrix(layer["w_hh"], H, H, Hp, Hp,
                                        matmul_dtype))
        weights.append(_pad_gate_bias(layer["b"], H, Hp))
    fc_w = jnp.pad(params["fc_w"].astype(jnp.float32),
                   ((0, Hp - H), (0, Cp - C))).astype(matmul_dtype)
    fc_b = jnp.pad(params["fc_b"].astype(jnp.float32), ((0, 0), (0, Cp - C)))
    weights += [fc_w, fc_b]
    return PreparedParams(tuple(weights), num_layers, H, C, Hp, Dp, Cp,
                          matmul_dtype)


# ---------------------------------------------------------------------------
# Forward: equivalent of LSTMModel.forward
# ---------------------------------------------------------------------------
@functools.partial(
    jax.jit,
    static_argnames=("num_layers", "H", "C", "Hp", "Dp", "Cp", "matmul_dtype"))
def _lstm_forward_impl(x, weights, *, num_layers, H, C, Hp, Dp, Cp,
                       matmul_dtype):
    B, T, D = x.shape
    # Batch rounded to the sublane tile of the narrowest row-sliced buffer
    # (8 rows for f32, 16 for bf16) so per-step slices/stores are unmasked.
    sublanes = 8 * 4 // jnp.dtype(matmul_dtype).itemsize
    Bp = _round_up(B, sublanes)

    # (B, T, D) -> time-major, padded, flattened (T*Bp, Dp), matmul dtype.
    x_tb = jnp.transpose(x.astype(jnp.float32), (1, 0, 2))       # (T, B, D)
    x_tb = jnp.pad(x_tb, ((0, 0), (0, Bp - B), (0, Dp - D)))     # (T, Bp, Dp)
    x_flat = x_tb.reshape(T * Bp, Dp).astype(matmul_dtype)

    kernel = _make_fused_lstm_kernel(num_layers, T, Bp, Hp, matmul_dtype)
    out_p = pl.pallas_call(
        kernel,
        out_shape=jax.ShapeDtypeStruct((Bp, Cp), jnp.float32),
        scratch_shapes=[
            pltpu.VMEM((T * Bp, 4 * Hp), jnp.float32),   # hoisted gate pre-acts
            pltpu.VMEM((T * Bp, Hp), matmul_dtype),      # layer-to-layer hidden
        ],
    )(x_flat, *weights)
    # TODO(synk): for large T, chunk the hoisted input projection (pre scratch
    # grows with T) and raise pltpu.CompilerParams(vmem_limit_bytes=...) — it
    # is the first buffer to blow v7x's 64 MiB VMEM.
    # TODO(synk): for Bp >= 16 on v7x, add a leading batch-parallel grid axis
    # (dimension_semantics=("parallel",)) so both TensorCores are used.
    # TODO(synk): for deeper models, stream layer l+1 weights with
    # memory_space=pl.ANY + pltpu.make_async_copy behind layer l's recurrence.
    return out_p[:B, :C]


def lstm_model_forward(x, prepared: PreparedParams):
    """out, _ = lstm(x); return fc(out[:, -1, :])."""
    return _lstm_forward_impl(
        x, prepared.weights,
        num_layers=prepared.num_layers, H=prepared.H, C=prepared.C,
        Hp=prepared.Hp, Dp=prepared.Dp, Cp=prepared.Cp,
        matmul_dtype=prepared.matmul_dtype)


# ---------------------------------------------------------------------------
# Deterministic parameter init (PyTorch-style U(-1/sqrt(H), 1/sqrt(H)))
# ---------------------------------------------------------------------------
def init_params(key, input_size, hidden_size, num_layers, num_classes):
    bound = 1.0 / jnp.sqrt(jnp.float32(hidden_size))
    layers = []
    for layer_idx in range(num_layers):
        d_in = input_size if layer_idx == 0 else hidden_size
        key, k1, k2, k3, k4 = jax.random.split(key, 5)
        # Stored pre-transposed for right-multiplication: x @ w_ih, h @ w_hh
        w_ih = jax.random.uniform(k1, (d_in, 4 * hidden_size), jnp.float32,
                                  -bound, bound)
        w_hh = jax.random.uniform(k2, (hidden_size, 4 * hidden_size),
                                  jnp.float32, -bound, bound)
        b_ih = jax.random.uniform(k3, (4 * hidden_size,), jnp.float32,
                                  -bound, bound)
        b_hh = jax.random.uniform(k4, (4 * hidden_size,), jnp.float32,
                                  -bound, bound)
        layers.append({
            "w_ih": w_ih,
            "w_hh": w_hh,
            "b": (b_ih + b_hh)[None, :],   # (1, 4H), PyTorch gate order i,f,g,o
        })
    key, k5, k6 = jax.random.split(key, 3)
    fc_w = jax.random.uniform(k5, (hidden_size, num_classes), jnp.float32,
                              -bound, bound)
    fc_b = jax.random.uniform(k6, (1, num_classes), jnp.float32,
                              -bound, bound)
    return {"lstm": layers, "fc_w": fc_w, "fc_b": fc_b}


# ---------------------------------------------------------------------------
# Pure-JAX reference (correctness check)
# ---------------------------------------------------------------------------
def reference_forward(x, params):
    h_seq = jnp.transpose(x, (1, 0, 2)).astype(jnp.float32)  # (T, B, D)
    for layer in params["lstm"]:
        w_ih, w_hh, b = layer["w_ih"], layer["w_hh"], layer["b"]
        H = w_hh.shape[0]
        B = h_seq.shape[1]

        def step(carry, x_t):
            h, c = carry
            gates = x_t @ w_ih + h @ w_hh + b
            i_g = jax.nn.sigmoid(gates[:, 0 * H:1 * H])
            f_g = jax.nn.sigmoid(gates[:, 1 * H:2 * H])
            g_g = jnp.tanh(gates[:, 2 * H:3 * H])
            o_g = jax.nn.sigmoid(gates[:, 3 * H:4 * H])
            c_new = f_g * c + i_g * g_g
            h_new = o_g * jnp.tanh(c_new)
            return (h_new, c_new), h_new

        init = (jnp.zeros((B, H), jnp.float32), jnp.zeros((B, H), jnp.float32))
        _, h_seq = jax.lax.scan(step, init, h_seq)
    return h_seq[-1] @ params["fc_w"] + params["fc_b"]


# ---------------------------------------------------------------------------
if __name__ == "__main__":
    # Small shapes consistent with the module's forward: x is (B, T, input_size)
    B, T = 2, 8
    input_size, hidden_size, num_layers, num_classes = 16, 32, 2, 5

    key = jax.random.PRNGKey(0)
    key_x, key_p = jax.random.split(key)
    x = jax.random.normal(key_x, (B, T, input_size), jnp.float32)
    params = init_params(key_p, input_size, hidden_size, num_layers,
                         num_classes)

    # Weights padded / reordered / cast ONCE, outside the forward pass.
    prep_bf16 = prepare_params(params, matmul_dtype=jnp.bfloat16)  # perf default
    prep_f32 = prepare_params(params, matmul_dtype=jnp.float32)    # exact path

    out_bf16 = jax.block_until_ready(lstm_model_forward(x, prep_bf16))
    out_f32 = jax.block_until_ready(lstm_model_forward(x, prep_f32))

    ref = reference_forward(x, params)
    assert out_bf16.shape == (B, num_classes)
    assert out_f32.shape == (B, num_classes)
    assert jnp.allclose(out_f32, ref, atol=1e-4, rtol=1e-4), \
        "f32 kernel mismatch vs reference"
    assert jnp.allclose(out_bf16, ref, atol=5e-2, rtol=5e-2), \
        "bf16 kernel mismatch vs reference"

    print("KERNEL_OK")
</pallas_src>

<mosaic_0001>
module attributes {stable_mosaic.version = 11 : i64} {
  func.func @kernel(%arg0: memref<128x128xbf16, #tpu.memory_space<vmem>>, %arg1: memref<128x512xbf16, #tpu.memory_space<vmem>>, %arg2: memref<128x512xbf16, #tpu.memory_space<vmem>>, %arg3: memref<1x512xf32, #tpu.memory_space<vmem>>, %arg4: memref<128x512xbf16, #tpu.memory_space<vmem>>, %arg5: memref<128x512xbf16, #tpu.memory_space<vmem>>, %arg6: memref<1x512xf32, #tpu.memory_space<vmem>>, %arg7: memref<128x128xbf16, #tpu.memory_space<vmem>>, %arg8: memref<1x128xf32, #tpu.memory_space<vmem>>, %arg9: memref<16x128xf32, #tpu.memory_space<vmem>>, %arg10: memref<128x512xf32, #tpu.memory_space<vmem>>, %arg11: memref<128x128xbf16, #tpu.memory_space<vmem>>) attributes {dimension_semantics = [], scalar_prefetch = 0 : i64, scratch_operands = 2 : i64, tpu.core_type = #tpu.core_type<tc>} {
    %c0 = arith.constant 0 : index
    %c0_0 = arith.constant 0 : index
    %0 = vector.load %arg0[%c0, %c0_0] : memref<128x128xbf16, #tpu.memory_space<vmem>>, vector<128x128xbf16>
    %c0_1 = arith.constant 0 : index
    %c0_2 = arith.constant 0 : index
    %1 = vector.load %arg1[%c0_1, %c0_2] : memref<128x512xbf16, #tpu.memory_space<vmem>>, vector<128x512xbf16>
    %cst = arith.constant dense<0.000000e+00> : vector<128x512xf32>
    %2 = tpu.matmul %0, %1, %cst {dimension_numbers = #tpu.dot_dimension_numbers<[1], [0], [0], [1], [0, 0, 1, 1], [], []>} : vector<128x128xbf16>, vector<128x512xbf16>, vector<128x512xf32> -> vector<128x512xf32>
    %c0_3 = arith.constant 0 : index
    %c0_4 = arith.constant 0 : index
    %3 = vector.load %arg3[%c0_3, %c0_4] : memref<1x512xf32, #tpu.memory_space<vmem>>, vector<1x512xf32>
    %4 = vector.broadcast %3 : vector<1x512xf32> to vector<128x512xf32>
    %5 = arith.addf %2, %4 : vector<128x512xf32>
    %c0_5 = arith.constant 0 : index
    %c0_6 = arith.constant 0 : index
    %6 = vector.load %arg10[%c0_5, %c0_6] : memref<128x512xf32, #tpu.memory_space<vmem>>, vector<128x512xf32>
    tpu.vector_store %arg10[%c0_5, %c0_6], %5 {strides = array<i32>} : memref<128x512xf32, #tpu.memory_space<vmem>>, vector<128x512xf32>,
    %c0_7 = arith.constant 0 : index
    %c0_8 = arith.constant 0 : index
    %7 = vector.load %arg2[%c0_7, %c0_8] : memref<128x512xbf16, #tpu.memory_space<vmem>>, vector<128x512xbf16>
    %cst_9 = arith.constant 0.000000e+00 : f32
    %8 = vector.broadcast %cst_9 : f32 to vector<16x128xf32>
    %c0_i32 = arith.constant 0 : i32
    %c16_i32 = arith.constant 16 : i32
    %9 = arith.muli %c0_i32, %c16_i32 : i32
    %10 = tpu.assume_multiple %9, 16 : i32
    %11 = arith.index_cast %10 : i32 to index
    %c0_10 = arith.constant 0 : index
    %12 = vector.load %arg10[%11, %c0_10] : memref<128x512xf32, #tpu.memory_space<vmem>>, vector<16x512xf32>
    %13 = arith.truncf %8 : vector<16x128xf32> to vector<16x128xbf16>
    %cst_11 = arith.constant dense<0.000000e+00> : vector<16x512xf32>
    %14 = tpu.matmul %13, %7, %cst_11 {dimension_numbers = #tpu.dot_dimension_numbers<[1], [0], [0], [1], [0, 0, 1, 1], [], []>} : vector<16x128xbf16>, vector<128x512xbf16>, vector<16x512xf32> -> vector<16x512xf32>
    %15 = arith.addf %12, %14 : vector<16x512xf32>
    %16 = vector.extract_strided_slice %15 {offsets = [0, 0], sizes = [16, 384], strides = [1, 1]} : vector<16x512xf32> to vector<16x384xf32>
    %cst_12 = arith.constant 5.000000e-01 : f32
    %17 = vector.broadcast %cst_12 : f32 to vector<16x384xf32>
    %18 = arith.mulf %17, %16 : vector<16x384xf32>
    %19 = math.tanh %18 : vector<16x384xf32>
    %cst_13 = arith.constant 5.000000e-01 : f32
    %20 = vector.broadcast %cst_13 : f32 to vector<16x384xf32>
    %21 = arith.mulf %20, %19 : vector<16x384xf32>
    %cst_14 = arith.constant 5.000000e-01 : f32
    %22 = vector.broadcast %cst_14 : f32 to vector<16x384xf32>
    %23 = arith.addf %21, %22 : vector<16x384xf32>
    %24 = vector.extract_strided_slice %23 {offsets = [0, 0], sizes = [16, 128], strides = [1, 1]} : vector<16x384xf32> to vector<16x128xf32>
    %25 = vector.extract_strided_slice %23 {offsets = [0, 128], sizes = [16, 128], strides = [1, 1]} : vector<16x384xf32> to vector<16x128xf32>
    %26 = vector.extract_strided_slice %23 {offsets = [0, 256], sizes = [16, 128], strides = [1, 1]} : vector<16x384xf32> to vector<16x128xf32>
    %27 = vector.extract_strided_slice %15 {offsets = [0, 384], sizes = [16, 128], strides = [1, 1]} : vector<16x512xf32> to vector<16x128xf32>
    %28 = math.tanh %27 : vector<16x128xf32>
    %29 = arith.mulf %25, %8 : vector<16x128xf32>
    %30 = arith.mulf %24, %28 : vector<16x128xf32>
    %31 = arith.addf %29, %30 : vector<16x128xf32>
    %32 = math.tanh %31 : vector<16x128xf32>
    %33 = arith.mulf %26, %32 : vector<16x128xf32>
    %34 = arith.truncf %33 : vector<16x128xf32> to vector<16x128xbf16>
    %35 = arith.index_cast %10 : i32 to index
    %c0_15 = arith.constant 0 : index
    %36 = vector.load %arg11[%35, %c0_15] : memref<128x128xbf16, #tpu.memory_space<vmem>>, vector<16x128xbf16>
    tpu.vector_store %arg11[%35, %c0_15], %34 {strides = array<i32>} : memref<128x128xbf16, #tpu.memory_space<vmem>>, vector<16x128xbf16>,
    %c1_i32 = arith.constant 1 : i32
    %c16_i32_16 = arith.constant 16 : i32
    %37 = arith.muli %c1_i32, %c16_i32_16 : i32
    %38 = tpu.assume_multiple %37, 16 : i32
    %39 = arith.index_cast %38 : i32 to index
    %c0_17 = arith.constant 0 : index
    %40 = vector.load %arg10[%39, %c0_17] : memref<128x512xf32, #tpu.memory_space<vmem>>, vector<16x512xf32>
    %41 = arith.truncf %33 : vector<16x128xf32> to vector<16x128xbf16>
    %cst_18 = arith.constant dense<0.000000e+00> : vector<16x512xf32>
    %42 = tpu.matmul %41, %7, %cst_18 {dimension_numbers = #tpu.dot_dimension_numbers<[1], [0], [0], [1], [0, 0, 1, 1], [], []>} : vector<16x128xbf16>, vector<128x512xbf16>, vector<16x512xf32> -> vector<16x512xf32>
    %43 = arith.addf %40, %42 : vector<16x512xf32>
    %44 = vector.extract_strided_slice %43 {offsets = [0, 0], sizes = [16, 384], strides = [1, 1]} : vector<16x512xf32> to vector<16x384xf32>
    %cst_19 = arith.constant 5.000000e-01 : f32
    %45 = vector.broadcast %cst_19 : f32 to vector<16x384xf32>
    %46 = arith.mulf %45, %44 : vector<16x384xf32>
    %47 = math.tanh %46 : vector<16x384xf32>
    %cst_20 = arith.constant 5.000000e-01 : f32
    %48 = vector.broadcast %cst_20 : f32 to vector<16x384xf32>
    %49 = arith.mulf %48, %47 : vector<16x384xf32>
    %cst_21 = arith.constant 5.000000e-01 : f32
    %50 = vector.broadcast %cst_21 : f32 to vector<16x384xf32>
    %51 = arith.addf %49, %50 : vector<16x384xf32>
    %52 = vector.extract_strided_slice %51 {offsets = [0, 0], sizes = [16, 128], strides = [1, 1]} : vector<16x384xf32> to vector<16x128xf32>
    %53 = vector.extract_strided_slice %51 {offsets = [0, 128], sizes = [16, 128], strides = [1, 1]} : vector<16x384xf32> to vector<16x128xf32>
    %54 = vector.extract_strided_slice %51 {offsets = [0, 256], sizes = [16, 128], strides = [1, 1]} : vector<16x384xf32> to vector<16x128xf32>
    %55 = vector.extract_strided_slice %43 {offsets = [0, 384], sizes = [16, 128], strides = [1, 1]} : vector<16x512xf32> to vector<16x128xf32>
    %56 = math.tanh %55 : vector<16x128xf32>
    %57 = arith.mulf %53, %31 : vector<16x128xf32>
    %58 = arith.mulf %52, %56 : vector<16x128xf32>
    %59 = arith.addf %57, %58 : vector<16x128xf32>
    %60 = math.tanh %59 : vector<16x128xf32>
    %61 = arith.mulf %54, %60 : vector<16x128xf32>
    %62 = arith.truncf %61 : vector<16x128xf32> to vector<16x128xbf16>
    %63 = arith.index_cast %38 : i32 to index
    %c0_22 = arith.constant 0 : index
    %64 = vector.load %arg11[%63, %c0_22] : memref<128x128xbf16, #tpu.memory_space<vmem>>, vector<16x128xbf16>
    tpu.vector_store %arg11[%63, %c0_22], %62 {strides = array<i32>} : memref<128x128xbf16, #tpu.memory_space<vmem>>, vector<16x128xbf16>,
    %c2_i32 = arith.constant 2 : i32
    %c16_i32_23 = arith.constant 16 : i32
    %65 = arith.muli %c2_i32, %c16_i32_23 : i32
    %66 = tpu.assume_multiple %65, 16 : i32
    %67 = arith.index_cast %66 : i32 to index
    %c0_24 = arith.constant 0 : index
    %68 = vector.load %arg10[%67, %c0_24] : memref<128x512xf32, #tpu.memory_space<vmem>>, vector<16x512xf32>
    %69 = arith.truncf %61 : vector<16x128xf32> to vector<16x128xbf16>
    %cst_25 = arith.constant dense<0.000000e+00> : vector<16x512xf32>
    %70 = tpu.matmul %69, %7, %cst_25 {dimension_numbers = #tpu.dot_dimension_numbers<[1], [0], [0], [1], [0, 0, 1, 1], [], []>} : vector<16x128xbf16>, vector<128x512xbf16>, vector<16x512xf32> -> vector<16x512xf32>
    %71 = arith.addf %68, %70 : vector<16x512xf32>
    %72 = vector.extract_strided_slice %71 {offsets = [0, 0], sizes = [16, 384], strides = [1, 1]} : vector<16x512xf32> to vector<16x384xf32>
    %cst_26 = arith.constant 5.000000e-01 : f32
    %73 = vector.broadcast %cst_26 : f32 to vector<16x384xf32>
    %74 = arith.mulf %73, %72 : vector<16x384xf32>
    %75 = math.tanh %74 : vector<16x384xf32>
    %cst_27 = arith.constant 5.000000e-01 : f32
    %76 = vector.broadcast %cst_27 : f32 to vector<16x384xf32>
    %77 = arith.mulf %76, %75 : vector<16x384xf32>
    %cst_28 = arith.constant 5.000000e-01 : f32
    %78 = vector.broadcast %cst_28 : f32 to vector<16x384xf32>
    %79 = arith.addf %77, %78 : vector<16x384xf32>
    %80 = vector.extract_strided_slice %79 {offsets = [0, 0], sizes = [16, 128], strides = [1, 1]} : vector<16x384xf32> to vector<16x128xf32>
    %81 = vector.extract_strided_slice %79 {offsets = [0, 128], sizes = [16, 128], strides = [1, 1]} : vector<16x384xf32> to vector<16x128xf32>
    %82 = vector.extract_strided_slice %79 {offsets = [0, 256], sizes = [16, 128], strides = [1, 1]} : vector<16x384xf32> to vector<16x128xf32>
    %83 = vector.extract_strided_slice %71 {offsets = [0, 384], sizes = [16, 128], strides = [1, 1]} : vector<16x512xf32> to vector<16x128xf32>
    %84 = math.tanh %83 : vector<16x128xf32>
    %85 = arith.mulf %81, %59 : vector<16x128xf32>
    %86 = arith.mulf %80, %84 : vector<16x128xf32>
    %87 = arith.addf %85, %86 : vector<16x128xf32>
    %88 = math.tanh %87 : vector<16x128xf32>
    %89 = arith.mulf %82, %88 : vector<16x128xf32>
    %90 = arith.truncf %89 : vector<16x128xf32> to vector<16x128xbf16>
    %91 = arith.index_cast %66 : i32 to index
    %c0_29 = arith.constant 0 : index
    %92 = vector.load %arg11[%91, %c0_29] : memref<128x128xbf16, #tpu.memory_space<vmem>>, vector<16x128xbf16>
    tpu.vector_store %arg11[%91, %c0_29], %90 {strides = array<i32>} : memref<128x128xbf16, #tpu.memory_space<vmem>>, vector<16x128xbf16>,
    %c3_i32 = arith.constant 3 : i32
    %c16_i32_30 = arith.constant 16 : i32
    %93 = arith.muli %c3_i32, %c16_i32_30 : i32
    %94 = tpu.assume_multiple %93, 16 : i32
    %95 = arith.index_cast %94 : i32 to index
    %c0_31 = arith.constant 0 : index
    %96 = vector.load %arg10[%95, %c0_31] : memref<128x512xf32, #tpu.memory_space<vmem>>, vector<16x512xf32>
    %97 = arith.truncf %89 : vector<16x128xf32> to vector<16x128xbf16>
    %cst_32 = arith.constant dense<0.000000e+00> : vector<16x512xf32>
    %98 = tpu.matmul %97, %7, %cst_32 {dimension_numbers = #tpu.dot_dimension_numbers<[1], [0], [0], [1], [0, 0, 1, 1], [], []>} : vector<16x128xbf16>, vector<128x512xbf16>, vector<16x512xf32> -> vector<16x512xf32>
    %99 = arith.addf %96, %98 : vector<16x512xf32>
    %100 = vector.extract_strided_slice %99 {offsets = [0, 0], sizes = [16, 384], strides = [1, 1]} : vector<16x512xf32> to vector<16x384xf32>
    %cst_33 = arith.constant 5.000000e-01 : f32
    %101 = vector.broadcast %cst_33 : f32 to vector<16x384xf32>
    %102 = arith.mulf %101, %100 : vector<16x384xf32>
    %103 = math.tanh %102 : vector<16x384xf32>
    %cst_34 = arith.constant 5.000000e-01 : f32
    %104 = vector.broadcast %cst_34 : f32 to vector<16x384xf32>
    %105 = arith.mulf %104, %103 : vector<16x384xf32>
    %cst_35 = arith.constant 5.000000e-01 : f32
    %106 = vector.broadcast %cst_35 : f32 to vector<16x384xf32>
    %107 = arith.addf %105, %106 : vector<16x384xf32>
    %108 = vector.extract_strided_slice %107 {offsets = [0, 0], sizes = [16, 128], strides = [1, 1]} : vector<16x384xf32> to vector<16x128xf32>
    %109 = vector.extract_strided_slice %107 {offsets = [0, 128], sizes = [16, 128], strides = [1, 1]} : vector<16x384xf32> to vector<16x128xf32>
    %110 = vector.extract_strided_slice %107 {offsets = [0, 256], sizes = [16, 128], strides = [1, 1]} : vector<16x384xf32> to vector<16x128xf32>
    %111 = vector.extract_strided_slice %99 {offsets = [0, 384], sizes = [16, 128], strides = [1, 1]} : vector<16x512xf32> to vector<16x128xf32>
    %112 = math.tanh %111 : vector<16x128xf32>
    %113 = arith.mulf %109, %87 : vector<16x128xf32>
    %114 = arith.mulf %108, %112 : vector<16x128xf32>
    %115 = arith.addf %113, %114 : vector<16x128xf32>
    %116 = math.tanh %115 : vector<16x128xf32>
    %117 = arith.mulf %110, %116 : vector<16x128xf32>
    %118 = arith.truncf %117 : vector<16x128xf32> to vector<16x128xbf16>
    %119 = arith.index_cast %94 : i32 to index
    %c0_36 = arith.constant 0 : index
    %120 = vector.load %arg11[%119, %c0_36] : memref<128x128xbf16, #tpu.memory_space<vmem>>, vector<16x128xbf16>
    tpu.vector_store %arg11[%119, %c0_36], %118 {strides = array<i32>} : memref<128x128xbf16, #tpu.memory_space<vmem>>, vector<16x128xbf16>,
    %c4_i32 = arith.constant 4 : i32
    %c16_i32_37 = arith.constant 16 : i32
    %121 = arith.muli %c4_i32, %c16_i32_37 : i32
    %122 = tpu.assume_multiple %121, 16 : i32
    %123 = arith.index_cast %122 : i32 to index
    %c0_38 = arith.constant 0 : index
    %124 = vector.load %arg10[%123, %c0_38] : memref<128x512xf32, #tpu.memory_space<vmem>>, vector<16x512xf32>
    %125 = arith.truncf %117 : vector<16x128xf32> to vector<16x128xbf16>
    %cst_39 = arith.constant dense<0.000000e+00> : vector<16x512xf32>
    %126 = tpu.matmul %125, %7, %cst_39 {dimension_numbers = #tpu.dot_dimension_numbers<[1], [0], [0], [1], [0, 0, 1, 1], [], []>} : vector<16x128xbf16>, vector<128x512xbf16>, vector<16x512xf32> -> vector<16x512xf32>
    %127 = arith.addf %124, %126 : vector<16x512xf32>
    %128 = vector.extract_strided_slice %127 {offsets = [0, 0], sizes = [16, 384], strides = [1, 1]} : vector<16x512xf32> to vector<16x384xf32>
    %cst_40 = arith.constant 5.000000e-01 : f32
    %129 = vector.broadcast %cst_40 : f32 to vector<16x384xf32>
    %130 = arith.mulf %129, %128 : vector<16x384xf32>
    %131 = math.tanh %130 : vector<16x384xf32>
    %cst_41 = arith.constant 5.000000e-01 : f32
    %132 = vector.broadcast %cst_41 : f32 to vector<16x384xf32>
    %133 = arith.mulf %132, %131 : vector<16x384xf32>
    %cst_42 = arith.constant 5.000000e-01 : f32
    %134 = vector.broadcast %cst_42 : f32 to vector<16x384xf32>
    %135 = arith.addf %133, %134 : vector<16x384xf32>
    %136 = vector.extract_strided_slice %135 {offsets = [0, 0], sizes = [16, 128], strides = [1, 1]} : vector<16x384xf32> to vector<16x128xf32>
    %137 = vector.extract_strided_slice %135 {offsets = [0, 128], sizes = [16, 128], strides = [1, 1]} : vector<16x384xf32> to vector<16x128xf32>
    %138 = vector.extract_strided_slice %135 {offsets = [0, 256], sizes = [16, 128], strides = [1, 1]} : vector<16x384xf32> to vector<16x128xf32>
    %139 = vector.extract_strided_slice %127 {offsets = [0, 384], sizes = [16, 128], strides = [1, 1]} : vector<16x512xf32> to vector<16x128xf32>
    %140 = math.tanh %139 : vector<16x128xf32>
    %141 = arith.mulf %137, %115 : vector<16x128xf32>
    %142 = arith.mulf %136, %140 : vector<16x128xf32>
    %143 = arith.addf %141, %142 : vector<16x128xf32>
    %144 = math.tanh %143 : vector<16x128xf32>
    %145 = arith.mulf %138, %144 : vector<16x128xf32>
    %146 = arith.truncf %145 : vector<16x128xf32> to vector<16x128xbf16>
    %147 = arith.index_cast %122 : i32 to index
    %c0_43 = arith.constant 0 : index
    %148 = vector.load %arg11[%147, %c0_43] : memref<128x128xbf16, #tpu.memory_space<vmem>>, vector<16x128xbf16>
    tpu.vector_store %arg11[%147, %c0_43], %146 {strides = array<i32>} : memref<128x128xbf16, #tpu.memory_space<vmem>>, vector<16x128xbf16>,
    %c5_i32 = arith.constant 5 : i32
    %c16_i32_44 = arith.constant 16 : i32
    %149 = arith.muli %c5_i32, %c16_i32_44 : i32
    %150 = tpu.assume_multiple %149, 16 : i32
    %151 = arith.index_cast %150 : i32 to index
    %c0_45 = arith.constant 0 : index
    %152 = vector.load %arg10[%151, %c0_45] : memref<128x512xf32, #tpu.memory_space<vmem>>, vector<16x512xf32>
    %153 = arith.truncf %145 : vector<16x128xf32> to vector<16x128xbf16>
    %cst_46 = arith.constant dense<0.000000e+00> : vector<16x512xf32>
    %154 = tpu.matmul %153, %7, %cst_46 {dimension_numbers = #tpu.dot_dimension_numbers<[1], [0], [0], [1], [0, 0, 1, 1], [], []>} : vector<16x128xbf16>, vector<128x512xbf16>, vector<16x512xf32> -> vector<16x512xf32>
    %155 = arith.addf %152, %154 : vector<16x512xf32>
    %156 = vector.extract_strided_slice %155 {offsets = [0, 0], sizes = [16, 384], strides = [1, 1]} : vector<16x512xf32> to vector<16x384xf32>
    %cst_47 = arith.constant 5.000000e-01 : f32
    %157 = vector.broadcast %cst_47 : f32 to vector<16x384xf32>
    %158 = arith.mulf %157, %156 : vector<16x384xf32>
    %159 = math.tanh %158 : vector<16x384xf32>
    %cst_48 = arith.constant 5.000000e-01 : f32
    %160 = vector.broadcast %cst_48 : f32 to vector<16x384xf32>
    %161 = arith.mulf %160, %159 : vector<16x384xf32>
    %cst_49 = arith.constant 5.000000e-01 : f32
    %162 = vector.broadcast %cst_49 : f32 to vector<16x384xf32>
    %163 = arith.addf %161, %162 : vector<16x384xf32>
    %164 = vector.extract_strided_slice %163 {offsets = [0, 0], sizes = [16, 128], strides = [1, 1]} : vector<16x384xf32> to vector<16x128xf32>
    %165 = vector.extract_strided_slice %163 {offsets = [0, 128], sizes = [16, 128], strides = [1, 1]} : vector<16x384xf32> to vector<16x128xf32>
    %166 = vector.extract_strided_slice %163 {offsets = [0, 256], sizes = [16, 128], strides = [1, 1]} : vector<16x384xf32> to vector<16x128xf32>
    %167 = vector.extract_strided_slice %155 {offsets = [0, 384], sizes = [16, 128], strides = [1, 1]} : vector<16x512xf32> to vector<16x128xf32>
    %168 = math.tanh %167 : vector<16x128xf32>
    %169 = arith.mulf %165, %143 : vector<16x128xf32>
    %170 = arith.mulf %164, %168 : vector<16x128xf32>
    %171 = arith.addf %169, %170 : vector<16x128xf32>
    %172 = math.tanh %171 : vector<16x128xf32>
    %173 = arith.mulf %166, %172 : vector<16x128xf32>
    %174 = arith.truncf %173 : vector<16x128xf32> to vector<16x128xbf16>
    %175 = arith.index_cast %150 : i32 to index
    %c0_50 = arith.constant 0 : index
    %176 = vector.load %arg11[%175, %c0_50] : memref<128x128xbf16, #tpu.memory_space<vmem>>, vector<16x128xbf16>
    tpu.vector_store %arg11[%175, %c0_50], %174 {strides = array<i32>} : memref<128x128xbf16, #tpu.memory_space<vmem>>, vector<16x128xbf16>,
    %c6_i32 = arith.constant 6 : i32
    %c16_i32_51 = arith.constant 16 : i32
    %177 = arith.muli %c6_i32, %c16_i32_51 : i32
    %178 = tpu.assume_multiple %177, 16 : i32
    %179 = arith.index_cast %178 : i32 to index
    %c0_52 = arith.constant 0 : index
    %180 = vector.load %arg10[%179, %c0_52] : memref<128x512xf32, #tpu.memory_space<vmem>>, vector<16x512xf32>
    %181 = arith.truncf %173 : vector<16x128xf32> to vector<16x128xbf16>
    %cst_53 = arith.constant dense<0.000000e+00> : vector<16x512xf32>
    %182 = tpu.matmul %181, %7, %cst_53 {dimension_numbers = #tpu.dot_dimension_numbers<[1], [0], [0], [1], [0, 0, 1, 1], [], []>} : vector<16x128xbf16>, vector<128x512xbf16>, vector<16x512xf32> -> vector<16x512xf32>
    %183 = arith.addf %180, %182 : vector<16x512xf32>
    %184 = vector.extract_strided_slice %183 {offsets = [0, 0], sizes = [16, 384], strides = [1, 1]} : vector<16x512xf32> to vector<16x384xf32>
    %cst_54 = arith.constant 5.000000e-01 : f32
    %185 = vector.broadcast %cst_54 : f32 to vector<16x384xf32>
    %186 = arith.mulf %185, %184 : vector<16x384xf32>
    %187 = math.tanh %186 : vector<16x384xf32>
    %cst_55 = arith.constant 5.000000e-01 : f32
    %188 = vector.broadcast %cst_55 : f32 to vector<16x384xf32>
    %189 = arith.mulf %188, %187 : vector<16x384xf32>
    %cst_56 = arith.constant 5.000000e-01 : f32
    %190 = vector.broadcast %cst_56 : f32 to vector<16x384xf32>
    %191 = arith.addf %189, %190 : vector<16x384xf32>
    %192 = vector.extract_strided_slice %191 {offsets = [0, 0], sizes = [16, 128], strides = [1, 1]} : vector<16x384xf32> to vector<16x128xf32>
    %193 = vector.extract_strided_slice %191 {offsets = [0, 128], sizes = [16, 128], strides = [1, 1]} : vector<16x384xf32> to vector<16x128xf32>
    %194 = vector.extract_strided_slice %191 {offsets = [0, 256], sizes = [16, 128], strides = [1, 1]} : vector<16x384xf32> to vector<16x128xf32>
    %195 = vector.extract_strided_slice %183 {offsets = [0, 384], sizes = [16, 128], strides = [1, 1]} : vector<16x512xf32> to vector<16x128xf32>
    %196 = math.tanh %195 : vector<16x128xf32>
    %197 = arith.mulf %193, %171 : vector<16x128xf32>
    %198 = arith.mulf %192, %196 : vector<16x128xf32>
    %199 = arith.addf %197, %198 : vector<16x128xf32>
    %200 = math.tanh %199 : vector<16x128xf32>
    %201 = arith.mulf %194, %200 : vector<16x128xf32>
    %202 = arith.truncf %201 : vector<16x128xf32> to vector<16x128xbf16>
    %203 = arith.index_cast %178 : i32 to index
    %c0_57 = arith.constant 0 : index
    %204 = vector.load %arg11[%203, %c0_57] : memref<128x128xbf16, #tpu.memory_space<vmem>>, vector<16x128xbf16>
    tpu.vector_store %arg11[%203, %c0_57], %202 {strides = array<i32>} : memref<128x128xbf16, #tpu.memory_space<vmem>>, vector<16x128xbf16>,
    %c7_i32 = arith.constant 7 : i32
    %c16_i32_58 = arith.constant 16 : i32
    %205 = arith.muli %c7_i32, %c16_i32_58 : i32
    %206 = tpu.assume_multiple %205, 16 : i32
    %207 = arith.index_cast %206 : i32 to index
    %c0_59 = arith.constant 0 : index
    %208 = vector.load %arg10[%207, %c0_59] : memref<128x512xf32, #tpu.memory_space<vmem>>, vector<16x512xf32>
    %209 = arith.truncf %201 : vector<16x128xf32> to vector<16x128xbf16>
    %cst_60 = arith.constant dense<0.000000e+00> : vector<16x512xf32>
    %210 = tpu.matmul %209, %7, %cst_60 {dimension_numbers = #tpu.dot_dimension_numbers<[1], [0], [0], [1], [0, 0, 1, 1], [], []>} : vector<16x128xbf16>, vector<128x512xbf16>, vector<16x512xf32> -> vector<16x512xf32>
    %211 = arith.addf %208, %210 : vector<16x512xf32>
    %212 = vector.extract_strided_slice %211 {offsets = [0, 0], sizes = [16, 384], strides = [1, 1]} : vector<16x512xf32> to vector<16x384xf32>
    %cst_61 = arith.constant 5.000000e-01 : f32
    %213 = vector.broadcast %cst_61 : f32 to vector<16x384xf32>
    %214 = arith.mulf %213, %212 : vector<16x384xf32>
    %215 = math.tanh %214 : vector<16x384xf32>
    %cst_62 = arith.constant 5.000000e-01 : f32
    %216 = vector.broadcast %cst_62 : f32 to vector<16x384xf32>
    %217 = arith.mulf %216, %215 : vector<16x384xf32>
    %cst_63 = arith.constant 5.000000e-01 : f32
    %218 = vector.broadcast %cst_63 : f32 to vector<16x384xf32>
    %219 = arith.addf %217, %218 : vector<16x384xf32>
    %220 = vector.extract_strided_slice %219 {offsets = [0, 0], sizes = [16, 128], strides = [1, 1]} : vector<16x384xf32> to vector<16x128xf32>
    %221 = vector.extract_strided_slice %219 {offsets = [0, 128], sizes = [16, 128], strides = [1, 1]} : vector<16x384xf32> to vector<16x128xf32>
    %222 = vector.extract_strided_slice %219 {offsets = [0, 256], sizes = [16, 128], strides = [1, 1]} : vector<16x384xf32> to vector<16x128xf32>
    %223 = vector.extract_strided_slice %211 {offsets = [0, 384], sizes = [16, 128], strides = [1, 1]} : vector<16x512xf32> to vector<16x128xf32>
    %224 = math.tanh %223 : vector<16x128xf32>
    %225 = arith.mulf %221, %199 : vector<16x128xf32>
    %226 = arith.mulf %220, %224 : vector<16x128xf32>
    %227 = arith.addf %225, %226 : vector<16x128xf32>
    %228 = math.tanh %227 : vector<16x128xf32>
    %229 = arith.mulf %222, %228 : vector<16x128xf32>
    %230 = arith.truncf %229 : vector<16x128xf32> to vector<16x128xbf16>
    %231 = arith.index_cast %206 : i32 to index
    %c0_64 = arith.constant 0 : index
    %232 = vector.load %arg11[%231, %c0_64] : memref<128x128xbf16, #tpu.memory_space<vmem>>, vector<16x128xbf16>
    tpu.vector_store %arg11[%231, %c0_64], %230 {strides = array<i32>} : memref<128x128xbf16, #tpu.memory_space<vmem>>, vector<16x128xbf16>,
    %c8_i32 = arith.constant 8 : i32
    %c0_65 = arith.constant 0 : index
    %c0_66 = arith.constant 0 : index
    %233 = vector.load %arg11[%c0_65, %c0_66] : memref<128x128xbf16, #tpu.memory_space<vmem>>, vector<128x128xbf16>
    %c0_67 = arith.constant 0 : index
    %c0_68 = arith.constant 0 : index
    %234 = vector.load %arg4[%c0_67, %c0_68] : memref<128x512xbf16, #tpu.memory_space<vmem>>, vector<128x512xbf16>
    %cst_69 = arith.constant dense<0.000000e+00> : vector<128x512xf32>
    %235 = tpu.matmul %233, %234, %cst_69 {dimension_numbers = #tpu.dot_dimension_numbers<[1], [0], [0], [1], [0, 0, 1, 1], [], []>} : vector<128x128xbf16>, vector<128x512xbf16>, vector<128x512xf32> -> vector<128x512xf32>
    %c0_70 = arith.constant 0 : index
    %c0_71 = arith.constant 0 : index
    %236 = vector.load %arg6[%c0_70, %c0_71] : memref<1x512xf32, #tpu.memory_space<vmem>>, vector<1x512xf32>
    %237 = vector.broadcast %236 : vector<1x512xf32> to vector<128x512xf32>
    %238 = arith.addf %235, %237 : vector<128x512xf32>
    %c0_72 = arith.constant 0 : index
    %c0_73 = arith.constant 0 : index
    %239 = vector.load %arg10[%c0_72, %c0_73] : memref<128x512xf32, #tpu.memory_space<vmem>>, vector<128x512xf32>
    tpu.vector_store %arg10[%c0_72, %c0_73], %238 {strides = array<i32>} : memref<128x512xf32, #tpu.memory_space<vmem>>, vector<128x512xf32>,
    %c0_74 = arith.constant 0 : index
    %c0_75 = arith.constant 0 : index
    %240 = vector.load %arg5[%c0_74, %c0_75] : memref<128x512xbf16, #tpu.memory_space<vmem>>, vector<128x512xbf16>
    %cst_76 = arith.constant 0.000000e+00 : f32
    %241 = vector.broadcast %cst_76 : f32 to vector<16x128xf32>
    %c0_i32_77 = arith.constant 0 : i32
    %c16_i32_78 = arith.constant 16 : i32
    %242 = arith.muli %c0_i32_77, %c16_i32_78 : i32
    %243 = tpu.assume_multiple %242, 16 : i32
    %244 = arith.index_cast %243 : i32 to index
    %c0_79 = arith.constant 0 : index
    %245 = vector.load %arg10[%244, %c0_79] : memref<128x512xf32, #tpu.memory_space<vmem>>, vector<16x512xf32>
    %246 = arith.truncf %241 : vector<16x128xf32> to vector<16x128xbf16>
    %cst_80 = arith.constant dense<0.000000e+00> : vector<16x512xf32>
    %247 = tpu.matmul %246, %240, %cst_80 {dimension_numbers = #tpu.dot_dimension_numbers<[1], [0], [0], [1], [0, 0, 1, 1], [], []>} : vector<16x128xbf16>, vector<128x512xbf16>, vector<16x512xf32> -> vector<16x512xf32>
    %248 = arith.addf %245, %247 : vector<16x512xf32>
    %249 = vector.extract_strided_slice %248 {offsets = [0, 0], sizes = [16, 384], strides = [1, 1]} : vector<16x512xf32> to vector<16x384xf32>
    %cst_81 = arith.constant 5.000000e-01 : f32
    %250 = vector.broadcast %cst_81 : f32 to vector<16x384xf32>
    %251 = arith.mulf %250, %249 : vector<16x384xf32>
    %252 = math.tanh %251 : vector<16x384xf32>
    %cst_82 = arith.constant 5.000000e-01 : f32
    %253 = vector.broadcast %cst_82 : f32 to vector<16x384xf32>
    %254 = arith.mulf %253, %252 : vector<16x384xf32>
    %cst_83 = arith.constant 5.000000e-01 : f32
    %255 = vector.broadcast %cst_83 : f32 to vector<16x384xf32>
    %256 = arith.addf %254, %255 : vector<16x384xf32>
    %257 = vector.extract_strided_slice %256 {offsets = [0, 0], sizes = [16, 128], strides = [1, 1]} : vector<16x384xf32> to vector<16x128xf32>
    %258 = vector.extract_strided_slice %256 {offsets = [0, 128], sizes = [16, 128], strides = [1, 1]} : vector<16x384xf32> to vector<16x128xf32>
    %259 = vector.extract_strided_slice %256 {offsets = [0, 256], sizes = [16, 128], strides = [1, 1]} : vector<16x384xf32> to vector<16x128xf32>
    %260 = vector.extract_strided_slice %248 {offsets = [0, 384], sizes = [16, 128], strides = [1, 1]} : vector<16x512xf32> to vector<16x128xf32>
    %261 = math.tanh %260 : vector<16x128xf32>
    %262 = arith.mulf %258, %241 : vector<16x128xf32>
    %263 = arith.mulf %257, %261 : vector<16x128xf32>
    %264 = arith.addf %262, %263 : vector<16x128xf32>
    %265 = math.tanh %264 : vector<16x128xf32>
    %266 = arith.mulf %259, %265 : vector<16x128xf32>
    %c1_i32_84 = arith.constant 1 : i32
    %c16_i32_85 = arith.constant 16 : i32
    %267 = arith.muli %c1_i32_84, %c16_i32_85 : i32
    %268 = tpu.assume_multiple %267, 16 : i32
    %269 = arith.index_cast %268 : i32 to index
    %c0_86 = arith.constant 0 : index
    %270 = vector.load %arg10[%269, %c0_86] : memref<128x512xf32, #tpu.memory_space<vmem>>, vector<16x512xf32>
    %271 = arith.truncf %266 : vector<16x128xf32> to vector<16x128xbf16>
    %cst_87 = arith.constant dense<0.000000e+00> : vector<16x512xf32>
    %272 = tpu.matmul %271, %240, %cst_87 {dimension_numbers = #tpu.dot_dimension_numbers<[1], [0], [0], [1], [0, 0, 1, 1], [], []>} : vector<16x128xbf16>, vector<128x512xbf16>, vector<16x512xf32> -> vector<16x512xf32>
    %273 = arith.addf %270, %272 : vector<16x512xf32>
    %274 = vector.extract_strided_slice %273 {offsets = [0, 0], sizes = [16, 384], strides = [1, 1]} : vector<16x512xf32> to vector<16x384xf32>
    %cst_88 = arith.constant 5.000000e-01 : f32
    %275 = vector.broadcast %cst_88 : f32 to vector<16x384xf32>
    %276 = arith.mulf %275, %274 : vector<16x384xf32>
    %277 = math.tanh %276 : vector<16x384xf32>
    %cst_89 = arith.constant 5.000000e-01 : f32
    %278 = vector.broadcast %cst_89 : f32 to vector<16x384xf32>
    %279 = arith.mulf %278, %277 : vector<16x384xf32>
    %cst_90 = arith.constant 5.000000e-01 : f32
    %280 = vector.broadcast %cst_90 : f32 to vector<16x384xf32>
    %281 = arith.addf %279, %280 : vector<16x384xf32>
    %282 = vector.extract_strided_slice %281 {offsets = [0, 0], sizes = [16, 128], strides = [1, 1]} : vector<16x384xf32> to vector<16x128xf32>
    %283 = vector.extract_strided_slice %281 {offsets = [0, 128], sizes = [16, 128], strides = [1, 1]} : vector<16x384xf32> to vector<16x128xf32>
    %284 = vector.extract_strided_slice %281 {offsets = [0, 256], sizes = [16, 128], strides = [1, 1]} : vector<16x384xf32> to vector<16x128xf32>
    %285 = vector.extract_strided_slice %273 {offsets = [0, 384], sizes = [16, 128], strides = [1, 1]} : vector<16x512xf32> to vector<16x128xf32>
    %286 = math.tanh %285 : vector<16x128xf32>
    %287 = arith.mulf %283, %264 : vector<16x128xf32>
    %288 = arith.mulf %282, %286 : vector<16x128xf32>
    %289 = arith.addf %287, %288 : vector<16x128xf32>
    %290 = math.tanh %289 : vector<16x128xf32>
    %291 = arith.mulf %284, %290 : vector<16x128xf32>
    %c2_i32_91 = arith.constant 2 : i32
    %c16_i32_92 = arith.constant 16 : i32
    %292 = arith.muli %c2_i32_91, %c16_i32_92 : i32
    %293 = tpu.assume_multiple %292, 16 : i32
    %294 = arith.index_cast %293 : i32 to index
    %c0_93 = arith.constant 0 : index
    %295 = vector.load %arg10[%294, %c0_93] : memref<128x512xf32, #tpu.memory_space<vmem>>, vector<16x512xf32>
    %296 = arith.truncf %291 : vector<16x128xf32> to vector<16x128xbf16>
    %cst_94 = arith.constant dense<0.000000e+00> : vector<16x512xf32>
    %297 = tpu.matmul %296, %240, %cst_94 {dimension_numbers = #tpu.dot_dimension_numbers<[1], [0], [0], [1], [0, 0, 1, 1], [], []>} : vector<16x128xbf16>, vector<128x512xbf16>, vector<16x512xf32> -> vector<16x512xf32>
    %298 = arith.addf %295, %297 : vector<16x512xf32>
    %299 = vector.extract_strided_slice %298 {offsets = [0, 0], sizes = [16, 384], strides = [1, 1]} : vector<16x512xf32> to vector<16x384xf32>
    %cst_95 = arith.constant 5.000000e-01 : f32
    %300 = vector.broadcast %cst_95 : f32 to vector<16x384xf32>
    %301 = arith.mulf %300, %299 : vector<16x384xf32>
    %302 = math.tanh %301 : vector<16x384xf32>
    %cst_96 = arith.constant 5.000000e-01 : f32
    %303 = vector.broadcast %cst_96 : f32 to vector<16x384xf32>
    %304 = arith.mulf %303, %302 : vector<16x384xf32>
    %cst_97 = arith.constant 5.000000e-01 : f32
    %305 = vector.broadcast %cst_97 : f32 to vector<16x384xf32>
    %306 = arith.addf %304, %305 : vector<16x384xf32>
    %307 = vector.extract_strided_slice %306 {offsets = [0, 0], sizes = [16, 128], strides = [1, 1]} : vector<16x384xf32> to vector<16x128xf32>
    %308 = vector.extract_strided_slice %306 {offsets = [0, 128], sizes = [16, 128], strides = [1, 1]} : vector<16x384xf32> to vector<16x128xf32>
    %309 = vector.extract_strided_slice %306 {offsets = [0, 256], sizes = [16, 128], strides = [1, 1]} : vector<16x384xf32> to vector<16x128xf32>
    %310 = vector.extract_strided_slice %298 {offsets = [0, 384], sizes = [16, 128], strides = [1, 1]} : vector<16x512xf32> to vector<16x128xf32>
    %311 = math.tanh %310 : vector<16x128xf32>
    %312 = arith.mulf %308, %289 : vector<16x128xf32>
    %313 = arith.mulf %307, %311 : vector<16x128xf32>
    %314 = arith.addf %312, %313 : vector<16x128xf32>
    %315 = math.tanh %314 : vector<16x128xf32>
    %316 = arith.mulf %309, %315 : vector<16x128xf32>
    %c3_i32_98 = arith.constant 3 : i32
    %c16_i32_99 = arith.constant 16 : i32
    %317 = arith.muli %c3_i32_98, %c16_i32_99 : i32
    %318 = tpu.assume_multiple %317, 16 : i32
    %319 = arith.index_cast %318 : i32 to index
    %c0_100 = arith.constant 0 : index
    %320 = vector.load %arg10[%319, %c0_100] : memref<128x512xf32, #tpu.memory_space<vmem>>, vector<16x512xf32>
    %321 = arith.truncf %316 : vector<16x128xf32> to vector<16x128xbf16>
    %cst_101 = arith.constant dense<0.000000e+00> : vector<16x512xf32>
    %322 = tpu.matmul %321, %240, %cst_101 {dimension_numbers = #tpu.dot_dimension_numbers<[1], [0], [0], [1], [0, 0, 1, 1], [], []>} : vector<16x128xbf16>, vector<128x512xbf16>, vector<16x512xf32> -> vector<16x512xf32>
    %323 = arith.addf %320, %322 : vector<16x512xf32>
    %324 = vector.extract_strided_slice %323 {offsets = [0, 0], sizes = [16, 384], strides = [1, 1]} : vector<16x512xf32> to vector<16x384xf32>
    %cst_102 = arith.constant 5.000000e-01 : f32
    %325 = vector.broadcast %cst_102 : f32 to vector<16x384xf32>
    %326 = arith.mulf %325, %324 : vector<16x384xf32>
    %327 = math.tanh %326 : vector<16x384xf32>
    %cst_103 = arith.constant 5.000000e-01 : f32
    %328 = vector.broadcast %cst_103 : f32 to vector<16x384xf32>
    %329 = arith.mulf %328, %327 : vector<16x384xf32>
    %cst_104 = arith.constant 5.000000e-01 : f32
    %330 = vector.broadcast %cst_104 : f32 to vector<16x384xf32>
    %331 = arith.addf %329, %330 : vector<16x384xf32>
    %332 = vector.extract_strided_slice %331 {offsets = [0, 0], sizes = [16, 128], strides = [1, 1]} : vector<16x384xf32> to vector<16x128xf32>
    %333 = vector.extract_strided_slice %331 {offsets = [0, 128], sizes = [16, 128], strides = [1, 1]} : vector<16x384xf32> to vector<16x128xf32>
    %334 = vector.extract_strided_slice %331 {offsets = [0, 256], sizes = [16, 128], strides = [1, 1]} : vector<16x384xf32> to vector<16x128xf32>
    %335 = vector.extract_strided_slice %323 {offsets = [0, 384], sizes = [16, 128], strides = [1, 1]} : vector<16x512xf32> to vector<16x128xf32>
    %336 = math.tanh %335 : vector<16x128xf32>
    %337 = arith.mulf %333, %314 : vector<16x128xf32>
    %338 = arith.mulf %332, %336 : vector<16x128xf32>
    %339 = arith.addf %337, %338 : vector<16x128xf32>
    %340 = math.tanh %339 : vector<16x128xf32>
    %341 = arith.mulf %334, %340 : vector<16x128xf32>
    %c4_i32_105 = arith.constant 4 : i32
    %c16_i32_106 = arith.constant 16 : i32
    %342 = arith.muli %c4_i32_105, %c16_i32_106 : i32
    %343 = tpu.assume_multiple %342, 16 : i32
    %344 = arith.index_cast %343 : i32 to index
    %c0_107 = arith.constant 0 : index
    %345 = vector.load %arg10[%344, %c0_107] : memref<128x512xf32, #tpu.memory_space<vmem>>, vector<16x512xf32>
    %346 = arith.truncf %341 : vector<16x128xf32> to vector<16x128xbf16>
    %cst_108 = arith.constant dense<0.000000e+00> : vector<16x512xf32>
    %347 = tpu.matmul %346, %240, %cst_108 {dimension_numbers = #tpu.dot_dimension_numbers<[1], [0], [0], [1], [0, 0, 1, 1], [], []>} : vector<16x128xbf16>, vector<128x512xbf16>, vector<16x512xf32> -> vector<16x512xf32>
    %348 = arith.addf %345, %347 : vector<16x512xf32>
    %349 = vector.extract_strided_slice %348 {offsets = [0, 0], sizes = [16, 384], strides = [1, 1]} : vector<16x512xf32> to vector<16x384xf32>
    %cst_109 = arith.constant 5.000000e-01 : f32
    %350 = vector.broadcast %cst_109 : f32 to vector<16x384xf32>
    %351 = arith.mulf %350, %349 : vector<16x384xf32>
    %352 = math.tanh %351 : vector<16x384xf32>
    %cst_110 = arith.constant 5.000000e-01 : f32
    %353 = vector.broadcast %cst_110 : f32 to vector<16x384xf32>
    %354 = arith.mulf %353, %352 : vector<16x384xf32>
    %cst_111 = arith.constant 5.000000e-01 : f32
    %355 = vector.broadcast %cst_111 : f32 to vector<16x384xf32>
    %356 = arith.addf %354, %355 : vector<16x384xf32>
    %357 = vector.extract_strided_slice %356 {offsets = [0, 0], sizes = [16, 128], strides = [1, 1]} : vector<16x384xf32> to vector<16x128xf32>
    %358 = vector.extract_strided_slice %356 {offsets = [0, 128], sizes = [16, 128], strides = [1, 1]} : vector<16x384xf32> to vector<16x128xf32>
    %359 = vector.extract_strided_slice %356 {offsets = [0, 256], sizes = [16, 128], strides = [1, 1]} : vector<16x384xf32> to vector<16x128xf32>
    %360 = vector.extract_strided_slice %348 {offsets = [0, 384], sizes = [16, 128], strides = [1, 1]} : vector<16x512xf32> to vector<16x128xf32>
    %361 = math.tanh %360 : vector<16x128xf32>
    %362 = arith.mulf %358, %339 : vector<16x128xf32>
    %363 = arith.mulf %357, %361 : vector<16x128xf32>
    %364 = arith.addf %362, %363 : vector<16x128xf32>
    %365 = math.tanh %364 : vector<16x128xf32>
    %366 = arith.mulf %359, %365 : vector<16x128xf32>
    %c5_i32_112 = arith.constant 5 : i32
    %c16_i32_113 = arith.constant 16 : i32
    %367 = arith.muli %c5_i32_112, %c16_i32_113 : i32
    %368 = tpu.assume_multiple %367, 16 : i32
    %369 = arith.index_cast %368 : i32 to index
    %c0_114 = arith.constant 0 : index
    %370 = vector.load %arg10[%369, %c0_114] : memref<128x512xf32, #tpu.memory_space<vmem>>, vector<16x512xf32>
    %371 = arith.truncf %366 : vector<16x128xf32> to vector<16x128xbf16>
    %cst_115 = arith.constant dense<0.000000e+00> : vector<16x512xf32>
    %372 = tpu.matmul %371, %240, %cst_115 {dimension_numbers = #tpu.dot_dimension_numbers<[1], [0], [0], [1], [0, 0, 1, 1], [], []>} : vector<16x128xbf16>, vector<128x512xbf16>, vector<16x512xf32> -> vector<16x512xf32>
    %373 = arith.addf %370, %372 : vector<16x512xf32>
    %374 = vector.extract_strided_slice %373 {offsets = [0, 0], sizes = [16, 384], strides = [1, 1]} : vector<16x512xf32> to vector<16x384xf32>
    %cst_116 = arith.constant 5.000000e-01 : f32
    %375 = vector.broadcast %cst_116 : f32 to vector<16x384xf32>
    %376 = arith.mulf %375, %374 : vector<16x384xf32>
    %377 = math.tanh %376 : vector<16x384xf32>
    %cst_117 = arith.constant 5.000000e-01 : f32
    %378 = vector.broadcast %cst_117 : f32 to vector<16x384xf32>
    %379 = arith.mulf %378, %377 : vector<16x384xf32>
    %cst_118 = arith.constant 5.000000e-01 : f32
    %380 = vector.broadcast %cst_118 : f32 to vector<16x384xf32>
    %381 = arith.addf %379, %380 : vector<16x384xf32>
    %382 = vector.extract_strided_slice %381 {offsets = [0, 0], sizes = [16, 128], strides = [1, 1]} : vector<16x384xf32> to vector<16x128xf32>
    %383 = vector.extract_strided_slice %381 {offsets = [0, 128], sizes = [16, 128], strides = [1, 1]} : vector<16x384xf32> to vector<16x128xf32>
    %384 = vector.extract_strided_slice %381 {offsets = [0, 256], sizes = [16, 128], strides = [1, 1]} : vector<16x384xf32> to vector<16x128xf32>
    %385 = vector.extract_strided_slice %373 {offsets = [0, 384], sizes = [16, 128], strides = [1, 1]} : vector<16x512xf32> to vector<16x128xf32>
    %386 = math.tanh %385 : vector<16x128xf32>
    %387 = arith.mulf %383, %364 : vector<16x128xf32>
    %388 = arith.mulf %382, %386 : vector<16x128xf32>
    %389 = arith.addf %387, %388 : vector<16x128xf32>
    %390 = math.tanh %389 : vector<16x128xf32>
    %391 = arith.mulf %384, %390 : vector<16x128xf32>
    %c6_i32_119 = arith.constant 6 : i32
    %c16_i32_120 = arith.constant 16 : i32
    %392 = arith.muli %c6_i32_119, %c16_i32_120 : i32
    %393 = tpu.assume_multiple %392, 16 : i32
    %394 = arith.index_cast %393 : i32 to index
    %c0_121 = arith.constant 0 : index
    %395 = vector.load %arg10[%394, %c0_121] : memref<128x512xf32, #tpu.memory_space<vmem>>, vector<16x512xf32>
    %396 = arith.truncf %391 : vector<16x128xf32> to vector<16x128xbf16>
    %cst_122 = arith.constant dense<0.000000e+00> : vector<16x512xf32>
    %397 = tpu.matmul %396, %240, %cst_122 {dimension_numbers = #tpu.dot_dimension_numbers<[1], [0], [0], [1], [0, 0, 1, 1], [], []>} : vector<16x128xbf16>, vector<128x512xbf16>, vector<16x512xf32> -> vector<16x512xf32>
    %398 = arith.addf %395, %397 : vector<16x512xf32>
    %399 = vector.extract_strided_slice %398 {offsets = [0, 0], sizes = [16, 384], strides = [1, 1]} : vector<16x512xf32> to vector<16x384xf32>
    %cst_123 = arith.constant 5.000000e-01 : f32
    %400 = vector.broadcast %cst_123 : f32 to vector<16x384xf32>
    %401 = arith.mulf %400, %399 : vector<16x384xf32>
    %402 = math.tanh %401 : vector<16x384xf32>
    %cst_124 = arith.constant 5.000000e-01 : f32
    %403 = vector.broadcast %cst_124 : f32 to vector<16x384xf32>
    %404 = arith.mulf %403, %402 : vector<16x384xf32>
    %cst_125 = arith.constant 5.000000e-01 : f32
    %405 = vector.broadcast %cst_125 : f32 to vector<16x384xf32>
    %406 = arith.addf %404, %405 : vector<16x384xf32>
    %407 = vector.extract_strided_slice %406 {offsets = [0, 0], sizes = [16, 128], strides = [1, 1]} : vector<16x384xf32> to vector<16x128xf32>
    %408 = vector.extract_strided_slice %406 {offsets = [0, 128], sizes = [16, 128], strides = [1, 1]} : vector<16x384xf32> to vector<16x128xf32>
    %409 = vector.extract_strided_slice %406 {offsets = [0, 256], sizes = [16, 128], strides = [1, 1]} : vector<16x384xf32> to vector<16x128xf32>
    %410 = vector.extract_strided_slice %398 {offsets = [0, 384], sizes = [16, 128], strides = [1, 1]} : vector<16x512xf32> to vector<16x128xf32>
    %411 = math.tanh %410 : vector<16x128xf32>
    %412 = arith.mulf %408, %389 : vector<16x128xf32>
    %413 = arith.mulf %407, %411 : vector<16x128xf32>
    %414 = arith.addf %412, %413 : vector<16x128xf32>
    %415 = math.tanh %414 : vector<16x128xf32>
    %416 = arith.mulf %409, %415 : vector<16x128xf32>
    %c7_i32_126 = arith.constant 7 : i32
    %c16_i32_127 = arith.constant 16 : i32
    %417 = arith.muli %c7_i32_126, %c16_i32_127 : i32
    %418 = tpu.assume_multiple %417, 16 : i32
    %419 = arith.index_cast %418 : i32 to index
    %c0_128 = arith.constant 0 : index
    %420 = vector.load %arg10[%419, %c0_128] : memref<128x512xf32, #tpu.memory_space<vmem>>, vector<16x512xf32>
    %421 = arith.truncf %416 : vector<16x128xf32> to vector<16x128xbf16>
    %cst_129 = arith.constant dense<0.000000e+00> : vector<16x512xf32>
    %422 = tpu.matmul %421, %240, %cst_129 {dimension_numbers = #tpu.dot_dimension_numbers<[1], [0], [0], [1], [0, 0, 1, 1], [], []>} : vector<16x128xbf16>, vector<128x512xbf16>, vector<16x512xf32> -> vector<16x512xf32>
    %423 = arith.addf %420, %422 : vector<16x512xf32>
    %424 = vector.extract_strided_slice %423 {offsets = [0, 0], sizes = [16, 384], strides = [1, 1]} : vector<16x512xf32> to vector<16x384xf32>
    %cst_130 = arith.constant 5.000000e-01 : f32
    %425 = vector.broadcast %cst_130 : f32 to vector<16x384xf32>
    %426 = arith.mulf %425, %424 : vector<16x384xf32>
    %427 = math.tanh %426 : vector<16x384xf32>
    %cst_131 = arith.constant 5.000000e-01 : f32
    %428 = vector.broadcast %cst_131 : f32 to vector<16x384xf32>
    %429 = arith.mulf %428, %427 : vector<16x384xf32>
    %cst_132 = arith.constant 5.000000e-01 : f32
    %430 = vector.broadcast %cst_132 : f32 to vector<16x384xf32>
    %431 = arith.addf %429, %430 : vector<16x384xf32>
    %432 = vector.extract_strided_slice %431 {offsets = [0, 0], sizes = [16, 128], strides = [1, 1]} : vector<16x384xf32> to vector<16x128xf32>
    %433 = vector.extract_strided_slice %431 {offsets = [0, 128], sizes = [16, 128], strides = [1, 1]} : vector<16x384xf32> to vector<16x128xf32>
    %434 = vector.extract_strided_slice %431 {offsets = [0, 256], sizes = [16, 128], strides = [1, 1]} : vector<16x384xf32> to vector<16x128xf32>
    %435 = vector.extract_strided_slice %423 {offsets = [0, 384], sizes = [16, 128], strides = [1, 1]} : vector<16x512xf32> to vector<16x128xf32>
    %436 = math.tanh %435 : vector<16x128xf32>
    %437 = arith.mulf %433, %414 : vector<16x128xf32>
    %438 = arith.mulf %432, %436 : vector<16x128xf32>
    %439 = arith.addf %437, %438 : vector<16x128xf32>
    %440 = math.tanh %439 : vector<16x128xf32>
    %441 = arith.mulf %434, %440 : vector<16x128xf32>
    %c8_i32_133 = arith.constant 8 : i32
    %442 = arith.truncf %441 : vector<16x128xf32> to vector<16x128xbf16>
    %c0_134 = arith.constant 0 : index
    %c0_135 = arith.constant 0 : index
    %443 = vector.load %arg7[%c0_134, %c0_135] : memref<128x128xbf16, #tpu.memory_space<vmem>>, vector<128x128xbf16>
    %cst_136 = arith.constant dense<0.000000e+00> : vector<16x128xf32>
    %444 = tpu.matmul %442, %443, %cst_136 {dimension_numbers = #tpu.dot_dimension_numbers<[1], [0], [0], [1], [0, 0, 1, 1], [], []>} : vector<16x128xbf16>, vector<128x128xbf16>, vector<16x128xf32> -> vector<16x128xf32>
    %c0_137 = arith.constant 0 : index
    %c0_138 = arith.constant 0 : index
    %445 = vector.load %arg8[%c0_137, %c0_138] : memref<1x128xf32, #tpu.memory_space<vmem>>, vector<1x128xf32>
    %446 = vector.broadcast %445 : vector<1x128xf32> to vector<16x128xf32>
    %447 = arith.addf %444, %446 : vector<16x128xf32>
    %c0_139 = arith.constant 0 : index
    %c0_140 = arith.constant 0 : index
    %448 = vector.load %arg9[%c0_139, %c0_140] : memref<16x128xf32, #tpu.memory_space<vmem>>, vector<16x128xf32>
    tpu.vector_store %arg9[%c0_139, %c0_140], %447 {strides = array<i32>} : memref<16x128xf32, #tpu.memory_space<vmem>>, vector<16x128xf32>,
    return
  }
}

</mosaic_0001>

<bundles_post_ra>
// kernel: _lstm_forward_impl.1
= control target key start
LH: loop header
LB: loop body
LE: loop exit
PB: predicated region body
PF: predicated region fallthrough
CT: control target
= control target key end

     0   :  { %14 = vsyncpa [#allocation5], 0  ;;  %s6121_s0 = inlined_call_operand.vmem [shape: bf16[128,128], index: 0, kind: input, shape index: {}]   ;;  %s6122_s1 = inlined_call_operand.hbm [shape: bf16[128,512], index: 1, kind: input, shape index: {}]   ;;  %s6123_s2 = inlined_call_operand.hbm [shape: bf16[128,512], index: 2, kind: input, shape index: {}]   ;;  %s6124_s3 = inlined_call_operand.vmem [shape: f32[1,512], index: 3, kind: input, shape index: {}]   ;;  %s6125_s4 = inlined_call_operand.hbm [shape: bf16[128,512], index: 4, kind: input, shape index: {}]   ;;  %s6126_s5 = inlined_call_operand.hbm [shape: bf16[128,512], index: 5, kind: input, shape index: {}]   ;;  %s6127_s6 = inlined_call_operand.vmem [shape: f32[1,512], index: 6, kind: input, shape index: {}]   ;;  %s6128_s7 = inlined_call_operand.vmem [shape: bf16[128,128], index: 7, kind: input, shape index: {}]   ;;  %s6129_s8 = inlined_call_operand.vmem [shape: f32[1,128], index: 8, kind: input, shape index: {}]   ;;  %s6130_s9 = inlined_call_operand.vmem [shape: f32[16,128], index: 9, kind: output, shape index: {}]  }
   0x1   :  { %15 = vsyncpa [#allocation7], 0 }
   0x2   :  { %16 = vsyncpa [#allocation10], 0  ;;  %s36_s11 = sshll.u32 %s6123_s2, 4  ;;  %s4701_s12 = smov [#allocation6]   ;;  %s37_s11 = int_to_ptr.hbm [resolvable:$true] %s36_s11 }
   0x3   :  { %s38_s13 = sshll.u32 %s4701_s12, 4  ;;  %s23_s16 = sshll.u32 %s6122_s1, 4  ;;  %s39_s13 = int_to_ptr.vmem [resolvable:$true] %s38_s13  ;;  %s24_s16 = int_to_ptr.hbm [resolvable:$true] %s23_s16 }
   0x4   :  { %s4702_s17 = smov 256   ;;  %s4703_s18 = smov 16  }
   0x5   :  { %44 = dma.hbm_to_vmem [thread:$0]  %s37_s11, 4096, %s39_s13, [#allocation7], %s4702_s17, %s4702_s17, %s4703_s18  }
   0x6   :  { %s4704_s19 = smov [#allocation4]   ;;  %s51_s23 = sshll.u32 %s6125_s4, 4  ;;  %s52_s23 = int_to_ptr.hbm [resolvable:$true] %s51_s23 }
   0x7   :  { %s25_s20 = sshll.u32 %s4704_s19, 4  ;;  %s64_s25 = sshll.u32 %s6126_s5, 4  ;;  %s26_s20 = int_to_ptr.vmem [resolvable:$true] %s25_s20  ;;  %s65_s25 = int_to_ptr.hbm [resolvable:$true] %s64_s25 }
   0x8   :  { %31 = dma.hbm_to_vmem [thread:$0]  %s24_s16, 4096, %s26_s20, [#allocation5], %s4702_s17, %s4702_s17, %s4703_s18  }
   0x9   :  { %s4705_s26 = smov [#allocation8]   ;;  %s4706_s1 = smov [#allocation9]  }
   0xa   :  { %s53_s27 = sshll.u32 %s4705_s26, 4  ;;  %s66_s28 = sshll.u32 %s4706_s1, 4  ;;  %s54_s27 = int_to_ptr.vmem [resolvable:$true] %s53_s27  ;;  %s67_s28 = int_to_ptr.vmem [resolvable:$true] %s66_s28 }
   0xb   :  { %59 = dma.hbm_to_vmem [thread:$0]  %s52_s23, 4096, %s54_s27, [#allocation7], %s4702_s17, %s4702_s17, %s4703_s18  }
   0xc   :  { %72 = dma.hbm_to_vmem [thread:$0]  %s65_s25, 4096, %s67_s28, [#allocation10], %s4702_s17, %s4702_s17, %s4703_s18  }
   0xd   :  { %4695 = dma.done.wait [#allocation5], 4096  }
   0xe   :  { %4696 = vsyncadd [#allocation5], 4294963200 }
   0xf   :  { %4697 = dma.done.wait [#allocation7], 8192  }
  0x10   :  { %4698 = vsyncadd [#allocation7], 4294959104 }
  0x11   :  { %4699 = dma.done.wait [#allocation10], 4096  }
  0x12   :  { %4700 = vsyncadd [#allocation10], 4294963200  ;;  %v3617_v0 = vld [vmem:[#allocation4 + $0xe0] sm:$0xf]  ;;  %v4117_v1 = vld [vmem:[#allocation4 + $0xec] sm:$0xf0] }
  0x13   :  { %v4115_v2 = vld [vmem:[#allocation4 + $0xe4] sm:$0xf]  ;;  %v3618_v3 = vor.u32 %v4117_v1, %v3617_v0  ;;  %v3619_v4 = vld [vmem:[#allocation4 + $0xf0] sm:$0xf0]  ;;  %v3625_v5 = vld [vmem:[#allocation4 + $0xe8] sm:$0xf] }
  0x14   :  { %v4118_v6 = vld [vmem:[#allocation4 + $0xf4] sm:$0xf0]  ;;  %v3622_v7 = vor.u32 %v4115_v2, %v3619_v4  ;;  %v4116_v9 = vld [vmem:[#allocation4 + $0xec] sm:$0xf]  ;;  %v3627_v10 = vld [vmem:[#allocation4 + $0xf8] sm:$0xf0] }
  0x15   :  { %v3626_v8 = vor.u32 %v4118_v6, %v3625_v5  ;;  %v3601_v11 = vld [vmem:[#allocation4 + $0xc0] sm:$0xf]  ;;  %362 = vmatpush.bf16.msra.mxu0 %v3618_v3  ;;  %v3630_v12 = vor.u32 %v4116_v9, %v3627_v10  ;;  %v4113_v13 = vld [vmem:[#allocation4 + $0xcc] sm:$0xf0]  ;;  %v4111_v14 = vld [vmem:[#allocation4 + $0xc4] sm:$0xf] }
  0x16   :  { %v3603_v15 = vld [vmem:[#allocation4 + $0xd0] sm:$0xf0]  ;;  %411 = vmatpush.bf16.msra.mxu1 %v3622_v7  ;;  %v3602_v16 = vor.u32 %v4113_v13, %v3601_v11  ;;  %v3609_v18 = vld [vmem:[#allocation4 + $0xc8] sm:$0xf]  ;;  %v4114_v19 = vld [vmem:[#allocation4 + $0xd4] sm:$0xf0] }
  0x17   :  { %460 = vmatpush.bf16.msra.mxu2 %v3626_v8  ;;  %v3606_v17 = vor.u32 %v4111_v14, %v3603_v15  ;;  %v4112_v20 = vld [vmem:[#allocation4 + $0xcc] sm:$0xf]  ;;  %509 = vmatpush.bf16.msra.mxu3 %v3630_v12  ;;  %v3610_v21 = vor.u32 %v4114_v19, %v3609_v18  ;;  %v3611_v22 = vld [vmem:[#allocation4 + $0xd8] sm:$0xf0]  ;;  %v3585_v23 = vld [vmem:[#allocation4 + $0xa0] sm:$0xf] }
  0x18   :  { %v4109_v24 = vld [vmem:[#allocation4 + $0xac] sm:$0xf0]  ;;  %v3614_v25 = vor.u32 %v4112_v20, %v3611_v22  ;;  %v4107_v26 = vld [vmem:[#allocation4 + $0xa4] sm:$0xf]  ;;  %v3587_v27 = vld [vmem:[#allocation4 + $0xb0] sm:$0xf0] }
  0x19   :  { %v3593_v28 = vld [vmem:[#allocation4 + $0xa8] sm:$0xf]  ;;  %363 = vmatpush.bf16.msra.mxu0 %v3602_v16  ;;  %v3586_v29 = vor.u32 %v4109_v24, %v3585_v23  ;;  %v4110_v30 = vld [vmem:[#allocation4 + $0xb4] sm:$0xf0]  ;;  %v4108_v31 = vld [vmem:[#allocation4 + $0xac] sm:$0xf]  ;;  %v3590_v33 = vor.u32 %v4107_v26, %v3587_v27 }
  0x1a   :  { %v3595_v32 = vld [vmem:[#allocation4 + $0xb8] sm:$0xf0]  ;;  %412 = vmatpush.bf16.msra.mxu1 %v3606_v17  ;;  %v3594_v34 = vor.u32 %v4110_v30, %v3593_v28  ;;  %v3569_v35 = vld [vmem:[#allocation4 + $0x80] sm:$0xf]  ;;  %v4105_v36 = vld [vmem:[#allocation4 + $0x8c] sm:$0xf0] }
  0x1b   :  { %461 = vmatpush.bf16.msra.mxu2 %v3610_v21  ;;  %v4103_v37 = vld [vmem:[#allocation4 + $0x84] sm:$0xf]  ;;  %510 = vmatpush.bf16.msra.mxu3 %v3614_v25  ;;  %v3598_v38 = vor.u32 %v4108_v31, %v3595_v32  ;;  %v3571_v39 = vld [vmem:[#allocation4 + $0x90] sm:$0xf0]  ;;  %v3577_v40 = vld [vmem:[#allocation4 + $0x88] sm:$0xf]  ;;  %v3570_v44 = vor.u32 %v4105_v36, %v3569_v35 }
  0x1c   :  { %v4106_v41 = vld [vmem:[#allocation4 + $0x94] sm:$0xf0]  ;;  %v4104_v42 = vld [vmem:[#allocation4 + $0x8c] sm:$0xf]  ;;  %v3579_v43 = vld [vmem:[#allocation4 + $0x98] sm:$0xf0]  ;;  %v3574_v45 = vor.u32 %v4103_v37, %v3571_v39 }
  0x1d   :  { %364 = vmatpush.bf16.msra.mxu0 %v3586_v29  ;;  %v3578_v46 = vor.u32 %v4106_v41, %v3577_v40  ;;  %v3553_v47 = vld [vmem:[#allocation4 + $0x60] sm:$0xf]  ;;  %v4101_v48 = vld [vmem:[#allocation4 + $0x6c] sm:$0xf0]  ;;  %v4099_v49 = vld [vmem:[#allocation4 + $0x64] sm:$0xf]  ;;  %v3582_v50 = vor.u32 %v4104_v42, %v3579_v43 }
  0x1e   :  { %413 = vmatpush.bf16.msra.mxu1 %v3590_v33  ;;  %v3555_v51 = vld [vmem:[#allocation4 + $0x70] sm:$0xf0]  ;;  %v3561_v52 = vld [vmem:[#allocation4 + $0x68] sm:$0xf]  ;;  %v4102_v53 = vld [vmem:[#allocation4 + $0x74] sm:$0xf0]  ;;  %v3554_v56 = vor.u32 %v4101_v48, %v3553_v47 }
  0x1f   :  { %462 = vmatpush.bf16.msra.mxu2 %v3594_v34  ;;  %511 = vmatpush.bf16.msra.mxu3 %v3598_v38  ;;  %v4100_v54 = vld [vmem:[#allocation4 + $0x6c] sm:$0xf]  ;;  %v3563_v55 = vld [vmem:[#allocation4 + $0x78] sm:$0xf0]  ;;  %v3558_v57 = vor.u32 %v4099_v49, %v3555_v51  ;;  %v3562_v58 = vor.u32 %v4102_v53, %v3561_v52  ;;  %v3537_v59 = vld [vmem:[#allocation4 + $0x40] sm:$0xf] }
  0x20   :  { %v4097_v60 = vld [vmem:[#allocation4 + $0x4c] sm:$0xf0]  ;;  %v4095_v61 = vld [vmem:[#allocation4 + $0x44] sm:$0xf]  ;;  %v3566_v62 = vor.u32 %v4100_v54, %v3563_v55  ;;  %v3539_v63 = vld [vmem:[#allocation4 + $0x50] sm:$0xf0] }
  0x21   :  { %365 = vmatpush.bf16.msra.mxu0 %v3570_v44  ;;  %v3545_v0 = vld [vmem:[#allocation4 + $0x48] sm:$0xf]  ;;  %v4098_v1 = vld [vmem:[#allocation4 + $0x54] sm:$0xf0]  ;;  %v4096_v2 = vld [vmem:[#allocation4 + $0x4c] sm:$0xf]  ;;  %v3538_v4 = vor.u32 %v4097_v60, %v3537_v59  ;;  %v3542_v5 = vor.u32 %v4095_v61, %v3539_v63 }
  0x22   :  { %414 = vmatpush.bf16.msra.mxu1 %v3574_v45  ;;  %v3547_v3 = vld [vmem:[#allocation4 + $0x58] sm:$0xf0]  ;;  %v3546_v6 = vor.u32 %v4098_v1, %v3545_v0  ;;  %v3521_v7 = vld [vmem:[#allocation4 + $0x20] sm:$0xf]  ;;  %v4093_v8 = vld [vmem:[#allocation4 + $0x2c] sm:$0xf0] }
  0x23   :  { %463 = vmatpush.bf16.msra.mxu2 %v3578_v46  ;;  %512 = vmatpush.bf16.msra.mxu3 %v3582_v50  ;;  %v4091_v9 = vld [vmem:[#allocation4 + $0x24] sm:$0xf]  ;;  %v3550_v10 = vor.u32 %v4096_v2, %v3547_v3  ;;  %v3523_v11 = vld [vmem:[#allocation4 + $0x30] sm:$0xf0]  ;;  %v3529_v12 = vld [vmem:[#allocation4 + $0x28] sm:$0xf]  ;;  %v3522_v16 = vor.u32 %v4093_v8, %v3521_v7 }
  0x24   :  { %v4094_v13 = vld [vmem:[#allocation4 + $0x34] sm:$0xf0]  ;;  %v4092_v14 = vld [vmem:[#allocation4 + $0x2c] sm:$0xf]  ;;  %v3531_v15 = vld [vmem:[#allocation4 + $0x38] sm:$0xf0]  ;;  %v3526_v18 = vor.u32 %v4091_v9, %v3523_v11 }
  0x25   :  { %366 = vmatpush.bf16.msra.mxu0 %v3554_v56  ;;  %v3505_v17 = vld [vmem:[#allocation4] sm:$0xf]  ;;  %v3530_v19 = vor.u32 %v4094_v13, %v3529_v12  ;;  %v4089_v20 = vld [vmem:[#allocation4 + $0xc] sm:$0xf0]  ;;  %v4087_v21 = vld [vmem:[#allocation4 + $0x4] sm:$0xf]  ;;  %v3534_v23 = vor.u32 %v4092_v14, %v3531_v15 }
  0x26   :  { %415 = vmatpush.bf16.msra.mxu1 %v3558_v57  ;;  %v3507_v22 = vld [vmem:[#allocation4 + $0x10] sm:$0xf0]  ;;  %v3513_v24 = vld [vmem:[#allocation4 + $0x8] sm:$0xf]  ;;  %v4090_v25 = vld [vmem:[#allocation4 + $0x14] sm:$0xf0]  ;;  %v3506_v30 = vor.u32 %v4089_v20, %v3505_v17 }
  0x27   :  { %464 = vmatpush.bf16.msra.mxu2 %v3562_v58  ;;  %513 = vmatpush.bf16.msra.mxu3 %v3566_v62  ;;  %v4088_v26 = vld [vmem:[#allocation4 + $0xc] sm:$0xf]  ;;  %v3515_v27 = vld [vmem:[#allocation4 + $0x18] sm:$0xf0]  ;;  %v3745_v28 = vld [vmem:[#allocation6 + $0xe0] sm:$0xf]  ;;  %v3510_v33 = vor.u32 %v4087_v21, %v3507_v22  ;;  %v3514_v34 = vor.u32 %v4090_v25, %v3513_v24 }
  0x28   :  { %v4149_v29 = vld [vmem:[#allocation6 + $0xec] sm:$0xf0]  ;;  %v4147_v31 = vld [vmem:[#allocation6 + $0xe4] sm:$0xf]  ;;  %v3747_v32 = vld [vmem:[#allocation6 + $0xf0] sm:$0xf0]  ;;  %v3518_v36 = vor.u32 %v4088_v26, %v3515_v27 }
  0x29   :  { %367 = vmatpush.bf16.msra.mxu0 %v3538_v4  ;;  %v4079_v35 = vld [vmem:[%s6121_s0] sm:$0xff]  ;;  %v4773_v37 = vor.u32 %v4149_v29, %v3745_v28  ;;  %v4148_v38 = vld [vmem:[#allocation6 + $0xec] sm:$0xf]  ;;  %v3753_v39 = vld [vmem:[#allocation6 + $0xe8] sm:$0xf]  ;;  %v4775_v41 = vor.u32 %v4147_v31, %v3747_v32 }
  0x2a   :  { %416 = vmatpush.bf16.msra.mxu1 %v3542_v5  ;;  %v4150_v40 = vld [vmem:[#allocation6 + $0xf4] sm:$0xf0]  ;;  %v3755_v42 = vld [vmem:[#allocation6 + $0xf8] sm:$0xf0]  ;;  %v3729_v43 = vld [vmem:[#allocation6 + $0xc0] sm:$0xf] }
  0x2b   :  { %465 = vmatpush.bf16.msra.mxu2 %v3546_v6  ;;  %514 = vmatpush.bf16.msra.mxu3 %v3550_v10  ;;  %v4145_v44 = vld [vmem:[#allocation6 + $0xcc] sm:$0xf0]  ;;  %v4143_v45 = vld [vmem:[#allocation6 + $0xc4] sm:$0xf]  ;;  %v3731_v46 = vld [vmem:[#allocation6 + $0xd0] sm:$0xf0]  ;;  %v4777_v47 = vor.u32 %v4150_v40, %v3753_v39  ;;  %v4780_v48 = vor.u32 %v4148_v38, %v3755_v42 }
  0x2c   :  { %v4782_v49 = vor.u32 %v4145_v44, %v3729_v43  ;;  %v3737_v50 = vld [vmem:[#allocation6 + $0xc8] sm:$0xf]  ;;  %v4146_v51 = vld [vmem:[#allocation6 + $0xd4] sm:$0xf0]  ;;  %v4785_v52 = vor.u32 %v4143_v45, %v3731_v46  ;;  %v4144_v53 = vld [vmem:[#allocation6 + $0xcc] sm:$0xf] }
  0x2d   :  { %368 = vmatpush.bf16.msra.mxu0 %v3522_v16  ;;  %v3739_v54 = vld [vmem:[#allocation6 + $0xd8] sm:$0xf0]  ;;  %v4788_v55 = vor.u32 %v4146_v51, %v3737_v50  ;;  %v3713_v56 = vld [vmem:[#allocation6 + $0xa0] sm:$0xf]  ;;  %v4141_v57 = vld [vmem:[#allocation6 + $0xac] sm:$0xf0] }
  0x2e   :  { %417 = vmatpush.bf16.msra.mxu1 %v3526_v18  ;;  %v4139_v58 = vld [vmem:[#allocation6 + $0xa4] sm:$0xf]  ;;  %v4792_v59 = vor.u32 %v4144_v53, %v3739_v54  ;;  %v4794_v60 = vor.u32 %v4141_v57, %v3713_v56  ;;  %v3715_v61 = vld [vmem:[#allocation6 + $0xb0] sm:$0xf0]  ;;  %v4140_v62 = vld [vmem:[#allocation6 + $0xac] sm:$0xf] }
  0x2f   :  { %466 = vmatpush.bf16.msra.mxu2 %v3530_v19  ;;  %515 = vmatpush.bf16.msra.mxu3 %v3534_v23  ;;  %v4797_v63 = vor.u32 %v4139_v58, %v3715_v61  ;;  %v3723_v0 = vld [vmem:[#allocation6 + $0xb8] sm:$0xf0]  ;;  %v3721_v1 = vld [vmem:[#allocation6 + $0xa8] sm:$0xf]  ;;  %v4142_v2 = vld [vmem:[#allocation6 + $0xb4] sm:$0xf0] }
  0x30   :  { %v4800_v3 = vor.u32 %v4142_v2, %v3721_v1  ;;  %v4804_v4 = vor.u32 %v4140_v62, %v3723_v0  ;;  %v4080_v5 = vld [vmem:[%s6121_s0 + $0x8] sm:$0xff]  ;;  %v3697_v6 = vld [vmem:[#allocation6 + $0x80] sm:$0xf]  ;;  %v4137_v7 = vld [vmem:[#allocation6 + $0x8c] sm:$0xf0] }
  0x31   :  { %369 = vmatpush.bf16.msra.mxu0 %v3506_v30  ;;  %v4135_v8 = vld [vmem:[#allocation6 + $0x84] sm:$0xf]  ;;  %v4812_v9 = vor.u32 %v4137_v7, %v3697_v6  ;;  %v3699_v10 = vld [vmem:[#allocation6 + $0x90] sm:$0xf0]  ;;  %v4136_v11 = vld [vmem:[#allocation6 + $0x8c] sm:$0xf] }
  0x32   :  { %418 = vmatpush.bf16.msra.mxu1 %v3510_v33  ;;  %v3707_v12 = vld [vmem:[#allocation6 + $0x98] sm:$0xf0]  ;;  %v4814_v13 = vor.u32 %v4135_v8, %v3699_v10  ;;  %v3705_v15 = vld [vmem:[#allocation6 + $0x88] sm:$0xf]  ;;  %v4138_v16 = vld [vmem:[#allocation6 + $0x94] sm:$0xf0] }
  0x33   :  { %467 = vmatpush.bf16.msra.mxu2 %v3514_v34  ;;  %516 = vmatpush.bf16.msra.mxu3 %v3518_v36  ;;  %v4816_v14 = vor.u32 %v4136_v11, %v3707_v12  ;;  %v4819_v17 = vor.u32 %v4138_v16, %v3705_v15  ;;  %v4081_v18 = vld [vmem:[%s6121_s0 + $0x10] sm:$0xff]  ;;  %v3681_v19 = vld [vmem:[#allocation6 + $0x60] sm:$0xf]  ;;  %v4131_v21 = vld [vmem:[#allocation6 + $0x64] sm:$0xf] }
  0x34   :  { %370 = vmatmul.bf16.vlgmr.msra.gmra.mxu0 %v4079_v35  ;;  %v4133_v20 = vld [vmem:[#allocation6 + $0x6c] sm:$0xf0]  ;;  %v3683_v23 = vld [vmem:[#allocation6 + $0x70] sm:$0xf0]  ;;  %v4132_v24 = vld [vmem:[#allocation6 + $0x6c] sm:$0xf] }
  0x35   :  { %825 = vmatpush.bf16.msrb.mxu0 %v4773_v37  ;;  %419 = vmatmul.bf16.vlgmr.msra.gmra.mxu1 %v4079_v35  ;;  %v4827_v22 = vor.u32 %v4133_v20, %v3681_v19  ;;  %v3691_v25 = vld [vmem:[#allocation6 + $0x78] sm:$0xf0]  ;;  %v4829_v26 = vor.u32 %v4131_v21, %v3683_v23  ;;  %v3689_v28 = vld [vmem:[#allocation6 + $0x68] sm:$0xf]  ;;  %v4134_v29 = vld [vmem:[#allocation6 + $0x74] sm:$0xf0] }
  0x36   :  { %839 = vmatpush.bf16.msrb.mxu1 %v4775_v41  ;;  %468 = vmatmul.bf16.vlgmr.msra.gmra.mxu2 %v4079_v35  ;;  %v4831_v27 = vor.u32 %v4132_v24, %v3691_v25  ;;  %v4834_v30 = vor.u32 %v4134_v29, %v3689_v28  ;;  %v4082_v31 = vld [vmem:[%s6121_s0 + $0x18] sm:$0xff]  ;;  %v3665_v32 = vld [vmem:[#allocation6 + $0x40] sm:$0xf]  ;;  %v4129_v33 = vld [vmem:[#allocation6 + $0x4c] sm:$0xf0]  ;;  %v6131_v29 = vmov 0  }
  0x37   :  { %517 = vmatmul.bf16.vlgmr.msra.gmra.mxu3 %v4079_v35  ;;  %853 = vmatpush.bf16.msrb.mxu2 %v4777_v47  ;;  %v4127_v34 = vld [vmem:[#allocation6 + $0x44] sm:$0xf]  ;;  %v4842_v35 = vor.u32 %v4129_v33, %v3665_v32  ;;  %v3667_v36 = vld [vmem:[#allocation6 + $0x50] sm:$0xf0]  ;;  %v4128_v38 = vld [vmem:[#allocation6 + $0x4c] sm:$0xf] }
  0x38   :  { %867 = vmatpush.bf16.msrb.mxu3 %v4780_v48  ;;  %v3675_v39 = vld [vmem:[#allocation6 + $0x58] sm:$0xf0]  ;;  %v4844_v40 = vor.u32 %v4127_v34, %v3667_v36  ;;  %v3673_v43 = vld [vmem:[#allocation6 + $0x48] sm:$0xf]  ;;  %v4130_v44 = vld [vmem:[#allocation6 + $0x54] sm:$0xf0] }
  0x39   :  { %826 = vmatpush.bf16.msrb.mxu0 %v4782_v49  ;;  %v4846_v42 = vor.u32 %v4128_v38, %v3675_v39  ;;  %v4849_v45 = vor.u32 %v4130_v44, %v3673_v43  ;;  %v4083_v46 = vld [vmem:[%s6121_s0 + $0x20] sm:$0xff]  ;;  %v4125_v51 = vld [vmem:[#allocation6 + $0x2c] sm:$0xf0]  ;;  %v3651_v56 = vld [vmem:[#allocation6 + $0x30] sm:$0xf0] }
  0x3a   :  { %840 = vmatpush.bf16.msrb.mxu1 %v4785_v52  ;;  %v3649_v50 = vld [vmem:[#allocation6 + $0x20] sm:$0xf]  ;;  %v4123_v53 = vld [vmem:[#allocation6 + $0x24] sm:$0xf]  ;;  %v4124_v57 = vld [vmem:[#allocation6 + $0x2c] sm:$0xf] }
  0x3b   :  { %854 = vmatpush.bf16.msrb.mxu2 %v4788_v55  ;;  %v4857_v54 = vor.u32 %v4125_v51, %v3649_v50  ;;  %v3659_v58 = vld [vmem:[#allocation6 + $0x38] sm:$0xf0]  ;;  %v4859_v61 = vor.u32 %v4123_v53, %v3651_v56  ;;  %v3657_v0 = vld [vmem:[#allocation6 + $0x28] sm:$0xf]  ;;  %v4126_v1 = vld [vmem:[#allocation6 + $0x34] sm:$0xf0] }
  0x3c   :  { %868 = vmatpush.bf16.msrb.mxu3 %v4792_v59  ;;  %v4861_v62 = vor.u32 %v4124_v57, %v3659_v58  ;;  %v4864_v2 = vor.u32 %v4126_v1, %v3657_v0  ;;  %v3633_v6 = vld [vmem:[#allocation6] sm:$0xf]  ;;  %v4121_v7 = vld [vmem:[#allocation6 + $0xc] sm:$0xf0]  ;;  %v4119_v8 = vld [vmem:[#allocation6 + $0x4] sm:$0xf] }
  0x3d   :  { %827 = vmatpush.bf16.msrb.mxu0 %v4794_v60  ;;  %v4872_v10 = vor.u32 %v4121_v7, %v3633_v6  ;;  %v3635_v11 = vld [vmem:[#allocation6 + $0x10] sm:$0xf0]  ;;  %v4120_v12 = vld [vmem:[#allocation6 + $0xc] sm:$0xf]  ;;  %v3643_v15 = vld [vmem:[#allocation6 + $0x18] sm:$0xf0] }
  0x3e   :  { %841 = vmatpush.bf16.msrb.mxu1 %v4797_v63  ;;  %v4874_v16 = vor.u32 %v4119_v8, %v3635_v11  ;;  %v3641_v19 = vld [vmem:[#allocation6 + $0x8] sm:$0xf]  ;;  %v4122_v20 = vld [vmem:[#allocation6 + $0x14] sm:$0xf0]  ;;  %v4085_v23 = vld [vmem:[%s6121_s0 + $0x30] sm:$0xff] }
  0x3f   :  { %855 = vmatpush.bf16.msrb.mxu2 %v4800_v3  ;;  %v4879_v21 = vor.u32 %v4122_v20, %v3641_v19  ;;  %v4086_v24 = vld [vmem:[%s6121_s0 + $0x38] sm:$0xff] }
  0x40   :  { %869 = vmatpush.bf16.msrb.mxu3 %v4804_v4 }
  0x41   :  { %828 = vmatpush.bf16.msrb.mxu0 %v4812_v9 }
  0x42   :  { %842 = vmatpush.bf16.msrb.mxu1 %v4814_v13 }
  0x43   :  { %856 = vmatpush.bf16.msrb.mxu2 %v4819_v17 }
  0x44   :  { %375 = vmatmul.bf16.gmra.mxu0 %v4080_v5  ;;  %870 = vmatpush.bf16.msrb.mxu3 %v4816_v14 }
  0x45   :  { %424 = vmatmul.bf16.gmra.mxu1 %v4080_v5  ;;  %829 = vmatpush.bf16.msrb.mxu0 %v4827_v22 }
  0x46   :  { %473 = vmatmul.bf16.gmra.mxu2 %v4080_v5  ;;  %843 = vmatpush.bf16.msrb.mxu1 %v4829_v26 }
  0x47   :  { %522 = vmatmul.bf16.gmra.mxu3 %v4080_v5  ;;  %857 = vmatpush.bf16.msrb.mxu2 %v4834_v30  ;;  %v4084_v5 = vld [vmem:[%s6121_s0 + $0x28] sm:$0xff] }
  0x48   :  { %871 = vmatpush.bf16.msrb.mxu3 %v4831_v27 }
  0x49   :  { %830 = vmatpush.bf16.msrb.mxu0 %v4842_v35 }
  0x4a   :  { %844 = vmatpush.bf16.msrb.mxu1 %v4844_v40 }
  0x4b   :  { %858 = vmatpush.bf16.msrb.mxu2 %v4849_v45 }
  0x4c   :  { %872 = vmatpush.bf16.msrb.mxu3 %v4846_v42 }
  0x4d   :  { %831 = vmatpush.bf16.msrb.mxu0 %v4857_v54 }
  0x4e   :  { %845 = vmatpush.bf16.msrb.mxu1 %v4859_v61 }
  0x4f   :  { %859 = vmatpush.bf16.msrb.mxu2 %v4864_v2 }
  0x50   :  { %873 = vmatpush.bf16.msrb.mxu3 %v4861_v62 }
  0x51   :  { %832 = vmatpush.bf16.msrb.mxu0 %v4872_v10 }
  0x52   :  { %846 = vmatpush.bf16.msrb.mxu1 %v4874_v16 }
  0x53   :  { %860 = vmatpush.bf16.msrb.mxu2 %v4879_v21 }
  0x54   :  { %380 = vmatmul.bf16.gmra.mxu0 %v4081_v18 }
  0x55   :  { %429 = vmatmul.bf16.gmra.mxu1 %v4081_v18  ;;  %946 = vmatpush.bf16.msra.mxu0 %v4773_v37 }
  0x56   :  { %478 = vmatmul.bf16.gmra.mxu2 %v4081_v18  ;;  %960 = vmatpush.bf16.msra.mxu1 %v4775_v41 }
  0x57   :  { %527 = vmatmul.bf16.gmra.mxu3 %v4081_v18  ;;  %v4876_v18 = vor.u32 %v4120_v12, %v3643_v15  ;;  %974 = vmatpush.bf16.msra.mxu2 %v4777_v47 }
  0x59   :  { %874 = vmatpush.bf16.msrb.mxu3 %v4876_v18  ;;  %947 = vmatpush.bf16.msra.mxu0 %v4782_v49 }
  0x5a   :  { %961 = vmatpush.bf16.msra.mxu1 %v4785_v52 }
  0x5b   :  { %975 = vmatpush.bf16.msra.mxu2 %v4788_v55 }
  0x5d   :  { %988 = vmatpush.bf16.msra.mxu3 %v4780_v48  ;;  %948 = vmatpush.bf16.msra.mxu0 %v4794_v60 }
  0x5e   :  { %962 = vmatpush.bf16.msra.mxu1 %v4797_v63 }
  0x5f   :  { %976 = vmatpush.bf16.msra.mxu2 %v4800_v3 }
  0x61   :  { %989 = vmatpush.bf16.msra.mxu3 %v4792_v59  ;;  %949 = vmatpush.bf16.msra.mxu0 %v4812_v9 }
  0x62   :  { %963 = vmatpush.bf16.msra.mxu1 %v4814_v13 }
  0x63   :  { %977 = vmatpush.bf16.msra.mxu2 %v4819_v17 }
  0x64   :  { %385 = vmatmul.bf16.gmra.mxu0 %v4082_v31 }
  0x65   :  { %434 = vmatmul.bf16.gmra.mxu1 %v4082_v31  ;;  %990 = vmatpush.bf16.msra.mxu3 %v4804_v4 }
  0x66   :  { %483 = vmatmul.bf16.gmra.mxu2 %v4082_v31  ;;  %950 = vmatpush.bf16.msra.mxu0 %v4827_v22 }
  0x67   :  { %532 = vmatmul.bf16.gmra.mxu3 %v4082_v31  ;;  %964 = vmatpush.bf16.msra.mxu1 %v4829_v26 }
  0x68   :  { %978 = vmatpush.bf16.msra.mxu2 %v4834_v30 }
  0x69   :  { %991 = vmatpush.bf16.msra.mxu3 %v4816_v14 }
  0x6a   :  { %951 = vmatpush.bf16.msra.mxu0 %v4842_v35 }
  0x6b   :  { %965 = vmatpush.bf16.msra.mxu1 %v4844_v40 }
  0x6c   :  { %979 = vmatpush.bf16.msra.mxu2 %v4849_v45 }
  0x6d   :  { %992 = vmatpush.bf16.msra.mxu3 %v4831_v27 }
  0x6e   :  { %952 = vmatpush.bf16.msra.mxu0 %v4857_v54 }
  0x6f   :  { %966 = vmatpush.bf16.msra.mxu1 %v4859_v61 }
  0x70   :  { %980 = vmatpush.bf16.msra.mxu2 %v4864_v2 }
  0x71   :  { %993 = vmatpush.bf16.msra.mxu3 %v4846_v42 }
  0x72   :  { %953 = vmatpush.bf16.msra.mxu0 %v4872_v10 }
  0x73   :  { %967 = vmatpush.bf16.msra.mxu1 %v4874_v16 }
  0x74   :  { %390 = vmatmul.bf16.gmra.mxu0 %v4083_v46  ;;  %981 = vmatpush.bf16.msra.mxu2 %v4879_v21 }
  0x75   :  { %439 = vmatmul.bf16.gmra.mxu1 %v4083_v46  ;;  %994 = vmatpush.bf16.msra.mxu3 %v4861_v62 }
  0x76   :  { %488 = vmatmul.bf16.gmra.mxu2 %v4083_v46 }
  0x77   :  { %537 = vmatmul.bf16.gmra.mxu3 %v4083_v46 }
  0x79   :  { %995 = vmatpush.bf16.msra.mxu3 %v4876_v18 }
  0x84   :  { %395 = vmatmul.bf16.gmra.mxu0 %v4084_v5 }
  0x85   :  { %444 = vmatmul.bf16.gmra.mxu1 %v4084_v5 }
  0x86   :  { %493 = vmatmul.bf16.gmra.mxu2 %v4084_v5 }
  0x87   :  { %542 = vmatmul.bf16.gmra.mxu3 %v4084_v5 }
  0x94   :  { %400 = vmatmul.bf16.gmra.mxu0 %v4085_v23 }
  0x95   :  { %449 = vmatmul.bf16.gmra.mxu1 %v4085_v23 }
  0x96   :  { %498 = vmatmul.bf16.gmra.mxu2 %v4085_v23 }
  0x97   :  { %547 = vmatmul.bf16.gmra.mxu3 %v4085_v23 }
  0xa4   :  { %405 = vmatmul.bf16.gmra.mxu0 %v4086_v24 }
  0xa5   :  { %454 = vmatmul.bf16.gmra.mxu1 %v4086_v24 }
  0xa6   :  { %503 = vmatmul.bf16.gmra.mxu2 %v4086_v24 }
  0xa7   :  { %552 = vmatmul.bf16.gmra.mxu3 %v4086_v24 }
  0xb1   :  { %v4922_v25 = vpop.f32.mrf.mxu0 }
  0xb2   :  { %v4924_v28 = vpop.f32.mrf.mxu1 }
  0xb4   :  { %833 = vmatmul.bf16.vlgmr.msrb.gmra.mxu0 %v6131_v29 }
  0xb5   :  { %847 = vmatmul.bf16.vlgmr.msrb.gmra.mxu1 %v6131_v29  ;;  %1068 = vmatpush.bf16.msrb.mxu0 %v4773_v37 }
  0xb6   :  { %861 = vmatmul.bf16.vlgmr.msrb.gmra.mxu2 %v6131_v29  ;;  %1082 = vmatpush.bf16.msrb.mxu1 %v4775_v41 }
  0xb7   :  { %875 = vmatmul.bf16.vlgmr.msrb.gmra.mxu3 %v6131_v29  ;;  %1096 = vmatpush.bf16.msrb.mxu2 %v4777_v47 }
  0xb8   :  { %1110 = vmatpush.bf16.msrb.mxu3 %v4780_v48 }
  0xb9   :  { %v4933_v31 = vpop.f32.mrf.mxu2  ;;  %v4938_v33 = vpop.f32.mrf.mxu0  ;;  %1069 = vmatpush.bf16.msrb.mxu0 %v4782_v49 }
  0xba   :  { %v4936_v32 = vpop.f32.mrf.mxu3  ;;  %v4940_v34 = vpop.f32.mrf.mxu1  ;;  %1083 = vmatpush.bf16.msrb.mxu1 %v4785_v52 }
  0xbb   :  { %1097 = vmatpush.bf16.msrb.mxu2 %v4788_v55 }
  0xbc   :  { %1111 = vmatpush.bf16.msrb.mxu3 %v4792_v59 }
  0xbd   :  { %1070 = vmatpush.bf16.msrb.mxu0 %v4794_v60 }
  0xbe   :  { %1084 = vmatpush.bf16.msrb.mxu1 %v4797_v63 }
  0xbf   :  { %1098 = vmatpush.bf16.msrb.mxu2 %v4800_v3 }
  0xc0   :  { %1112 = vmatpush.bf16.msrb.mxu3 %v4804_v4 }
  0xc1   :  { %v4949_v36 = vpop.f32.mrf.mxu2  ;;  %v4954_v39 = vpop.f32.mrf.mxu0  ;;  %1071 = vmatpush.bf16.msrb.mxu0 %v4812_v9 }
  0xc2   :  { %v4952_v38 = vpop.f32.mrf.mxu3  ;;  %v4956_v43 = vpop.f32.mrf.mxu1  ;;  %1085 = vmatpush.bf16.msrb.mxu1 %v4814_v13 }
  0xc3   :  { %1099 = vmatpush.bf16.msrb.mxu2 %v4819_v17 }
  0xc4   :  { %1113 = vmatpush.bf16.msrb.mxu3 %v4816_v14 }
  0xc5   :  { %1072 = vmatpush.bf16.msrb.mxu0 %v4827_v22 }
  0xc6   :  { %1086 = vmatpush.bf16.msrb.mxu1 %v4829_v26 }
  0xc7   :  { %1100 = vmatpush.bf16.msrb.mxu2 %v4834_v30 }
  0xc8   :  { %1114 = vmatpush.bf16.msrb.mxu3 %v4831_v27 }
  0xc9   :  { %v4965_v44 = vpop.f32.mrf.mxu2  ;;  %v4970_v50 = vpop.f32.mrf.mxu0  ;;  %1073 = vmatpush.bf16.msrb.mxu0 %v4842_v35 }
  0xca   :  { %v4968_v46 = vpop.f32.mrf.mxu3  ;;  %v4972_v51 = vpop.f32.mrf.mxu1  ;;  %1087 = vmatpush.bf16.msrb.mxu1 %v4844_v40 }
  0xcb   :  { %6135 = vst [vmem:[#allocation14_spill] sm:$0xff] %v4972_v51  ;;  %1101 = vmatpush.bf16.msrb.mxu2 %v4849_v45 }
  0xcc   :  { %1115 = vmatpush.bf16.msrb.mxu3 %v4846_v42 }
  0xcd   :  { %1074 = vmatpush.bf16.msrb.mxu0 %v4857_v54 }
  0xce   :  { %1088 = vmatpush.bf16.msrb.mxu1 %v4859_v61 }
  0xcf   :  { %1102 = vmatpush.bf16.msrb.mxu2 %v4864_v2 }
  0xd0   :  { %1116 = vmatpush.bf16.msrb.mxu3 %v4861_v62 }
  0xd1   :  { %v4981_v53 = vpop.f32.mrf.mxu2  ;;  %v4986_v57 = vpop.f32.mrf.mxu0  ;;  %1075 = vmatpush.bf16.msrb.mxu0 %v4872_v10 }
  0xd2   :  { %6136 = vst [vmem:[#allocation15_spill] sm:$0xff] %v4981_v53  ;;  %v4984_v56 = vpop.f32.mrf.mxu3  ;;  %v4988_v58 = vpop.f32.mrf.mxu1  ;;  %1089 = vmatpush.bf16.msrb.mxu1 %v4874_v16 }
  0xd3   :  { %6137 = vst [vmem:[#allocation16_spill] sm:$0xff] %v4984_v56  ;;  %1103 = vmatpush.bf16.msrb.mxu2 %v4879_v21 }
  0xd4   :  { %6138 = vst [vmem:[#allocation17_spill] sm:$0xff] %v4986_v57  ;;  %1117 = vmatpush.bf16.msrb.mxu3 %v4876_v18 }
  0xd5   :  { %6139 = vst [vmem:[#allocation18_spill] sm:$0xff] %v4988_v58 }
  0xd9   :  { %v4994_v0 = vpop.f32.mrf.mxu2  ;;  %v4998_v5 = vpop.f32.mrf.mxu0 }
  0xda   :  { %6140 = vst [vmem:[#allocation19_spill] sm:$0xff] %v4994_v0  ;;  %v4996_v1 = vpop.f32.mrf.mxu3  ;;  %v5000_v6 = vpop.f32.mrf.mxu1 }
  0xdb   :  { %6141 = vst [vmem:[#allocation20_spill] sm:$0xff] %v4996_v1 }
  0xdc   :  { %6142 = vst [vmem:[#allocation21_spill] sm:$0xff] %v4998_v5 }
  0xdd   :  { %6143 = vst [vmem:[#allocation22_spill] sm:$0xff] %v5000_v6 }
  0xe1   :  { %v5002_v7 = vpop.f32.mrf.mxu2  ;;  %v5006_v11 = vpop.f32.mrf.mxu0 }
  0xe2   :  { %6144 = vst [vmem:[#allocation23_spill] sm:$0xff] %v5002_v7  ;;  %v5004_v8 = vpop.f32.mrf.mxu3  ;;  %v5008_v12 = vpop.f32.mrf.mxu1 }
  0xe3   :  { %6145 = vst [vmem:[#allocation24_spill] sm:$0xff] %v5004_v8 }
  0xe4   :  { %6146 = vst [vmem:[#allocation25_spill] sm:$0xff] %v5006_v11 }
  0xe5   :  { %6147 = vst [vmem:[#allocation26_spill] sm:$0xff] %v5008_v12 }
  0xe9   :  { %v5010_v15 = vpop.f32.mrf.mxu2  ;;  %v5014_v20 = vpop.f32.mrf.mxu0 }
  0xea   :  { %6148 = vst [vmem:[#allocation27_spill] sm:$0xff] %v5010_v15  ;;  %v5012_v19 = vpop.f32.mrf.mxu3  ;;  %v5016_v23 = vpop.f32.mrf.mxu1 }
  0xeb   :  { %6149 = vst [vmem:[#allocation28_spill] sm:$0xff] %v5012_v19 }
  0xec   :  { %6150 = vst [vmem:[#allocation29_spill] sm:$0xff] %v5014_v20 }
  0xed   :  { %6151 = vst [vmem:[#allocation30_spill] sm:$0xff] %v5016_v23 }
  0xf1   :  { %v5018_v24 = vpop.f32.mrf.mxu2  ;;  %v5022_v6 = vpop.f32.mrf.mxu0 }
  0xf2   :  { %6152 = vst [vmem:[#allocation31_spill] sm:$0xff] %v5018_v24  ;;  %v5020_v29 = vpop.f32.mrf.mxu3  ;;  %v5024_v7 = vpop.f32.mrf.mxu1 }
  0xf3   :  { %6153 = vst [vmem:[#allocation32_spill] sm:$0xff] %v5020_v29 }
  0xf4   :  { %6154 = vst [vmem:[#allocation33_spill] sm:$0xff] %v5022_v6 }
  0xf5   :  { %6155 = vst [vmem:[#allocation34_spill] sm:$0xff] %v5024_v7 }
  0xf9   :  { %v5026_v8 = vpop.f32.mrf.mxu2  ;;  %v5030_v12 = vpop.f32.mrf.mxu0 }
  0xfa   :  { %6156 = vst [vmem:[#allocation35_spill] sm:$0xff] %v5026_v8  ;;  %v5028_v11 = vpop.f32.mrf.mxu3  ;;  %v5032_v15 = vpop.f32.mrf.mxu1 }
  0xfb   :  { %6157 = vst [vmem:[#allocation36_spill] sm:$0xff] %v5028_v11 }
  0xfc   :  { %6158 = vst [vmem:[#allocation37_spill] sm:$0xff] %v5030_v12 }
  0xfd   :  { %6159 = vst [vmem:[#allocation38_spill] sm:$0xff] %v5032_v15 }
 0x101   :  { %v5034_v19 = vpop.f32.mrf.mxu2  ;;  %v5038_v23 = vpop.f32.mrf.mxu0 }
 0x102   :  { %6160 = vst [vmem:[#allocation39_spill] sm:$0xff] %v5034_v19  ;;  %v5036_v20 = vpop.f32.mrf.mxu3  ;;  %v5040_v24 = vpop.f32.mrf.mxu1 }
 0x103   :  { %6161 = vst [vmem:[#allocation40_spill] sm:$0xff] %v5036_v20 }
 0x104   :  { %6162 = vst [vmem:[#allocation41_spill] sm:$0xff] %v5038_v23 }
 0x105   :  { %6163 = vst [vmem:[#allocation42_spill] sm:$0xff] %v5040_v24 }
 0x109   :  { %v5042_v29 = vpop.f32.mrf.mxu2  ;;  %v5046_v7 = vpop.f32.mrf.mxu0 }
 0x10a   :  { %6164 = vst [vmem:[#allocation43_spill] sm:$0xff] %v5042_v29  ;;  %v5044_v6 = vpop.f32.mrf.mxu3  ;;  %v5048_v8 = vpop.f32.mrf.mxu1 }
 0x10b   :  { %6165 = vst [vmem:[#allocation44_spill] sm:$0xff] %v5044_v6 }
 0x10c   :  { %6166 = vst [vmem:[#allocation45_spill] sm:$0xff] %v5046_v7 }
 0x10d   :  { %6167 = vst [vmem:[#allocation46_spill] sm:$0xff] %v5048_v8 }
 0x111   :  { %v5050_v11 = vpop.f32.mrf.mxu2  ;;  %v5054_v15 = vpop.f32.mrf.mxu0 }
 0x112   :  { %6168 = vst [vmem:[#allocation47_spill] sm:$0xff] %v5050_v11  ;;  %v5052_v12 = vpop.f32.mrf.mxu3  ;;  %v5056_v19 = vpop.f32.mrf.mxu1 }
 0x113   :  { %6169 = vst [vmem:[#allocation48_spill] sm:$0xff] %v5052_v12 }
 0x114   :  { %6170 = vst [vmem:[#allocation49_spill] sm:$0xff] %v5054_v15 }
 0x115   :  { %6171 = vst [vmem:[#allocation50_spill] sm:$0xff] %v5056_v19 }
 0x119   :  { %v5058_v20 = vpop.f32.mrf.mxu2  ;;  %v5062_v24 = vpop.f32.mrf.mxu0 }
 0x11a   :  { %6172 = vst [vmem:[#allocation51_spill] sm:$0xff] %v5058_v20  ;;  %v5060_v23 = vpop.f32.mrf.mxu3  ;;  %v5064_v29 = vpop.f32.mrf.mxu1  ;;  %v144_v20 = vld [vmem:[%s6124_s3] sm:$0xf] }
 0x11b   :  { %6173 = vst [vmem:[#allocation52_spill] sm:$0xff] %v5060_v23  ;;  %v5097_v0 = vperm.slane %v144_v20, 3  ;;  %v5099_v1 = vperm.slane %v144_v20, 2 }
 0x11c   :  { %6174 = vst [vmem:[#allocation53_spill] sm:$0xff] %v5062_v24 }
 0x11d   :  { %6175 = vst [vmem:[#allocation54_spill] sm:$0xff] %v5064_v29  ;;  %v5085_v29 = vperm.slane %v144_v20, 0 }
 0x121   :  { %v5066_v6 = vpop.f32.mrf.mxu2  ;;  %v5070_v8 = vpop.f32.mrf.mxu0 }
 0x122   :  { %6176 = vst [vmem:[#allocation55_spill] sm:$0xff] %v5066_v6  ;;  %v5068_v7 = vpop.f32.mrf.mxu3  ;;  %v5072_v11 = vpop.f32.mrf.mxu1  ;;  %v5087_v6 = vperm.slane %v144_v20, 1 }
 0x123   :  { %6177 = vst [vmem:[#allocation56_spill] sm:$0xff] %v5068_v7 }
 0x124   :  { %6178 = vst [vmem:[#allocation57_spill] sm:$0xff] %v5070_v8  ;;  %v372_v8 = vadd.f32 %v4922_v25, %v5085_v29  ;;  %v519_v25 = vadd.f32 %v4936_v32, %v5097_v0 }
 0x125   :  { %6179 = vst [vmem:[#allocation58_spill] sm:$0xff] %v5072_v11 }
 0x129   :  { %v5074_v12 = vpop.f32.mrf.mxu2  ;;  %v5081_v23 = vpop.f32.mrf.mxu0 }
 0x12a   :  { %6180 = vst [vmem:[#allocation59_spill] sm:$0xff] %v5074_v12  ;;  %v5079_v19 = vpop.f32.mrf.mxu3  ;;  %v5083_v24 = vpop.f32.mrf.mxu1  ;;  %v421_v12 = vadd.f32 %v4924_v28, %v5087_v6  ;;  %v374_v28 = vadd.f32 %v4938_v33, %v5085_v29 }
 0x12b   :  { %6181 = vst [vmem:[#allocation60_spill] sm:$0xff] %v5079_v19 }
 0x12c   :  { %6182 = vst [vmem:[#allocation61_spill] sm:$0xff] %v5081_v23 }
 0x12d   :  { %6183 = vst [vmem:[#allocation62_spill] sm:$0xff] %v5083_v24 }
 0x131   :  { %v5091_v11 = vpop.f32.mrf.mxu2  ;;  %v834_v15 = vpop.f32.mrf.mxu0 }
 0x132   :  { %6184 = vst [vmem:[#allocation63_spill] sm:$0xff] %v5091_v11  ;;  %v5095_v7 = vpop.f32.mrf.mxu3  ;;  %v881_v19 = vadd.f32 %v834_v15, %v372_v8  ;;  %v848_v5 = vpop.f32.mrf.mxu1  ;;  %v470_v8 = vadd.f32 %v4933_v31, %v5099_v1  ;;  %v472_v31 = vadd.f32 %v4949_v36, %v5099_v1 }
 0x133   :  { %6185 = vst [vmem:[#allocation64_spill] sm:$0xff] %v5095_v7  ;;  %v882_v23 = vadd.f32 %v848_v5, %v421_v12  ;;  %v423_v5 = vadd.f32 %v4940_v34, %v5087_v6 }
 0x134   :  { %v889_v24 = vmul.f32 0.5, %v881_v19 }
 0x135   :  { %v890_v58 = vmul.f32 0.5, %v882_v23 }
 0x136   :  { %4279 = vtanh.f32 %v889_v24 }
 0x137   :  { %4281 = vtanh.f32 %v890_v58 }
 0x139   :  { %v862_v11 = vpop.f32.mrf.mxu2  ;;  %v836_v15 = vpop.f32.mrf.mxu0 }
 0x13a   :  { %v876_v12 = vpop.f32.mrf.mxu3  ;;  %v885_v20 = vadd.f32 %v836_v15, %v374_v28  ;;  %v850_v23 = vpop.f32.mrf.mxu1  ;;  %v883_v24 = vadd.f32 %v862_v11, %v470_v8 }
 0x13b   :  { %v884_v19 = vadd.f32 %v876_v12, %v519_v25  ;;  %v886_v58 = vadd.f32 %v850_v23, %v423_v5  ;;  %v521_v25 = vadd.f32 %v4952_v38, %v5097_v0 }
 0x13c   :  { %v4280_v7 = vpop.eup %4279  ;;  %v892_v32 = vmul.f32 0.5, %v885_v20  ;;  %v891_v34 = vmul.f32 0.5, %v883_v24 }
 0x13d   :  { %4283 = vtanh.f32 %v884_v19  ;;  %v4282_v57 = vpop.eup %4281  ;;  %v901_v56 = vmul.f32 0.5, %v4280_v7  ;;  %v893_v33 = vmul.f32 0.5, %v886_v58 }
 0x13e   :  { %v902_v53 = vmul.f32 0.5, %v4282_v57  ;;  %4285 = vtanh.f32 %v892_v32 }
 0x13f   :  { %v907_v51 = vadd.f32 0.5, %v901_v56  ;;  %4287 = vtanh.f32 %v893_v33 }
 0x140   :  { %v908_v28 = vadd.f32 0.5, %v902_v53  ;;  %4289 = vtanh.f32 %v891_v34 }
 0x141   :  { %v864_v11 = vpop.f32.mrf.mxu2 }
 0x142   :  { %v887_v8 = vadd.f32 %v864_v11, %v472_v31  ;;  %v878_v5 = vpop.f32.mrf.mxu3  ;;  %v915_v15 = vmul.f32 0.0, %v908_v28 }
 0x143   :  { %v4284_v12 = vpop.eup %4283  ;;  %v888_v19 = vadd.f32 %v878_v5, %v521_v25 }
 0x144   :  { %v917_v7 = vmul.f32 %v4284_v12, %v907_v51  ;;  %v894_v57 = vmul.f32 0.5, %v887_v8  ;;  %v4286_v20 = vpop.eup %4285 }
 0x145   :  { %4291 = vtanh.f32 %v888_v19  ;;  %v4288_v23 = vpop.eup %4287  ;;  %v904_v56 = vmul.f32 0.5, %v4286_v20 }
 0x146   :  { %v5113_v36 = vadd.f32 %v917_v7, %v915_v15  ;;  %v905_v24 = vmul.f32 0.5, %v4288_v23  ;;  %4293 = vtanh.f32 %v894_v57  ;;  %v4290_v53 = vpop.eup %4289 }
 0x147   :  { %v910_v58 = vadd.f32 0.5, %v904_v56  ;;  %v903_v25 = vmul.f32 0.5, %v4290_v53 }
 0x148   :  { %v911_v38 = vadd.f32 0.5, %v905_v24  ;;  %4295 = vtanh.f32 %v5113_v36 }
 0x149   :  { %v909_v11 = vadd.f32 0.5, %v903_v25 }
 0x14a   :  { %v916_v33 = vmul.f32 0.0, %v911_v38  ;;  %v426_v38 = vadd.f32 %v4956_v43, %v5087_v6 }
 0x14b   :  { %v4292_v32 = vpop.eup %4291 }
 0x14c   :  { %v918_v31 = vmul.f32 %v4292_v32, %v910_v58  ;;  %v4294_v34 = vpop.eup %4293  ;;  %v377_v58 = vadd.f32 %v4954_v39, %v5085_v29  ;;  %v379_v39 = vadd.f32 %v4970_v50, %v5085_v29  ;;  %v6187_v50 = vld [vmem:[#allocation15_spill] sm:$0xff] }
 0x14d   :  { %v906_v8 = vmul.f32 0.5, %v4294_v34 }
 0x14e   :  { %v5116_v51 = vadd.f32 %v918_v31, %v916_v33  ;;  %v4296_v28 = vpop.eup %4295 }
 0x14f   :  { %v923_v5 = vmul.f32 %v4296_v28, %v909_v11  ;;  %v912_v12 = vadd.f32 0.5, %v906_v8  ;;  %v524_v28 = vadd.f32 %v4968_v46, %v5097_v0  ;;  %v475_v11 = vadd.f32 %v4965_v44, %v5099_v1  ;;  %v6186_v8 = vld [vmem:[#allocation14_spill] sm:$0xff] }
 0x150   :  { %4297 = vtanh.f32 %v5116_v51  ;;  %v428_v43 = vadd.f32 %v6186_v8, %v5087_v6 }
 0x151   :  { %v925_v7 = vpack.c.bf16 %v923_v5, %v923_v5 }
 0x153   :  { %v942_v23 = vunpack.c.l.b16 %v925_v7 }
 0x156   :  { %v4298_v15 = vpop.eup %4297 }
 0x157   :  { %v924_v19 = vmul.f32 %v4298_v15, %v912_v12 }
 0x159   :  { %v926_v57 = vpack.c.bf16 %v924_v19, %v924_v19  ;;  %v4234_v20 = vpack.c.bf16 %v924_v19, %v923_v5 }
 0x15b   :  { %4235 = vst [vmem:[#allocation3 + $0x30] sm:$0xff] %v4234_v20   ;;  %v943_v56 = vunpack.c.l.b16 %v926_v57 }
 0x15d   :  { %v944_v24 = vpack.c.b16 %v943_v56, %v942_v23 }
 0x15f   :  { %954 = vmatmul.bf16.vlgmr.msra.gmra.mxu0 %v944_v24  ;;  %968 = vmatmul.bf16.vlgmr.msra.gmra.mxu1 %v944_v24 }
 0x160   :  { %982 = vmatmul.bf16.vlgmr.msra.gmra.mxu2 %v944_v24  ;;  %996 = vmatmul.bf16.vlgmr.msra.gmra.mxu3 %v944_v24 }
 0x161   :  { %1190 = vmatpush.bf16.msra.mxu0 %v4773_v37  ;;  %1204 = vmatpush.bf16.msra.mxu1 %v4775_v41 }
 0x162   :  { %1218 = vmatpush.bf16.msra.mxu2 %v4777_v47  ;;  %1232 = vmatpush.bf16.msra.mxu3 %v4780_v48 }
 0x165   :  { %1191 = vmatpush.bf16.msra.mxu0 %v4782_v49  ;;  %1205 = vmatpush.bf16.msra.mxu1 %v4785_v52 }
 0x166   :  { %1219 = vmatpush.bf16.msra.mxu2 %v4788_v55  ;;  %1233 = vmatpush.bf16.msra.mxu3 %v4792_v59 }
 0x169   :  { %1192 = vmatpush.bf16.msra.mxu0 %v4794_v60  ;;  %1206 = vmatpush.bf16.msra.mxu1 %v4797_v63 }
 0x16a   :  { %1220 = vmatpush.bf16.msra.mxu2 %v4800_v3  ;;  %1234 = vmatpush.bf16.msra.mxu3 %v4804_v4 }
 0x16d   :  { %1193 = vmatpush.bf16.msra.mxu0 %v4812_v9  ;;  %1207 = vmatpush.bf16.msra.mxu1 %v4814_v13 }
 0x16e   :  { %1221 = vmatpush.bf16.msra.mxu2 %v4819_v17  ;;  %1235 = vmatpush.bf16.msra.mxu3 %v4816_v14 }
 0x171   :  { %1194 = vmatpush.bf16.msra.mxu0 %v4827_v22  ;;  %1208 = vmatpush.bf16.msra.mxu1 %v4829_v26 }
 0x172   :  { %1222 = vmatpush.bf16.msra.mxu2 %v4834_v30  ;;  %1236 = vmatpush.bf16.msra.mxu3 %v4831_v27 }
 0x175   :  { %1195 = vmatpush.bf16.msra.mxu0 %v4842_v35  ;;  %1209 = vmatpush.bf16.msra.mxu1 %v4844_v40 }
 0x176   :  { %1223 = vmatpush.bf16.msra.mxu2 %v4849_v45  ;;  %1237 = vmatpush.bf16.msra.mxu3 %v4846_v42 }
 0x179   :  { %1196 = vmatpush.bf16.msra.mxu0 %v4857_v54  ;;  %1210 = vmatpush.bf16.msra.mxu1 %v4859_v61 }
 0x17a   :  { %1224 = vmatpush.bf16.msra.mxu2 %v4864_v2  ;;  %1238 = vmatpush.bf16.msra.mxu3 %v4861_v62 }
 0x17d   :  { %1197 = vmatpush.bf16.msra.mxu0 %v4872_v10  ;;  %1211 = vmatpush.bf16.msra.mxu1 %v4874_v16 }
 0x17e   :  { %1225 = vmatpush.bf16.msra.mxu2 %v4879_v21  ;;  %1239 = vmatpush.bf16.msra.mxu3 %v4876_v18 }
 0x1dc   :  { %v955_v53 = vpop.f32.mrf.mxu0  ;;  %v969_v32 = vpop.f32.mrf.mxu1 }
 0x1dd   :  { %v1002_v33 = vadd.f32 %v955_v53, %v377_v58  ;;  %v1003_v31 = vadd.f32 %v969_v32, %v426_v38  ;;  %v477_v32 = vadd.f32 %v6187_v50, %v5099_v1 }
 0x1df   :  { %v1010_v25 = vmul.f32 0.5, %v1002_v33  ;;  %v1011_v34 = vmul.f32 0.5, %v1003_v31  ;;  %v6188_v33 = vld [vmem:[#allocation16_spill] sm:$0xff] }
 0x1e0   :  { %v526_v31 = vadd.f32 %v6188_v33, %v5097_v0 }
 0x1e1   :  { %4299 = vtanh.f32 %v1010_v25 }
 0x1e2   :  { %4301 = vtanh.f32 %v1011_v34 }
 0x1e3   :  { %v983_v5 = vpop.f32.mrf.mxu2  ;;  %v997_v12 = vpop.f32.mrf.mxu3 }
 0x1e4   :  { %v1005_v15 = vadd.f32 %v997_v12, %v524_v28  ;;  %v957_v19 = vpop.f32.mrf.mxu0  ;;  %v971_v7 = vpop.f32.mrf.mxu1  ;;  %v1004_v57 = vadd.f32 %v983_v5, %v475_v11 }
 0x1e5   :  { %v1006_v20 = vadd.f32 %v957_v19, %v379_v39  ;;  %v1007_v23 = vadd.f32 %v971_v7, %v428_v43 }
 0x1e6   :  { %4303 = vtanh.f32 %v1005_v15  ;;  %v1012_v53 = vmul.f32 0.5, %v1004_v57 }
 0x1e7   :  { %v4300_v46 = vpop.eup %4299  ;;  %v1013_v56 = vmul.f32 0.5, %v1006_v20  ;;  %v1014_v24 = vmul.f32 0.5, %v1007_v23 }
 0x1e8   :  { %v4302_v58 = vpop.eup %4301  ;;  %v1022_v44 = vmul.f32 0.5, %v4300_v46 }
 0x1e9   :  { %v1023_v38 = vmul.f32 0.5, %v4302_v58  ;;  %4305 = vtanh.f32 %v1013_v56 }
 0x1ea   :  { %v1028_v25 = vadd.f32 0.5, %v1022_v44  ;;  %4307 = vtanh.f32 %v1014_v24 }
 0x1eb   :  { %v1029_v34 = vadd.f32 0.5, %v1023_v38  ;;  %v985_v28 = vpop.f32.mrf.mxu2  ;;  %v999_v11 = vpop.f32.mrf.mxu3  ;;  %4309 = vtanh.f32 %v1012_v53 }
 0x1ec   :  { %v4304_v39 = vpop.eup %4303  ;;  %v1008_v8 = vadd.f32 %v985_v28, %v477_v32  ;;  %v1009_v43 = vadd.f32 %v999_v11, %v526_v31 }
 0x1ed   :  { %v1036_v5 = vmul.f32 %v1029_v34, %v5113_v36  ;;  %v1038_v12 = vmul.f32 %v4304_v39, %v1028_v25 }
 0x1ee   :  { %v1015_v15 = vmul.f32 0.5, %v1008_v8  ;;  %4311 = vtanh.f32 %v1009_v43 }
 0x1ef   :  { %v4306_v19 = vpop.eup %4305  ;;  %v5168_v7 = vadd.f32 %v1038_v12, %v1036_v5 }
 0x1f0   :  { %v4308_v57 = vpop.eup %4307  ;;  %v1025_v20 = vmul.f32 0.5, %v4306_v19  ;;  %4313 = vtanh.f32 %v1015_v15  ;;  %v6189_v15 = vld [vmem:[#allocation17_spill] sm:$0xff] }
 0x1f1   :  { %v1026_v23 = vmul.f32 0.5, %v4308_v57  ;;  %v4310_v56 = vpop.eup %4309  ;;  %4315 = vtanh.f32 %v5168_v7  ;;  %v382_v19 = vadd.f32 %v6189_v15, %v5085_v29  ;;  %v6190_v57 = vld [vmem:[#allocation18_spill] sm:$0xff] }
 0x1f2   :  { %v1031_v46 = vadd.f32 0.5, %v1025_v20  ;;  %v1024_v38 = vmul.f32 0.5, %v4310_v56  ;;  %v431_v20 = vadd.f32 %v6190_v57, %v5087_v6 }
 0x1f3   :  { %v1032_v24 = vadd.f32 0.5, %v1026_v23 }
 0x1f4   :  { %v4312_v58 = vpop.eup %4311  ;;  %v1030_v33 = vadd.f32 0.5, %v1024_v38 }
 0x1f5   :  { %v1037_v44 = vmul.f32 %v1032_v24, %v5116_v51  ;;  %v1039_v36 = vmul.f32 %v4312_v58, %v1031_v46 }
 0x1f6   :  { %v4314_v53 = vpop.eup %4313 }
 0x1f7   :  { %v5172_v50 = vadd.f32 %v1039_v36, %v1037_v44  ;;  %v4316_v32 = vpop.eup %4315  ;;  %v1027_v31 = vmul.f32 0.5, %v4314_v53  ;;  %v6191_v36 = vld [vmem:[#allocation20_spill] sm:$0xff]  ;;  %v6192_v53 = vld [vmem:[#allocation19_spill] sm:$0xff] }
 0x1f8   :  { %v1044_v25 = vmul.f32 %v4316_v32, %v1030_v33  ;;  %v529_v38 = vadd.f32 %v6191_v36, %v5097_v0  ;;  %v480_v32 = vadd.f32 %v6192_v53, %v5099_v1  ;;  %v6193_v33 = vld [vmem:[#allocation21_spill] sm:$0xff] }
 0x1f9   :  { %4317 = vtanh.f32 %v5172_v50  ;;  %v1033_v34 = vadd.f32 0.5, %v1027_v31  ;;  %v384_v31 = vadd.f32 %v6193_v33, %v5085_v29 }
 0x1fa   :  { %v1046_v39 = vpack.c.bf16 %v1044_v25, %v1044_v25 }
 0x1fc   :  { %v1064_v5 = vunpack.c.l.b16 %v1046_v39 }
 0x1ff   :  { %v4318_v28 = vpop.eup %4317 }
 0x200   :  { %v1045_v11 = vmul.f32 %v4318_v28, %v1033_v34 }
 0x202   :  { %v1047_v8 = vpack.c.bf16 %v1045_v11, %v1045_v11  ;;  %v4239_v43 = vpack.c.bf16 %v1045_v11, %v1044_v25  ;;  %v6194_v25 = vld [vmem:[#allocation22_spill] sm:$0xff] }
 0x203   :  { %v433_v34 = vadd.f32 %v6194_v25, %v5087_v6 }
 0x204   :  { %4240 = vst [vmem:[#allocation3] sm:$0xff] %v4239_v43   ;;  %v1065_v51 = vunpack.c.l.b16 %v1047_v8 }
 0x206   :  { %v1066_v12 = vpack.c.b16 %v1065_v51, %v1064_v5 }
 0x208   :  { %1076 = vmatmul.bf16.vlgmr.msrb.gmra.mxu0 %v1066_v12  ;;  %1090 = vmatmul.bf16.vlgmr.msrb.gmra.mxu1 %v1066_v12 }
 0x209   :  { %1104 = vmatmul.bf16.vlgmr.msrb.gmra.mxu2 %v1066_v12  ;;  %1118 = vmatmul.bf16.vlgmr.msrb.gmra.mxu3 %v1066_v12 }
 0x20a   :  { %1312 = vmatpush.bf16.msrb.mxu0 %v4773_v37  ;;  %1326 = vmatpush.bf16.msrb.mxu1 %v4775_v41 }
 0x20b   :  { %1340 = vmatpush.bf16.msrb.mxu2 %v4777_v47  ;;  %1354 = vmatpush.bf16.msrb.mxu3 %v4780_v48 }
 0x20e   :  { %1313 = vmatpush.bf16.msrb.mxu0 %v4782_v49  ;;  %1327 = vmatpush.bf16.msrb.mxu1 %v4785_v52 }
 0x20f   :  { %1341 = vmatpush.bf16.msrb.mxu2 %v4788_v55  ;;  %1355 = vmatpush.bf16.msrb.mxu3 %v4792_v59 }
 0x212   :  { %1314 = vmatpush.bf16.msrb.mxu0 %v4794_v60  ;;  %1328 = vmatpush.bf16.msrb.mxu1 %v4797_v63 }
 0x213   :  { %1342 = vmatpush.bf16.msrb.mxu2 %v4800_v3  ;;  %1356 = vmatpush.bf16.msrb.mxu3 %v4804_v4 }
 0x216   :  { %1315 = vmatpush.bf16.msrb.mxu0 %v4812_v9  ;;  %1329 = vmatpush.bf16.msrb.mxu1 %v4814_v13 }
 0x217   :  { %1343 = vmatpush.bf16.msrb.mxu2 %v4819_v17  ;;  %1357 = vmatpush.bf16.msrb.mxu3 %v4816_v14 }
 0x21a   :  { %1316 = vmatpush.bf16.msrb.mxu0 %v4827_v22  ;;  %1330 = vmatpush.bf16.msrb.mxu1 %v4829_v26 }
 0x21b   :  { %1344 = vmatpush.bf16.msrb.mxu2 %v4834_v30  ;;  %1358 = vmatpush.bf16.msrb.mxu3 %v4831_v27 }
 0x21e   :  { %1317 = vmatpush.bf16.msrb.mxu0 %v4842_v35  ;;  %1331 = vmatpush.bf16.msrb.mxu1 %v4844_v40 }
 0x21f   :  { %1345 = vmatpush.bf16.msrb.mxu2 %v4849_v45  ;;  %1359 = vmatpush.bf16.msrb.mxu3 %v4846_v42 }
 0x222   :  { %1318 = vmatpush.bf16.msrb.mxu0 %v4857_v54  ;;  %1332 = vmatpush.bf16.msrb.mxu1 %v4859_v61 }
 0x223   :  { %1346 = vmatpush.bf16.msrb.mxu2 %v4864_v2  ;;  %1360 = vmatpush.bf16.msrb.mxu3 %v4861_v62 }
 0x226   :  { %1319 = vmatpush.bf16.msrb.mxu0 %v4872_v10  ;;  %1333 = vmatpush.bf16.msrb.mxu1 %v4874_v16 }
 0x227   :  { %1347 = vmatpush.bf16.msrb.mxu2 %v4879_v21  ;;  %1361 = vmatpush.bf16.msrb.mxu3 %v4876_v18 }
 0x285   :  { %v1077_v23 = vpop.f32.mrf.mxu0  ;;  %v1091_v46 = vpop.f32.mrf.mxu1 }
 0x286   :  { %v1124_v56 = vadd.f32 %v1077_v23, %v382_v19  ;;  %v1125_v24 = vadd.f32 %v1091_v46, %v431_v20 }
 0x288   :  { %v1132_v58 = vmul.f32 0.5, %v1124_v56  ;;  %v1133_v44 = vmul.f32 0.5, %v1125_v24  ;;  %v6195_v24 = vld [vmem:[#allocation23_spill] sm:$0xff] }
 0x28a   :  { %4319 = vtanh.f32 %v1132_v58  ;;  %v482_v58 = vadd.f32 %v6195_v24, %v5099_v1 }
 0x28b   :  { %4321 = vtanh.f32 %v1133_v44  ;;  %v6196_v44 = vld [vmem:[#allocation24_spill] sm:$0xff] }
 0x28c   :  { %v1105_v28 = vpop.f32.mrf.mxu2  ;;  %v1119_v11 = vpop.f32.mrf.mxu3  ;;  %v531_v36 = vadd.f32 %v6196_v44, %v5097_v0 }
 0x28d   :  { %v1127_v39 = vadd.f32 %v1119_v11, %v529_v38  ;;  %v1079_v8 = vpop.f32.mrf.mxu0  ;;  %v1093_v43 = vpop.f32.mrf.mxu1  ;;  %v1126_v5 = vadd.f32 %v1105_v28, %v480_v32 }
 0x28e   :  { %v1128_v51 = vadd.f32 %v1079_v8, %v384_v31  ;;  %v1129_v12 = vadd.f32 %v1093_v43, %v433_v34 }
 0x28f   :  { %4323 = vtanh.f32 %v1127_v39  ;;  %v1134_v56 = vmul.f32 0.5, %v1126_v5 }
 0x290   :  { %v4320_v15 = vpop.eup %4319  ;;  %v1135_v19 = vmul.f32 0.5, %v1128_v51  ;;  %v1136_v57 = vmul.f32 0.5, %v1129_v12 }
 0x291   :  { %v4322_v20 = vpop.eup %4321  ;;  %v1144_v23 = vmul.f32 0.5, %v4320_v15 }
 0x292   :  { %v1145_v46 = vmul.f32 0.5, %v4322_v20  ;;  %4325 = vtanh.f32 %v1135_v19 }
 0x293   :  { %v1150_v38 = vadd.f32 0.5, %v1144_v23  ;;  %4327 = vtanh.f32 %v1136_v57 }
 0x294   :  { %v1151_v53 = vadd.f32 0.5, %v1145_v46  ;;  %v1107_v32 = vpop.f32.mrf.mxu2  ;;  %v1121_v33 = vpop.f32.mrf.mxu3  ;;  %4329 = vtanh.f32 %v1134_v56 }
 0x295   :  { %v4324_v31 = vpop.eup %4323  ;;  %v1130_v25 = vadd.f32 %v1107_v32, %v482_v58  ;;  %v1131_v34 = vadd.f32 %v1121_v33, %v531_v36 }
 0x296   :  { %v1158_v28 = vmul.f32 %v1151_v53, %v5168_v7  ;;  %v1160_v11 = vmul.f32 %v4324_v31, %v1150_v38 }
 0x297   :  { %v1137_v39 = vmul.f32 0.5, %v1130_v25  ;;  %4331 = vtanh.f32 %v1131_v34 }
 0x298   :  { %v4326_v8 = vpop.eup %4325  ;;  %v5224_v43 = vadd.f32 %v1160_v11, %v1158_v28 }
 0x299   :  { %v4328_v5 = vpop.eup %4327  ;;  %v1147_v51 = vmul.f32 0.5, %v4326_v8  ;;  %4333 = vtanh.f32 %v1137_v39  ;;  %v6197_v39 = vld [vmem:[#allocation25_spill] sm:$0xff] }
 0x29a   :  { %v1148_v12 = vmul.f32 0.5, %v4328_v5  ;;  %v4330_v19 = vpop.eup %4329  ;;  %4335 = vtanh.f32 %v5224_v43  ;;  %v387_v8 = vadd.f32 %v6197_v39, %v5085_v29  ;;  %v6198_v5 = vld [vmem:[#allocation26_spill] sm:$0xff] }
 0x29b   :  { %v1153_v15 = vadd.f32 0.5, %v1147_v51  ;;  %v1146_v46 = vmul.f32 0.5, %v4330_v19  ;;  %v436_v51 = vadd.f32 %v6198_v5, %v5087_v6 }
 0x29c   :  { %v1154_v57 = vadd.f32 0.5, %v1148_v12 }
 0x29d   :  { %v4332_v20 = vpop.eup %4331  ;;  %v1152_v44 = vadd.f32 0.5, %v1146_v46 }
 0x29e   :  { %v1159_v23 = vmul.f32 %v1154_v57, %v5172_v50  ;;  %v1161_v7 = vmul.f32 %v4332_v20, %v1153_v15 }
 0x29f   :  { %v4334_v56 = vpop.eup %4333 }
 0x2a0   :  { %v5228_v24 = vadd.f32 %v1161_v7, %v1159_v23  ;;  %v4336_v58 = vpop.eup %4335  ;;  %v1149_v36 = vmul.f32 0.5, %v4334_v56  ;;  %v6199_v7 = vld [vmem:[#allocation28_spill] sm:$0xff]  ;;  %v6200_v56 = vld [vmem:[#allocation27_spill] sm:$0xff] }
 0x2a1   :  { %v1166_v38 = vmul.f32 %v4336_v58, %v1152_v44  ;;  %v534_v46 = vadd.f32 %v6199_v7, %v5097_v0  ;;  %v485_v58 = vadd.f32 %v6200_v56, %v5099_v1  ;;  %v6201_v44 = vld [vmem:[#allocation29_spill] sm:$0xff] }
 0x2a2   :  { %4337 = vtanh.f32 %v5228_v24  ;;  %v1155_v53 = vadd.f32 0.5, %v1149_v36  ;;  %v389_v36 = vadd.f32 %v6201_v44, %v5085_v29 }
 0x2a3   :  { %v1168_v31 = vpack.c.bf16 %v1166_v38, %v1166_v38 }
 0x2a5   :  { %v1186_v28 = vunpack.c.l.b16 %v1168_v31 }
 0x2a8   :  { %v4338_v32 = vpop.eup %4337 }
 0x2a9   :  { %v1167_v33 = vmul.f32 %v4338_v32, %v1155_v53 }
 0x2ab   :  { %v1169_v25 = vpack.c.bf16 %v1167_v33, %v1167_v33  ;;  %v4244_v34 = vpack.c.bf16 %v1167_v33, %v1166_v38  ;;  %v6202_v38 = vld [vmem:[#allocation30_spill] sm:$0xff] }
 0x2ac   :  { %v438_v53 = vadd.f32 %v6202_v38, %v5087_v6 }
 0x2ad   :  { %4245 = vst [vmem:[#allocation3 + $0x18] sm:$0xff] %v4244_v34   ;;  %v1187_v50 = vunpack.c.l.b16 %v1169_v25 }
 0x2af   :  { %v1188_v11 = vpack.c.b16 %v1187_v50, %v1186_v28 }
 0x2b1   :  { %1198 = vmatmul.bf16.vlgmr.msra.gmra.mxu0 %v1188_v11  ;;  %1212 = vmatmul.bf16.vlgmr.msra.gmra.mxu1 %v1188_v11 }
 0x2b2   :  { %1226 = vmatmul.bf16.vlgmr.msra.gmra.mxu2 %v1188_v11  ;;  %1240 = vmatmul.bf16.vlgmr.msra.gmra.mxu3 %v1188_v11 }
 0x2b3   :  { %1434 = vmatpush.bf16.msra.mxu0 %v4773_v37  ;;  %1448 = vmatpush.bf16.msra.mxu1 %v4775_v41 }
 0x2b4   :  { %1462 = vmatpush.bf16.msra.mxu2 %v4777_v47  ;;  %1476 = vmatpush.bf16.msra.mxu3 %v4780_v48 }
 0x2b7   :  { %1435 = vmatpush.bf16.msra.mxu0 %v4782_v49  ;;  %1449 = vmatpush.bf16.msra.mxu1 %v4785_v52 }
 0x2b8   :  { %1463 = vmatpush.bf16.msra.mxu2 %v4788_v55  ;;  %1477 = vmatpush.bf16.msra.mxu3 %v4792_v59 }
 0x2bb   :  { %1436 = vmatpush.bf16.msra.mxu0 %v4794_v60  ;;  %1450 = vmatpush.bf16.msra.mxu1 %v4797_v63 }
 0x2bc   :  { %1464 = vmatpush.bf16.msra.mxu2 %v4800_v3  ;;  %1478 = vmatpush.bf16.msra.mxu3 %v4804_v4 }
 0x2bf   :  { %1437 = vmatpush.bf16.msra.mxu0 %v4812_v9  ;;  %1451 = vmatpush.bf16.msra.mxu1 %v4814_v13 }
 0x2c0   :  { %1465 = vmatpush.bf16.msra.mxu2 %v4819_v17  ;;  %1479 = vmatpush.bf16.msra.mxu3 %v4816_v14 }
 0x2c3   :  { %1438 = vmatpush.bf16.msra.mxu0 %v4827_v22  ;;  %1452 = vmatpush.bf16.msra.mxu1 %v4829_v26 }
 0x2c4   :  { %1466 = vmatpush.bf16.msra.mxu2 %v4834_v30  ;;  %1480 = vmatpush.bf16.msra.mxu3 %v4831_v27 }
 0x2c7   :  { %1439 = vmatpush.bf16.msra.mxu0 %v4842_v35  ;;  %1453 = vmatpush.bf16.msra.mxu1 %v4844_v40 }
 0x2c8   :  { %1467 = vmatpush.bf16.msra.mxu2 %v4849_v45  ;;  %1481 = vmatpush.bf16.msra.mxu3 %v4846_v42 }
 0x2cb   :  { %1440 = vmatpush.bf16.msra.mxu0 %v4857_v54  ;;  %1454 = vmatpush.bf16.msra.mxu1 %v4859_v61 }
 0x2cc   :  { %1468 = vmatpush.bf16.msra.mxu2 %v4864_v2  ;;  %1482 = vmatpush.bf16.msra.mxu3 %v4861_v62 }
 0x2cf   :  { %1441 = vmatpush.bf16.msra.mxu0 %v4872_v10  ;;  %1455 = vmatpush.bf16.msra.mxu1 %v4874_v16 }
 0x2d0   :  { %1469 = vmatpush.bf16.msra.mxu2 %v4879_v21  ;;  %1483 = vmatpush.bf16.msra.mxu3 %v4876_v18 }
 0x32e   :  { %v1199_v12 = vpop.f32.mrf.mxu0  ;;  %v1213_v15 = vpop.f32.mrf.mxu1 }
 0x32f   :  { %v1246_v19 = vadd.f32 %v1199_v12, %v387_v8  ;;  %v1247_v57 = vadd.f32 %v1213_v15, %v436_v51 }
 0x331   :  { %v1254_v20 = vmul.f32 0.5, %v1246_v19  ;;  %v1255_v23 = vmul.f32 0.5, %v1247_v57  ;;  %v6203_v57 = vld [vmem:[#allocation31_spill] sm:$0xff] }
 0x333   :  { %4339 = vtanh.f32 %v1254_v20  ;;  %v487_v20 = vadd.f32 %v6203_v57, %v5099_v1 }
 0x334   :  { %4341 = vtanh.f32 %v1255_v23  ;;  %v6204_v23 = vld [vmem:[#allocation32_spill] sm:$0xff] }
 0x335   :  { %v1227_v32 = vpop.f32.mrf.mxu2  ;;  %v1241_v33 = vpop.f32.mrf.mxu3  ;;  %v536_v7 = vadd.f32 %v6204_v23, %v5097_v0 }
 0x336   :  { %v1249_v31 = vadd.f32 %v1241_v33, %v534_v46  ;;  %v1201_v25 = vpop.f32.mrf.mxu0  ;;  %v1215_v34 = vpop.f32.mrf.mxu1  ;;  %v1248_v28 = vadd.f32 %v1227_v32, %v485_v58 }
 0x337   :  { %v1250_v50 = vadd.f32 %v1201_v25, %v389_v36  ;;  %v1251_v11 = vadd.f32 %v1215_v34, %v438_v53 }
 0x338   :  { %4343 = vtanh.f32 %v1249_v31  ;;  %v1256_v19 = vmul.f32 0.5, %v1248_v28 }
 0x339   :  { %v4340_v39 = vpop.eup %4339  ;;  %v1257_v8 = vmul.f32 0.5, %v1250_v50  ;;  %v1258_v5 = vmul.f32 0.5, %v1251_v11 }
 0x33a   :  { %v4342_v51 = vpop.eup %4341  ;;  %v1266_v12 = vmul.f32 0.5, %v4340_v39 }
 0x33b   :  { %v1267_v15 = vmul.f32 0.5, %v4342_v51  ;;  %4345 = vtanh.f32 %v1257_v8 }
 0x33c   :  { %v1272_v46 = vadd.f32 0.5, %v1266_v12  ;;  %4347 = vtanh.f32 %v1258_v5 }
 0x33d   :  { %v1273_v56 = vadd.f32 0.5, %v1267_v15  ;;  %v1229_v58 = vpop.f32.mrf.mxu2  ;;  %v1243_v44 = vpop.f32.mrf.mxu3  ;;  %4349 = vtanh.f32 %v1256_v19 }
 0x33e   :  { %v4344_v36 = vpop.eup %4343  ;;  %v1252_v38 = vadd.f32 %v1229_v58, %v487_v20  ;;  %v1253_v53 = vadd.f32 %v1243_v44, %v536_v7 }
 0x33f   :  { %v1280_v32 = vmul.f32 %v1273_v56, %v5224_v43  ;;  %v1282_v33 = vmul.f32 %v4344_v36, %v1272_v46 }
 0x340   :  { %v1259_v31 = vmul.f32 0.5, %v1252_v38  ;;  %4351 = vtanh.f32 %v1253_v53 }
 0x341   :  { %v4346_v25 = vpop.eup %4345  ;;  %v5280_v34 = vadd.f32 %v1282_v33, %v1280_v32 }
 0x342   :  { %v4348_v28 = vpop.eup %4347  ;;  %v1269_v50 = vmul.f32 0.5, %v4346_v25  ;;  %4353 = vtanh.f32 %v1259_v31  ;;  %v6205_v31 = vld [vmem:[#allocation33_spill] sm:$0xff] }
 0x343   :  { %v1270_v11 = vmul.f32 0.5, %v4348_v28  ;;  %v4350_v8 = vpop.eup %4349  ;;  %4355 = vtanh.f32 %v5280_v34  ;;  %v392_v25 = vadd.f32 %v6205_v31, %v5085_v29  ;;  %v6206_v28 = vld [vmem:[#allocation34_spill] sm:$0xff] }
 0x344   :  { %v1275_v39 = vadd.f32 0.5, %v1269_v50  ;;  %v1268_v15 = vmul.f32 0.5, %v4350_v8  ;;  %v441_v50 = vadd.f32 %v6206_v28, %v5087_v6 }
 0x345   :  { %v1276_v5 = vadd.f32 0.5, %v1270_v11 }
 0x346   :  { %v4352_v51 = vpop.eup %4351  ;;  %v1274_v23 = vadd.f32 0.5, %v1268_v15 }
 0x347   :  { %v1281_v12 = vmul.f32 %v1276_v5, %v5228_v24  ;;  %v1283_v43 = vmul.f32 %v4352_v51, %v1275_v39 }
 0x348   :  { %v4354_v19 = vpop.eup %4353 }
 0x349   :  { %v5284_v57 = vadd.f32 %v1283_v43, %v1281_v12  ;;  %v4356_v20 = vpop.eup %4355  ;;  %v1271_v7 = vmul.f32 0.5, %v4354_v19  ;;  %v6207_v43 = vld [vmem:[#allocation36_spill] sm:$0xff]  ;;  %v6208_v19 = vld [vmem:[#allocation35_spill] sm:$0xff] }
 0x34a   :  { %v1288_v46 = vmul.f32 %v4356_v20, %v1274_v23  ;;  %v539_v15 = vadd.f32 %v6207_v43, %v5097_v0  ;;  %v490_v20 = vadd.f32 %v6208_v19, %v5099_v1  ;;  %v6209_v23 = vld [vmem:[#allocation37_spill] sm:$0xff] }
 0x34b   :  { %4357 = vtanh.f32 %v5284_v57  ;;  %v1277_v56 = vadd.f32 0.5, %v1271_v7  ;;  %v394_v7 = vadd.f32 %v6209_v23, %v5085_v29 }
 0x34c   :  { %v1290_v36 = vpack.c.bf16 %v1288_v46, %v1288_v46 }
 0x34e   :  { %v1308_v32 = vunpack.c.l.b16 %v1290_v36 }
 0x351   :  { %v4358_v58 = vpop.eup %4357 }
 0x352   :  { %v1289_v44 = vmul.f32 %v4358_v58, %v1277_v56 }
 0x354   :  { %v1291_v38 = vpack.c.bf16 %v1289_v44, %v1289_v44  ;;  %v4249_v53 = vpack.c.bf16 %v1289_v44, %v1288_v46  ;;  %v6210_v46 = vld [vmem:[#allocation38_spill] sm:$0xff] }
 0x355   :  { %v443_v56 = vadd.f32 %v6210_v46, %v5087_v6 }
 0x356   :  { %4250 = vst [vmem:[#allocation3 + $0x10] sm:$0xff] %v4249_v53   ;;  %v1309_v24 = vunpack.c.l.b16 %v1291_v38 }
 0x358   :  { %v1310_v33 = vpack.c.b16 %v1309_v24, %v1308_v32 }
 0x35a   :  { %1320 = vmatmul.bf16.vlgmr.msrb.gmra.mxu0 %v1310_v33  ;;  %1334 = vmatmul.bf16.vlgmr.msrb.gmra.mxu1 %v1310_v33 }
 0x35b   :  { %1348 = vmatmul.bf16.vlgmr.msrb.gmra.mxu2 %v1310_v33  ;;  %1362 = vmatmul.bf16.vlgmr.msrb.gmra.mxu3 %v1310_v33 }
 0x35c   :  { %1556 = vmatpush.bf16.msrb.mxu0 %v4773_v37  ;;  %1570 = vmatpush.bf16.msrb.mxu1 %v4775_v41 }
 0x35d   :  { %1584 = vmatpush.bf16.msrb.mxu2 %v4777_v47  ;;  %1598 = vmatpush.bf16.msrb.mxu3 %v4780_v48 }
 0x360   :  { %1557 = vmatpush.bf16.msrb.mxu0 %v4782_v49  ;;  %1571 = vmatpush.bf16.msrb.mxu1 %v4785_v52 }
 0x361   :  { %1585 = vmatpush.bf16.msrb.mxu2 %v4788_v55  ;;  %1599 = vmatpush.bf16.msrb.mxu3 %v4792_v59 }
 0x364   :  { %1558 = vmatpush.bf16.msrb.mxu0 %v4794_v60  ;;  %1572 = vmatpush.bf16.msrb.mxu1 %v4797_v63 }
 0x365   :  { %1586 = vmatpush.bf16.msrb.mxu2 %v4800_v3  ;;  %1600 = vmatpush.bf16.msrb.mxu3 %v4804_v4 }
 0x368   :  { %1559 = vmatpush.bf16.msrb.mxu0 %v4812_v9  ;;  %1573 = vmatpush.bf16.msrb.mxu1 %v4814_v13 }
 0x369   :  { %1587 = vmatpush.bf16.msrb.mxu2 %v4819_v17  ;;  %1601 = vmatpush.bf16.msrb.mxu3 %v4816_v14 }
 0x36c   :  { %1560 = vmatpush.bf16.msrb.mxu0 %v4827_v22  ;;  %1574 = vmatpush.bf16.msrb.mxu1 %v4829_v26 }
 0x36d   :  { %1588 = vmatpush.bf16.msrb.mxu2 %v4834_v30  ;;  %1602 = vmatpush.bf16.msrb.mxu3 %v4831_v27 }
 0x370   :  { %1561 = vmatpush.bf16.msrb.mxu0 %v4842_v35  ;;  %1575 = vmatpush.bf16.msrb.mxu1 %v4844_v40 }
 0x371   :  { %1589 = vmatpush.bf16.msrb.mxu2 %v4849_v45  ;;  %1603 = vmatpush.bf16.msrb.mxu3 %v4846_v42 }
 0x374   :  { %1562 = vmatpush.bf16.msrb.mxu0 %v4857_v54  ;;  %1576 = vmatpush.bf16.msrb.mxu1 %v4859_v61 }
 0x375   :  { %1590 = vmatpush.bf16.msrb.mxu2 %v4864_v2  ;;  %1604 = vmatpush.bf16.msrb.mxu3 %v4861_v62 }
 0x378   :  { %1563 = vmatpush.bf16.msrb.mxu0 %v4872_v10  ;;  %1577 = vmatpush.bf16.msrb.mxu1 %v4874_v16 }
 0x379   :  { %1591 = vmatpush.bf16.msrb.mxu2 %v4879_v21  ;;  %1605 = vmatpush.bf16.msrb.mxu3 %v4876_v18 }
 0x3d7   :  { %v1321_v11 = vpop.f32.mrf.mxu0  ;;  %v1335_v39 = vpop.f32.mrf.mxu1 }
 0x3d8   :  { %v1368_v8 = vadd.f32 %v1321_v11, %v392_v25  ;;  %v1369_v5 = vadd.f32 %v1335_v39, %v441_v50 }
 0x3da   :  { %v1376_v51 = vmul.f32 0.5, %v1368_v8  ;;  %v1377_v12 = vmul.f32 0.5, %v1369_v5  ;;  %v6211_v5 = vld [vmem:[#allocation39_spill] sm:$0xff] }
 0x3dc   :  { %4359 = vtanh.f32 %v1376_v51  ;;  %v492_v51 = vadd.f32 %v6211_v5, %v5099_v1 }
 0x3dd   :  { %4361 = vtanh.f32 %v1377_v12  ;;  %v6212_v12 = vld [vmem:[#allocation40_spill] sm:$0xff] }
 0x3de   :  { %v1349_v58 = vpop.f32.mrf.mxu2  ;;  %v1363_v44 = vpop.f32.mrf.mxu3  ;;  %v541_v43 = vadd.f32 %v6212_v12, %v5097_v0 }
 0x3df   :  { %v1371_v36 = vadd.f32 %v1363_v44, %v539_v15  ;;  %v1323_v38 = vpop.f32.mrf.mxu0  ;;  %v1337_v53 = vpop.f32.mrf.mxu1  ;;  %v1370_v32 = vadd.f32 %v1349_v58, %v490_v20 }
 0x3e0   :  { %v1372_v24 = vadd.f32 %v1323_v38, %v394_v7  ;;  %v1373_v33 = vadd.f32 %v1337_v53, %v443_v56 }
 0x3e1   :  { %4363 = vtanh.f32 %v1371_v36  ;;  %v1378_v8 = vmul.f32 0.5, %v1370_v32 }
 0x3e2   :  { %v4360_v31 = vpop.eup %4359  ;;  %v1379_v25 = vmul.f32 0.5, %v1372_v24  ;;  %v1380_v28 = vmul.f32 0.5, %v1373_v33 }
 0x3e3   :  { %v4362_v50 = vpop.eup %4361  ;;  %v1388_v11 = vmul.f32 0.5, %v4360_v31 }
 0x3e4   :  { %v1389_v39 = vmul.f32 0.5, %v4362_v50  ;;  %4365 = vtanh.f32 %v1379_v25 }
 0x3e5   :  { %v1394_v15 = vadd.f32 0.5, %v1388_v11  ;;  %4367 = vtanh.f32 %v1380_v28 }
 0x3e6   :  { %v1395_v19 = vadd.f32 0.5, %v1389_v39  ;;  %v1351_v20 = vpop.f32.mrf.mxu2  ;;  %v1365_v23 = vpop.f32.mrf.mxu3  ;;  %4369 = vtanh.f32 %v1378_v8 }
 0x3e7   :  { %v4364_v7 = vpop.eup %4363  ;;  %v1374_v46 = vadd.f32 %v1351_v20, %v492_v51  ;;  %v1375_v56 = vadd.f32 %v1365_v23, %v541_v43 }
 0x3e8   :  { %v1402_v58 = vmul.f32 %v1395_v19, %v5280_v34  ;;  %v1404_v44 = vmul.f32 %v4364_v7, %v1394_v15 }
 0x3e9   :  { %v1381_v36 = vmul.f32 0.5, %v1374_v46  ;;  %4371 = vtanh.f32 %v1375_v56 }
 0x3ea   :  { %v4366_v38 = vpop.eup %4365  ;;  %v5336_v53 = vadd.f32 %v1404_v44, %v1402_v58 }
 0x3eb   :  { %v4368_v32 = vpop.eup %4367  ;;  %v1391_v24 = vmul.f32 0.5, %v4366_v38  ;;  %4373 = vtanh.f32 %v1381_v36  ;;  %v6219_v38 = vld [vmem:[#allocation47_spill] sm:$0xff] }
 0x3ec   :  { %v1392_v33 = vmul.f32 0.5, %v4368_v32  ;;  %v4370_v25 = vpop.eup %4369  ;;  %4375 = vtanh.f32 %v5336_v53  ;;  %v497_v32 = vadd.f32 %v6219_v38, %v5099_v1  ;;  %v6221_v38 = vld [vmem:[#allocation49_spill] sm:$0xff] }
 0x3ed   :  { %v1397_v31 = vadd.f32 0.5, %v1391_v24  ;;  %v1390_v39 = vmul.f32 0.5, %v4370_v25  ;;  %v6220_v24 = vld [vmem:[#allocation48_spill] sm:$0xff] }
 0x3ee   :  { %v1398_v28 = vadd.f32 0.5, %v1392_v33  ;;  %v546_v33 = vadd.f32 %v6220_v24, %v5097_v0  ;;  %v6222_v24 = vld [vmem:[#allocation50_spill] sm:$0xff] }
 0x3ef   :  { %v4372_v50 = vpop.eup %4371  ;;  %v1396_v12 = vadd.f32 0.5, %v1390_v39 }
 0x3f0   :  { %v1403_v11 = vmul.f32 %v1398_v28, %v5284_v57  ;;  %v1405_v34 = vmul.f32 %v4372_v50, %v1397_v31 }
 0x3f1   :  { %v4374_v8 = vpop.eup %4373 }
 0x3f2   :  { %v5340_v5 = vadd.f32 %v1405_v34, %v1403_v11  ;;  %v4376_v51 = vpop.eup %4375  ;;  %v1393_v43 = vmul.f32 0.5, %v4374_v8 }
 0x3f3   :  { %v1410_v15 = vmul.f32 %v4376_v51, %v1396_v12 }
 0x3f4   :  { %4377 = vtanh.f32 %v5340_v5  ;;  %v1399_v19 = vadd.f32 0.5, %v1393_v43 }
 0x3f5   :  { %v1412_v7 = vpack.c.bf16 %v1410_v15, %v1410_v15 }
 0x3f7   :  { %v1430_v58 = vunpack.c.l.b16 %v1412_v7 }
 0x3fa   :  { %v4378_v20 = vpop.eup %4377 }
 0x3fb   :  { %v1411_v23 = vmul.f32 %v4378_v20, %v1399_v19 }
 0x3fd   :  { %v1413_v46 = vpack.c.bf16 %v1411_v23, %v1411_v23  ;;  %v4254_v56 = vpack.c.bf16 %v1411_v23, %v1410_v15 }
 0x3ff   :  { %4255 = vst [vmem:[#allocation3 + $0x8] sm:$0xff] %v4254_v56   ;;  %v1431_v57 = vunpack.c.l.b16 %v1413_v46 }
 0x401   :  { %v1432_v44 = vpack.c.b16 %v1431_v57, %v1430_v58 }
 0x403   :  { %1442 = vmatmul.bf16.vlgmr.msra.gmra.mxu0 %v1432_v44  ;;  %1456 = vmatmul.bf16.vlgmr.msra.gmra.mxu1 %v1432_v44 }
 0x404   :  { %1470 = vmatmul.bf16.vlgmr.msra.gmra.mxu2 %v1432_v44  ;;  %1484 = vmatmul.bf16.vlgmr.msra.gmra.mxu3 %v1432_v44 }
 0x405   :  { %1678 = vmatpush.bf16.msra.mxu0 %v4773_v37  ;;  %1692 = vmatpush.bf16.msra.mxu1 %v4775_v41  ;;  %v6213_v37 = vld [vmem:[#allocation41_spill] sm:$0xff] }
 0x406   :  { %1706 = vmatpush.bf16.msra.mxu2 %v4777_v47  ;;  %1720 = vmatpush.bf16.msra.mxu3 %v4780_v48  ;;  %v397_v41 = vadd.f32 %v6213_v37, %v5085_v29  ;;  %v6214_v47 = vld [vmem:[#allocation42_spill] sm:$0xff] }
 0x407   :  { %v446_v48 = vadd.f32 %v6214_v47, %v5087_v6 }
 0x409   :  { %1679 = vmatpush.bf16.msra.mxu0 %v4782_v49  ;;  %1693 = vmatpush.bf16.msra.mxu1 %v4785_v52 }
 0x40a   :  { %1707 = vmatpush.bf16.msra.mxu2 %v4788_v55  ;;  %1721 = vmatpush.bf16.msra.mxu3 %v4792_v59 }
 0x40d   :  { %1680 = vmatpush.bf16.msra.mxu0 %v4794_v60  ;;  %1694 = vmatpush.bf16.msra.mxu1 %v4797_v63 }
 0x40e   :  { %1708 = vmatpush.bf16.msra.mxu2 %v4800_v3  ;;  %1722 = vmatpush.bf16.msra.mxu3 %v4804_v4  ;;  %v6215_v3 = vld [vmem:[#allocation44_spill] sm:$0xff] }
 0x40f   :  { %v544_v4 = vadd.f32 %v6215_v3, %v5097_v0 }
 0x411   :  { %1681 = vmatpush.bf16.msra.mxu0 %v4812_v9  ;;  %1695 = vmatpush.bf16.msra.mxu1 %v4814_v13  ;;  %v6216_v9 = vld [vmem:[#allocation43_spill] sm:$0xff] }
 0x412   :  { %1709 = vmatpush.bf16.msra.mxu2 %v4819_v17  ;;  %1723 = vmatpush.bf16.msra.mxu3 %v4816_v14  ;;  %v495_v13 = vadd.f32 %v6216_v9, %v5099_v1  ;;  %v6217_v14 = vld [vmem:[#allocation45_spill] sm:$0xff] }
 0x413   :  { %v399_v17 = vadd.f32 %v6217_v14, %v5085_v29  ;;  %v3905_v14 = vld [vmem:[#allocation8 + $0xe0] sm:$0xf] }
 0x415   :  { %1682 = vmatpush.bf16.msra.mxu0 %v4827_v22  ;;  %1696 = vmatpush.bf16.msra.mxu1 %v4829_v26  ;;  %v6218_v22 = vld [vmem:[#allocation46_spill] sm:$0xff] }
 0x416   :  { %1710 = vmatpush.bf16.msra.mxu2 %v4834_v30  ;;  %1724 = vmatpush.bf16.msra.mxu3 %v4831_v27  ;;  %v448_v26 = vadd.f32 %v6218_v22, %v5087_v6  ;;  %v4187_v22 = vld [vmem:[#allocation8 + $0xe4] sm:$0xf] }
 0x419   :  { %1683 = vmatpush.bf16.msra.mxu0 %v4842_v35  ;;  %1697 = vmatpush.bf16.msra.mxu1 %v4844_v40 }
 0x41a   :  { %1711 = vmatpush.bf16.msra.mxu2 %v4849_v45  ;;  %1725 = vmatpush.bf16.msra.mxu3 %v4846_v42 }
 0x41d   :  { %1684 = vmatpush.bf16.msra.mxu0 %v4857_v54  ;;  %1698 = vmatpush.bf16.msra.mxu1 %v4859_v61 }
 0x41e   :  { %1712 = vmatpush.bf16.msra.mxu2 %v4864_v2  ;;  %1726 = vmatpush.bf16.msra.mxu3 %v4861_v62 }
 0x421   :  { %1685 = vmatpush.bf16.msra.mxu0 %v4872_v10  ;;  %1699 = vmatpush.bf16.msra.mxu1 %v4874_v16 }
 0x422   :  { %1713 = vmatpush.bf16.msra.mxu2 %v4879_v21  ;;  %1727 = vmatpush.bf16.msra.mxu3 %v4876_v18 }
 0x480   :  { %v1443_v49 = vpop.f32.mrf.mxu0  ;;  %v1457_v52 = vpop.f32.mrf.mxu1 }
 0x481   :  { %v1490_v55 = vadd.f32 %v1443_v49, %v397_v41  ;;  %v1491_v59 = vadd.f32 %v1457_v52, %v446_v48 }
 0x483   :  { %v1498_v60 = vmul.f32 0.5, %v1490_v55  ;;  %v1499_v63 = vmul.f32 0.5, %v1491_v59 }
 0x485   :  { %4379 = vtanh.f32 %v1498_v60 }
 0x486   :  { %4381 = vtanh.f32 %v1499_v63 }
 0x487   :  { %v1471_v27 = vpop.f32.mrf.mxu2  ;;  %v1485_v30 = vpop.f32.mrf.mxu3 }
 0x488   :  { %v1493_v35 = vadd.f32 %v1485_v30, %v544_v4  ;;  %v1445_v40 = vpop.f32.mrf.mxu0  ;;  %v1459_v42 = vpop.f32.mrf.mxu1  ;;  %v1492_v45 = vadd.f32 %v1471_v27, %v495_v13  ;;  %v3907_v27 = vld [vmem:[#allocation8 + $0xf0] sm:$0xf0]  ;;  %v3913_v30 = vld [vmem:[#allocation8 + $0xe8] sm:$0xf] }
 0x489   :  { %v1494_v54 = vadd.f32 %v1445_v40, %v399_v17  ;;  %v1495_v61 = vadd.f32 %v1459_v42, %v448_v26  ;;  %v4189_v17 = vld [vmem:[#allocation8 + $0xec] sm:$0xf0]  ;;  %v3910_v40 = vor.u32 %v4187_v22, %v3907_v27 }
 0x48a   :  { %4383 = vtanh.f32 %v1493_v35  ;;  %v1500_v36 = vmul.f32 0.5, %v1492_v45  ;;  %v3906_v26 = vor.u32 %v4189_v17, %v3905_v14  ;;  %v4190_v35 = vld [vmem:[#allocation8 + $0xf4] sm:$0xf0]  ;;  %v4188_v45 = vld [vmem:[#allocation8 + $0xec] sm:$0xf] }
 0x48b   :  { %v4380_v62 = vpop.eup %4379  ;;  %v1501_v2 = vmul.f32 0.5, %v1494_v54  ;;  %v1502_v10 = vmul.f32 0.5, %v1495_v61  ;;  %v3914_v42 = vor.u32 %v4190_v35, %v3913_v30  ;;  %v3915_v54 = vld [vmem:[#allocation8 + $0xf8] sm:$0xf0]  ;;  %v6224_v17 = vld [vmem:[#allocation51_spill] sm:$0xff]  ;;  %v6226_v30 = vld [vmem:[#allocation54_spill] sm:$0xff] }
 0x48c   :  { %v4382_v16 = vpop.eup %4381  ;;  %v1510_v18 = vmul.f32 0.5, %v4380_v62  ;;  %v3918_v61 = vor.u32 %v4188_v45, %v3915_v54  ;;  %v3889_v62 = vld [vmem:[#allocation8 + $0xc0] sm:$0xf]  ;;  %v500_v22 = vadd.f32 %v6224_v17, %v5099_v1  ;;  %v453_v35 = vadd.f32 %v6226_v30, %v5087_v6 }
 0x48d   :  { %v1511_v21 = vmul.f32 0.5, %v4382_v16  ;;  %4385 = vtanh.f32 %v1501_v2  ;;  %v4185_v2 = vld [vmem:[#allocation8 + $0xcc] sm:$0xf0] }
 0x48e   :  { %v1516_v31 = vadd.f32 0.5, %v1510_v18  ;;  %4387 = vtanh.f32 %v1502_v10  ;;  %v4183_v10 = vld [vmem:[#allocation8 + $0xc4] sm:$0xf]  ;;  %v3890_v16 = vor.u32 %v4185_v2, %v3889_v62  ;;  %v3891_v18 = vld [vmem:[#allocation8 + $0xd0] sm:$0xf0] }
 0x48f   :  { %v1517_v25 = vadd.f32 0.5, %v1511_v21  ;;  %v1473_v28 = vpop.f32.mrf.mxu2  ;;  %v1487_v50 = vpop.f32.mrf.mxu3  ;;  %4389 = vtanh.f32 %v1500_v36  ;;  %v3897_v21 = vld [vmem:[#allocation8 + $0xc8] sm:$0xf]  ;;  %v4186_v36 = vld [vmem:[#allocation8 + $0xd4] sm:$0xf0] }
 0x490   :  { %v4384_v11 = vpop.eup %4383  ;;  %v1496_v34 = vadd.f32 %v1473_v28, %v497_v32  ;;  %v1497_v39 = vadd.f32 %v1487_v50, %v546_v33  ;;  %v402_v32 = vadd.f32 %v6221_v38, %v5085_v29  ;;  %v451_v33 = vadd.f32 %v6222_v24, %v5087_v6  ;;  %v4184_v28 = vld [vmem:[#allocation8 + $0xcc] sm:$0xf]  ;;  %v3899_v50 = vld [vmem:[#allocation8 + $0xd8] sm:$0xf0]  ;;  %v3841_v38 = vld [vmem:[#allocation8 + $0x60] sm:$0xf] }
 0x491   :  { %v1524_v8 = vmul.f32 %v1517_v25, %v5336_v53  ;;  %v1526_v51 = vmul.f32 %v4384_v11, %v1516_v31  ;;  %v3894_v31 = vor.u32 %v4183_v10, %v3891_v18  ;;  %v3898_v25 = vor.u32 %v4186_v36, %v3897_v21  ;;  %v3873_v11 = vld [vmem:[#allocation8 + $0xa0] sm:$0xf] }
 0x492   :  { %v1503_v12 = vmul.f32 0.5, %v1496_v34  ;;  %4391 = vtanh.f32 %v1497_v39 }
 0x493   :  { %v4386_v43 = vpop.eup %4385  ;;  %v5392_v15 = vadd.f32 %v1526_v51, %v1524_v8  ;;  %v3902_v8 = vor.u32 %v4184_v28, %v3899_v50  ;;  %v4181_v51 = vld [vmem:[#allocation8 + $0xac] sm:$0xf0]  ;;  %v4171_v50 = vld [vmem:[#allocation8 + $0x64] sm:$0xf] }
 0x494   :  { %v4388_v19 = vpop.eup %4387  ;;  %v1513_v20 = vmul.f32 0.5, %v4386_v43  ;;  %4393 = vtanh.f32 %v1503_v12  ;;  %v4179_v12 = vld [vmem:[#allocation8 + $0xa4] sm:$0xf]  ;;  %v3875_v43 = vld [vmem:[#allocation8 + $0xb0] sm:$0xf0] }
 0x495   :  { %v1514_v23 = vmul.f32 0.5, %v4388_v19  ;;  %v4390_v46 = vpop.eup %4389  ;;  %4395 = vtanh.f32 %v5392_v15 }
 0x496   :  { %v1519_v7 = vadd.f32 0.5, %v1513_v20  ;;  %v1512_v44 = vmul.f32 0.5, %v4390_v46  ;;  %v4182_v46 = vld [vmem:[#allocation8 + $0xb4] sm:$0xf0] }
 0x497   :  { %v1520_v56 = vadd.f32 0.5, %v1514_v23  ;;  %v3874_v23 = vor.u32 %v4181_v51, %v3873_v11  ;;  %v3843_v11 = vld [vmem:[#allocation8 + $0x70] sm:$0xf0]  ;;  %v3849_v51 = vld [vmem:[#allocation8 + $0x68] sm:$0xf] }
 0x498   :  { %v4392_v58 = vpop.eup %4391  ;;  %v1518_v48 = vadd.f32 0.5, %v1512_v44  ;;  %v3857_v44 = vld [vmem:[#allocation8 + $0x80] sm:$0xf] }
 0x499   :  { %v1525_v57 = vmul.f32 %v1520_v56, %v5340_v5  ;;  %v1527_v53 = vmul.f32 %v4392_v58, %v1519_v7  ;;  %v3881_v7 = vld [vmem:[#allocation8 + $0xa8] sm:$0xf]  ;;  %v4180_v56 = vld [vmem:[#allocation8 + $0xac] sm:$0xf]  ;;  %v3878_v58 = vor.u32 %v4179_v12, %v3875_v43  ;;  %v4174_v12 = vld [vmem:[#allocation8 + $0x74] sm:$0xf0] }
 0x49a   :  { %v4394_v37 = vpop.eup %4393  ;;  %v6228_v43 = vld [vmem:[#allocation56_spill] sm:$0xff] }
 0x49b   :  { %v5396_v41 = vadd.f32 %v1527_v53, %v1525_v57  ;;  %v4396_v47 = vpop.eup %4395  ;;  %v1515_v49 = vmul.f32 0.5, %v4394_v37  ;;  %v3882_v57 = vor.u32 %v4182_v46, %v3881_v7  ;;  %v3883_v53 = vld [vmem:[#allocation8 + $0xb8] sm:$0xf0]  ;;  %v4177_v37 = vld [vmem:[#allocation8 + $0x8c] sm:$0xf0] }
 0x49c   :  { %v1532_v52 = vmul.f32 %v4396_v47, %v1518_v48  ;;  %v4172_v7 = vld [vmem:[#allocation8 + $0x6c] sm:$0xf]  ;;  %v3851_v46 = vld [vmem:[#allocation8 + $0x78] sm:$0xf0] }
 0x49d   :  { %4397 = vtanh.f32 %v5396_v41  ;;  %v1521_v55 = vadd.f32 0.5, %v1515_v49  ;;  %v3886_v49 = vor.u32 %v4180_v56, %v3883_v53  ;;  %v3854_v53 = vor.u32 %v4172_v7, %v3851_v46 }
 0x49e   :  { %v1534_v63 = vpack.c.bf16 %v1532_v52, %v1532_v52 }
 0x4a0   :  { %v1552_v9 = vunpack.c.l.b16 %v1534_v63  ;;  %v4176_v63 = vld [vmem:[#allocation8 + $0x8c] sm:$0xf] }
 0x4a3   :  { %v4398_v59 = vpop.eup %4397 }
 0x4a4   :  { %v1533_v60 = vmul.f32 %v4398_v59, %v1521_v55  ;;  %v3859_v55 = vld [vmem:[#allocation8 + $0x90] sm:$0xf0]  ;;  %v3865_v59 = vld [vmem:[#allocation8 + $0x88] sm:$0xf] }
 0x4a6   :  { %v1535_v3 = vpack.c.bf16 %v1533_v60, %v1533_v60  ;;  %v4259_v4 = vpack.c.bf16 %v1533_v60, %v1532_v52  ;;  %v4175_v52 = vld [vmem:[#allocation8 + $0x84] sm:$0xf]  ;;  %v4178_v60 = vld [vmem:[#allocation8 + $0x94] sm:$0xf0] }
 0x4a7   :  { %v3866_v14 = vor.u32 %v4178_v60, %v3865_v59  ;;  %v3827_v59 = vld [vmem:[#allocation8 + $0x50] sm:$0xf0]  ;;  %v3833_v60 = vld [vmem:[#allocation8 + $0x48] sm:$0xf] }
 0x4a8   :  { %4260 = vst [vmem:[#allocation3 + $0x20] sm:$0xff] %v4259_v4   ;;  %v1553_v5 = vunpack.c.l.b16 %v1535_v3  ;;  %v3858_v3 = vor.u32 %v4177_v37, %v3857_v44  ;;  %v3867_v4 = vld [vmem:[#allocation8 + $0x98] sm:$0xf0]  ;;  %v3825_v44 = vld [vmem:[#allocation8 + $0x40] sm:$0xf] }
 0x4a9   :  { %v3870_v45 = vor.u32 %v4176_v63, %v3867_v4  ;;  %v4169_v37 = vld [vmem:[#allocation8 + $0x4c] sm:$0xf0] }
 0x4aa   :  { %v1554_v13 = vpack.c.b16 %v1553_v5, %v1552_v9  ;;  %v6223_v9 = vld [vmem:[#allocation52_spill] sm:$0xff] }
 0x4ab   :  { %v549_v5 = vadd.f32 %v6223_v9, %v5097_v0  ;;  %v4170_v9 = vld [vmem:[#allocation8 + $0x54] sm:$0xf0] }
 0x4ac   :  { %1564 = vmatmul.bf16.vlgmr.msrb.gmra.mxu0 %v1554_v13  ;;  %1578 = vmatmul.bf16.vlgmr.msrb.gmra.mxu1 %v1554_v13  ;;  %v3834_v17 = vor.u32 %v4170_v9, %v3833_v60  ;;  %v4219_v9 = vld [vmem:[#allocation9 + $0xe4] sm:$0xf] }
 0x4ad   :  { %1592 = vmatmul.bf16.vlgmr.msrb.gmra.mxu2 %v1554_v13  ;;  %1606 = vmatmul.bf16.vlgmr.msrb.gmra.mxu3 %v1554_v13  ;;  %v3862_v13 = vor.u32 %v4175_v52, %v3859_v55  ;;  %v3826_v52 = vor.u32 %v4169_v37, %v3825_v44  ;;  %v4167_v55 = vld [vmem:[#allocation8 + $0x44] sm:$0xf] }
 0x4ae   :  { %2049 = vmatpush.bf16.msrb.mxu0 %v3906_v26  ;;  %2098 = vmatpush.bf16.msrb.mxu1 %v3910_v40  ;;  %v6225_v26 = vld [vmem:[#allocation53_spill] sm:$0xff]  ;;  %v3830_v4 = vor.u32 %v4167_v55, %v3827_v59 }
 0x4af   :  { %2147 = vmatpush.bf16.msrb.mxu2 %v3914_v42  ;;  %2196 = vmatpush.bf16.msrb.mxu3 %v3918_v61  ;;  %v404_v27 = vadd.f32 %v6225_v26, %v5085_v29  ;;  %v3809_v26 = vld [vmem:[#allocation8 + $0x20] sm:$0xf] }
 0x4b2   :  { %2050 = vmatpush.bf16.msrb.mxu0 %v3890_v16  ;;  %2099 = vmatpush.bf16.msrb.mxu1 %v3894_v31 }
 0x4b3   :  { %2148 = vmatpush.bf16.msrb.mxu2 %v3898_v25  ;;  %2197 = vmatpush.bf16.msrb.mxu3 %v3902_v8  ;;  %v3846_v8 = vor.u32 %v4171_v50, %v3843_v11  ;;  %v3795_v50 = vld [vmem:[#allocation8 + $0x10] sm:$0xf0] }
 0x4b6   :  { %2051 = vmatpush.bf16.msrb.mxu0 %v3874_v23  ;;  %2100 = vmatpush.bf16.msrb.mxu1 %v3878_v58  ;;  %v3850_v23 = vor.u32 %v4174_v12, %v3849_v51  ;;  %v4160_v51 = vld [vmem:[#allocation8 + $0xc] sm:$0xf] }
 0x4b7   :  { %2149 = vmatpush.bf16.msrb.mxu2 %v3882_v57  ;;  %2198 = vmatpush.bf16.msrb.mxu3 %v3886_v49 }
 0x4ba   :  { %2052 = vmatpush.bf16.msrb.mxu0 %v3858_v3  ;;  %2101 = vmatpush.bf16.msrb.mxu1 %v3862_v13  ;;  %v3835_v13 = vld [vmem:[#allocation8 + $0x58] sm:$0xf0] }
 0x4bb   :  { %2150 = vmatpush.bf16.msrb.mxu2 %v3866_v14  ;;  %2199 = vmatpush.bf16.msrb.mxu3 %v3870_v45 }
 0x4be   :  { %2102 = vmatpush.bf16.msrb.mxu1 %v3846_v8  ;;  %v4162_v8 = vld [vmem:[#allocation8 + $0x14] sm:$0xf0] }
 0x4bf   :  { %2151 = vmatpush.bf16.msrb.mxu2 %v3850_v23  ;;  %2200 = vmatpush.bf16.msrb.mxu3 %v3854_v53 }
 0x4c2   :  { %2103 = vmatpush.bf16.msrb.mxu1 %v3830_v4  ;;  %v4221_v4 = vld [vmem:[#allocation9 + $0xec] sm:$0xf0] }
 0x4c3   :  { %2152 = vmatpush.bf16.msrb.mxu2 %v3834_v17  ;;  %v4043_v17 = vld [vmem:[#allocation9 + $0xf8] sm:$0xf0] }
 0x529   :  { %v1565_v34 = vpop.f32.mrf.mxu0  ;;  %v1579_v39 = vpop.f32.mrf.mxu1 }
 0x52a   :  { %v1612_v19 = vadd.f32 %v1565_v34, %v402_v32  ;;  %v1613_v20 = vadd.f32 %v1579_v39, %v451_v33  ;;  %v4173_v32 = vld [vmem:[#allocation8 + $0x6c] sm:$0xf0]  ;;  %v6227_v33 = vld [vmem:[#allocation55_spill] sm:$0xff] }
 0x52b   :  { %v502_v31 = vadd.f32 %v6227_v33, %v5099_v1  ;;  %v3842_v28 = vor.u32 %v4173_v32, %v3841_v38  ;;  %v3793_v32 = vld [vmem:[#allocation8] sm:$0xf] }
 0x52c   :  { %v1620_v47 = vmul.f32 0.5, %v1612_v19  ;;  %v1621_v48 = vmul.f32 0.5, %v1613_v20  ;;  %v551_v19 = vadd.f32 %v6228_v43, %v5097_v0 }
 0x52d   :  { %2053 = vmatpush.bf16.msrb.mxu0 %v3842_v28  ;;  %v4159_v28 = vld [vmem:[#allocation8 + $0x4] sm:$0xf] }
 0x52e   :  { %4399 = vtanh.f32 %v1620_v47 }
 0x52f   :  { %4401 = vtanh.f32 %v1621_v48 }
 0x530   :  { %v1593_v40 = vpop.f32.mrf.mxu2  ;;  %v1607_v42 = vpop.f32.mrf.mxu3 }
 0x531   :  { %v1615_v54 = vadd.f32 %v1607_v42, %v549_v5  ;;  %v1567_v61 = vpop.f32.mrf.mxu0  ;;  %v1581_v62 = vpop.f32.mrf.mxu1  ;;  %v1614_v2 = vadd.f32 %v1593_v40, %v500_v22  ;;  %v4168_v5 = vld [vmem:[#allocation8 + $0x4c] sm:$0xf]  ;;  %2054 = vmatpush.bf16.msrb.mxu0 %v3826_v52  ;;  %v3811_v42 = vld [vmem:[#allocation8 + $0x30] sm:$0xf0] }
 0x532   :  { %v1616_v10 = vadd.f32 %v1567_v61, %v404_v27  ;;  %v1617_v16 = vadd.f32 %v1581_v62, %v453_v35  ;;  %v3838_v22 = vor.u32 %v4168_v5, %v3835_v13  ;;  %v4165_v27 = vld [vmem:[#allocation8 + $0x2c] sm:$0xf0]  ;;  %v3817_v62 = vld [vmem:[#allocation8 + $0x28] sm:$0xf]  ;;  %v4035_v13 = vld [vmem:[#allocation9 + $0xf0] sm:$0xf0] }
 0x533   :  { %4403 = vtanh.f32 %v1615_v54  ;;  %v1622_v39 = vmul.f32 0.5, %v1614_v2  ;;  %v3810_v40 = vor.u32 %v4165_v27, %v3809_v26  ;;  %v4166_v2 = vld [vmem:[#allocation8 + $0x34] sm:$0xf0]  ;;  %v4152_v27 = vld [vmem:[#allocation3] sm:$0xff] }
 0x534   :  { %v4400_v18 = vpop.eup %4399  ;;  %v1623_v21 = vmul.f32 0.5, %v1616_v10  ;;  %v1624_v36 = vmul.f32 0.5, %v1617_v16  ;;  %2201 = vmatpush.bf16.msrb.mxu3 %v3838_v22  ;;  %v3818_v16 = vor.u32 %v4166_v2, %v3817_v62  ;;  %v5425_v22 = vor.u32 %v4219_v9, %v4035_v13  ;;  %v3979_v9 = vld [vmem:[#allocation9 + $0x78] sm:$0xf0] }
 0x535   :  { %v4402_v24 = vpop.eup %4401  ;;  %v1632_v25 = vmul.f32 0.5, %v4400_v18  ;;  %v4164_v18 = vld [vmem:[#allocation8 + $0x2c] sm:$0xf]  ;;  %2055 = vmatpush.bf16.msrb.mxu0 %v3810_v40  ;;  %v4222_v40 = vld [vmem:[#allocation9 + $0xf4] sm:$0xf0] }
 0x536   :  { %v1633_v34 = vmul.f32 0.5, %v4402_v24  ;;  %4405 = vtanh.f32 %v1623_v21  ;;  %v3819_v21 = vld [vmem:[#allocation8 + $0x38] sm:$0xf0]  ;;  %v4161_v24 = vld [vmem:[#allocation8 + $0xc] sm:$0xf0]  ;;  %2153 = vmatpush.bf16.msrb.mxu2 %v3818_v16 }
 0x537   :  { %v1638_v20 = vadd.f32 0.5, %v1632_v25  ;;  %4407 = vtanh.f32 %v1624_v36  ;;  %v3822_v38 = vor.u32 %v4164_v18, %v3819_v21  ;;  %v3794_v25 = vor.u32 %v4161_v24, %v3793_v32  ;;  %v4027_v16 = vld [vmem:[#allocation9 + $0xd8] sm:$0xf0]  ;;  %v4001_v32 = vld [vmem:[#allocation9 + $0xa0] sm:$0xf] }
 0x538   :  { %v1639_v56 = vadd.f32 0.5, %v1633_v34  ;;  %v1595_v58 = vpop.f32.mrf.mxu2  ;;  %v1609_v57 = vpop.f32.mrf.mxu3  ;;  %4409 = vtanh.f32 %v1622_v39  ;;  %v3798_v34 = vor.u32 %v4159_v28, %v3795_v50  ;;  %v3801_v39 = vld [vmem:[#allocation8 + $0x8] sm:$0xf]  ;;  %v4153_v21 = vld [vmem:[#allocation3 + $0x18] sm:$0xff] }
 0x539   :  { %v4404_v47 = vpop.eup %4403  ;;  %v1618_v48 = vadd.f32 %v1595_v58, %v502_v31  ;;  %v1619_v49 = vadd.f32 %v1609_v57, %v551_v19  ;;  %2202 = vmatpush.bf16.msrb.mxu3 %v3822_v38  ;;  %v3802_v19 = vor.u32 %v4162_v8, %v3801_v39  ;;  %2056 = vmatpush.bf16.msrb.mxu0 %v3794_v25  ;;  %v4218_v38 = vld [vmem:[#allocation9 + $0xd4] sm:$0xf0]  ;;  %v4003_v25 = vld [vmem:[#allocation9 + $0xb0] sm:$0xf0] }
 0x53a   :  { %v1646_v63 = vmul.f32 %v1639_v56, %v5392_v15  ;;  %v1648_v3 = vmul.f32 %v4404_v47, %v1638_v20  ;;  %v4163_v15 = vld [vmem:[#allocation8 + $0x24] sm:$0xf]  ;;  %v3803_v20 = vld [vmem:[#allocation8 + $0x18] sm:$0xf0]  ;;  %v4154_v8 = vld [vmem:[#allocation3 + $0x10] sm:$0xff] }
 0x53b   :  { %v1625_v14 = vmul.f32 0.5, %v1618_v48  ;;  %4411 = vtanh.f32 %v1619_v49  ;;  %v3814_v61 = vor.u32 %v4163_v15, %v3811_v42  ;;  %v3806_v7 = vor.u32 %v4160_v51, %v3803_v20  ;;  %2154 = vmatpush.bf16.msrb.mxu2 %v3802_v19  ;;  %v4017_v15 = vld [vmem:[#allocation9 + $0xc0] sm:$0xf]  ;;  %v4009_v51 = vld [vmem:[#allocation9 + $0xa8] sm:$0xf] }
 0x53c   :  { %v4406_v30 = vpop.eup %4405  ;;  %v5416_v35 = vadd.f32 %v1648_v3, %v1646_v63  ;;  %v4151_v63 = vld [vmem:[#allocation3 + $0x30] sm:$0xff]  ;;  %v4033_v3 = vld [vmem:[#allocation9 + $0xe0] sm:$0xf] }
 0x53d   :  { %v4408_v45 = vpop.eup %4407  ;;  %v1635_v54 = vmul.f32 0.5, %v4406_v30  ;;  %4413 = vtanh.f32 %v1625_v14  ;;  %2104 = vmatpush.bf16.msrb.mxu1 %v3814_v61  ;;  %2203 = vmatpush.bf16.msrb.mxu3 %v3806_v7  ;;  %v5423_v5 = vor.u32 %v4221_v4, %v4033_v3  ;;  %v4220_v14 = vld [vmem:[#allocation9 + $0xec] sm:$0xf]  ;;  %v4041_v30 = vld [vmem:[#allocation9 + $0xe8] sm:$0xf] }
 0x53e   :  { %v1636_v10 = vmul.f32 0.5, %v4408_v45  ;;  %v4410_v33 = vpop.eup %4409  ;;  %4415 = vtanh.f32 %v5416_v35  ;;  %v5427_v26 = vor.u32 %v4220_v14, %v4043_v17  ;;  %v5432_v42 = vor.u32 %v4222_v40, %v4041_v30  ;;  %v4217_v45 = vld [vmem:[#allocation9 + $0xcc] sm:$0xf0]  ;;  %v4019_v61 = vld [vmem:[#allocation9 + $0xd0] sm:$0xf0]  ;;  %v6229_v40 = vld [vmem:[#allocation57_spill] sm:$0xff] }
 0x53f   :  { %v1641_v36 = vadd.f32 0.5, %v1635_v54  ;;  %v1634_v23 = vmul.f32 0.5, %v4410_v33  ;;  %v4215_v54 = vld [vmem:[#allocation9 + $0xc4] sm:$0xf]  ;;  %v5434_v62 = vor.u32 %v4217_v45, %v4017_v15  ;;  %v4213_v33 = vld [vmem:[#allocation9 + $0xac] sm:$0xf0]  ;;  %v407_v15 = vadd.f32 %v6229_v40, %v5085_v29 }
 0x540   :  { %v1642_v31 = vadd.f32 0.5, %v1636_v10  ;;  %v5436_v2 = vor.u32 %v4215_v54, %v4019_v61  ;;  %v4216_v10 = vld [vmem:[#allocation9 + $0xcc] sm:$0xf]  ;;  %v5446_v28 = vor.u32 %v4213_v33, %v4001_v32  ;;  %v4209_v20 = vld [vmem:[#allocation9 + $0x8c] sm:$0xf0]  ;;  %v6230_v45 = vld [vmem:[#allocation58_spill] sm:$0xff] }
 0x541   :  { %v4412_v11 = vpop.eup %4411  ;;  %2105 = vmatpush.bf16.msrb.mxu1 %v3798_v34  ;;  %v1640_v57 = vadd.f32 0.5, %v1634_v23  ;;  %v5439_v18 = vor.u32 %v4216_v10, %v4027_v16  ;;  %v4011_v34 = vld [vmem:[#allocation9 + $0xb8] sm:$0xf0]  ;;  %v4207_v23 = vld [vmem:[#allocation9 + $0x84] sm:$0xf]  ;;  %v456_v54 = vadd.f32 %v6230_v45, %v5087_v6  ;;  %v6231_v32 = vld [vmem:[#allocation59_spill] sm:$0xff] }
 0x542   :  { %v1647_v12 = vmul.f32 %v1642_v31, %v5396_v41  ;;  %v1649_v43 = vmul.f32 %v4412_v11, %v1641_v36  ;;  %v4025_v36 = vld [vmem:[#allocation9 + $0xc8] sm:$0xf]  ;;  %v4211_v31 = vld [vmem:[#allocation9 + $0xa4] sm:$0xf]  ;;  %v4212_v11 = vld [vmem:[#allocation9 + $0xac] sm:$0xf]  ;;  %v505_v33 = vadd.f32 %v6231_v32, %v5099_v1 }
 0x543   :  { %v4414_v46 = vpop.eup %4413  ;;  %v5444_v24 = vor.u32 %v4218_v38, %v4025_v36  ;;  %v5448_v50 = vor.u32 %v4211_v31, %v4003_v25  ;;  %v5451_v39 = vor.u32 %v4212_v11, %v4011_v34  ;;  %v3987_v7 = vld [vmem:[#allocation9 + $0x90] sm:$0xf0]  ;;  %v4204_v4 = vld [vmem:[#allocation9 + $0x6c] sm:$0xf]  ;;  %v3977_v17 = vld [vmem:[#allocation9 + $0x68] sm:$0xf] }
 0x544   :  { %v5420_v56 = vadd.f32 %v1649_v43, %v1647_v12  ;;  %v4416_v58 = vpop.eup %4415  ;;  %v1637_v53 = vmul.f32 0.5, %v4414_v46  ;;  %v4214_v12 = vld [vmem:[#allocation9 + $0xb4] sm:$0xf0]  ;;  %v3985_v43 = vld [vmem:[#allocation9 + $0x80] sm:$0xf]  ;;  %v5475_v14 = vor.u32 %v4204_v4, %v3979_v9  ;;  %v6232_v31 = vld [vmem:[#allocation60_spill] sm:$0xff] }
 0x545   :  { %v1654_v44 = vmul.f32 %v4416_v58, %v1640_v57  ;;  %v5456_v19 = vor.u32 %v4214_v12, %v4009_v51  ;;  %v5458_v46 = vor.u32 %v4209_v20, %v3985_v43  ;;  %v5460_v58 = vor.u32 %v4207_v23, %v3987_v7  ;;  %v4208_v57 = vld [vmem:[#allocation9 + $0x8c] sm:$0xf]  ;;  %v3971_v3 = vld [vmem:[#allocation9 + $0x70] sm:$0xf0]  ;;  %v6233_v11 = vld [vmem:[#allocation61_spill] sm:$0xff] }
 0x546   :  { %4417 = vtanh.f32 %v5420_v56  ;;  %v1643_v41 = vadd.f32 0.5, %v1637_v53  ;;  %v3995_v53 = vld [vmem:[#allocation9 + $0x98] sm:$0xf0]  ;;  %v554_v25 = vadd.f32 %v6232_v31, %v5097_v0  ;;  %v409_v34 = vadd.f32 %v6233_v11, %v5085_v29  ;;  %v3961_v4 = vld [vmem:[#allocation9 + $0x48] sm:$0xf] }
 0x547   :  { %v1656_v48 = vpack.c.bf16 %v1654_v44, %v1654_v44  ;;  %v4202_v9 = vld [vmem:[#allocation9 + $0x54] sm:$0xf0]  ;;  %v3937_v45 = vld [vmem:[#allocation9 + $0x20] sm:$0xf]  ;;  %v3947_v11 = vld [vmem:[#allocation9 + $0x38] sm:$0xf0] }
 0x549   :  { %v1674_v55 = vunpack.c.l.b16 %v1656_v48 }
 0x54c   :  { %v4418_v37 = vpop.eup %4417 }
 0x54d   :  { %v1655_v47 = vmul.f32 %v4418_v37, %v1643_v41  ;;  %v4155_v41 = vld [vmem:[#allocation3 + $0x8] sm:$0xff] }
 0x54e   :  { %v3993_v37 = vld [vmem:[#allocation9 + $0x88] sm:$0xf] }
 0x54f   :  { %v1657_v49 = vpack.c.bf16 %v1655_v47, %v1655_v47  ;;  %v4264_v52 = vpack.c.bf16 %v1655_v47, %v1654_v44  ;;  %v5463_v44 = vor.u32 %v4208_v57, %v3995_v53  ;;  %v4210_v47 = vld [vmem:[#allocation9 + $0x94] sm:$0xf0]  ;;  %v3953_v53 = vld [vmem:[#allocation9 + $0x40] sm:$0xf] }
 0x550   :  { %v5468_v48 = vor.u32 %v4210_v47, %v3993_v37  ;;  %v4199_v37 = vld [vmem:[#allocation9 + $0x44] sm:$0xf] }
 0x551   :  { %4265 = vst [vmem:[#allocation3 + $0x28] sm:$0xff] %v4264_v52   ;;  %v1675_v59 = vunpack.c.l.b16 %v1657_v49  ;;  %v4156_v49 = vld [vmem:[#allocation3 + $0x20] sm:$0xff] }
 0x553   :  { %v1676_v60 = vpack.c.b16 %v1675_v59, %v1674_v55  ;;  %v3969_v55 = vld [vmem:[#allocation9 + $0x60] sm:$0xf]  ;;  %v4205_v59 = vld [vmem:[#allocation9 + $0x6c] sm:$0xf0] }
 0x555   :  { %1686 = vmatmul.bf16.vlgmr.msra.gmra.mxu0 %v1676_v60  ;;  %1700 = vmatmul.bf16.vlgmr.msra.gmra.mxu1 %v1676_v60 }
 0x556   :  { %1714 = vmatmul.bf16.vlgmr.msra.gmra.mxu2 %v1676_v60  ;;  %1728 = vmatmul.bf16.vlgmr.msra.gmra.mxu3 %v1676_v60  ;;  %v4203_v60 = vld [vmem:[#allocation9 + $0x64] sm:$0xf] }
 0x557   :  { %2509 = vmatpush.bf16.msra.mxu0 %v5423_v5  ;;  %2523 = vmatpush.bf16.msra.mxu1 %v5425_v22  ;;  %v5473_v13 = vor.u32 %v4203_v60, %v3971_v3  ;;  %v3963_v60 = vld [vmem:[#allocation9 + $0x58] sm:$0xf0] }
 0x558   :  { %2551 = vmatpush.bf16.msra.mxu3 %v5427_v26  ;;  %2537 = vmatpush.bf16.msra.mxu2 %v5432_v42  ;;  %v4157_v52 = vld [vmem:[#allocation3 + $0x28] sm:$0xff] }
 0x55b   :  { %2510 = vmatpush.bf16.msra.mxu0 %v5434_v62  ;;  %2524 = vmatpush.bf16.msra.mxu1 %v5436_v2 }
 0x55c   :  { %2552 = vmatpush.bf16.msra.mxu3 %v5439_v18  ;;  %2538 = vmatpush.bf16.msra.mxu2 %v5444_v24 }
 0x55f   :  { %2511 = vmatpush.bf16.msra.mxu0 %v5446_v28  ;;  %2525 = vmatpush.bf16.msra.mxu1 %v5448_v50 }
 0x560   :  { %2553 = vmatpush.bf16.msra.mxu3 %v5451_v39  ;;  %2539 = vmatpush.bf16.msra.mxu2 %v5456_v19 }
 0x563   :  { %2512 = vmatpush.bf16.msra.mxu0 %v5458_v46  ;;  %2526 = vmatpush.bf16.msra.mxu1 %v5460_v58 }
 0x564   :  { %2554 = vmatpush.bf16.msra.mxu3 %v5463_v44  ;;  %2540 = vmatpush.bf16.msra.mxu2 %v5468_v48 }
 0x565   :  { %2057 = vmatmul.bf16.vlgmr.msrb.gmra.mxu0 %v4151_v63  ;;  %2106 = vmatmul.bf16.vlgmr.msrb.gmra.mxu1 %v4151_v63 }
 0x566   :  { %2155 = vmatmul.bf16.vlgmr.msrb.gmra.mxu2 %v4151_v63  ;;  %2204 = vmatmul.bf16.vlgmr.msrb.gmra.mxu3 %v4151_v63  ;;  %v5471_v63 = vor.u32 %v4205_v59, %v3969_v55  ;;  %v3955_v55 = vld [vmem:[#allocation9 + $0x50] sm:$0xf0]  ;;  %v4200_v59 = vld [vmem:[#allocation9 + $0x4c] sm:$0xf] }
 0x567   :  { %2527 = vmatpush.bf16.msra.mxu1 %v5473_v13  ;;  %v5497_v3 = vor.u32 %v4199_v37, %v3955_v55 }
 0x568   :  { %2513 = vmatpush.bf16.msra.mxu0 %v5471_v63  ;;  %2555 = vmatpush.bf16.msra.mxu3 %v5475_v14 }
 0x56b   :  { %2528 = vmatpush.bf16.msra.mxu1 %v5497_v3 }
 0x575   :  { %2062 = vmatmul.bf16.gmra.mxu0 %v4152_v27  ;;  %2111 = vmatmul.bf16.gmra.mxu1 %v4152_v27 }
 0x576   :  { %2160 = vmatmul.bf16.gmra.mxu2 %v4152_v27  ;;  %2209 = vmatmul.bf16.gmra.mxu3 %v4152_v27  ;;  %v4206_v27 = vld [vmem:[#allocation9 + $0x74] sm:$0xf0] }
 0x577   :  { %v5480_v30 = vor.u32 %v4206_v27, %v3977_v17 }
 0x579   :  { %2541 = vmatpush.bf16.msra.mxu2 %v5480_v30 }
 0x585   :  { %2067 = vmatmul.bf16.gmra.mxu0 %v4153_v21  ;;  %2116 = vmatmul.bf16.gmra.mxu1 %v4153_v21 }
 0x586   :  { %2165 = vmatmul.bf16.gmra.mxu2 %v4153_v21  ;;  %2214 = vmatmul.bf16.gmra.mxu3 %v4153_v21 }
 0x595   :  { %2072 = vmatmul.bf16.gmra.mxu0 %v4154_v8  ;;  %2121 = vmatmul.bf16.gmra.mxu1 %v4154_v8 }
 0x596   :  { %2170 = vmatmul.bf16.gmra.mxu2 %v4154_v8  ;;  %2219 = vmatmul.bf16.gmra.mxu3 %v4154_v8  ;;  %v6234_v8 = vld [vmem:[#allocation62_spill] sm:$0xff] }
 0x597   :  { %v458_v51 = vadd.f32 %v6234_v8, %v5087_v6  ;;  %v5499_v6 = vor.u32 %v4200_v59, %v3963_v60  ;;  %v3921_v59 = vld [vmem:[#allocation9] sm:$0xf]  ;;  %v4193_v60 = vld [vmem:[#allocation9 + $0xc] sm:$0xf0] }
 0x599   :  { %2556 = vmatpush.bf16.msra.mxu3 %v5499_v6 }
 0x5a5   :  { %2077 = vmatmul.bf16.gmra.mxu0 %v4155_v41  ;;  %2126 = vmatmul.bf16.gmra.mxu1 %v4155_v41 }
 0x5a6   :  { %2175 = vmatmul.bf16.gmra.mxu2 %v4155_v41  ;;  %2224 = vmatmul.bf16.gmra.mxu3 %v4155_v41  ;;  %v4201_v41 = vld [vmem:[#allocation9 + $0x4c] sm:$0xf0] }
 0x5b5   :  { %2082 = vmatmul.bf16.gmra.mxu0 %v4156_v49  ;;  %2131 = vmatmul.bf16.gmra.mxu1 %v4156_v49 }
 0x5b6   :  { %2180 = vmatmul.bf16.gmra.mxu2 %v4156_v49  ;;  %2229 = vmatmul.bf16.gmra.mxu3 %v4156_v49 }
 0x5c5   :  { %2087 = vmatmul.bf16.gmra.mxu0 %v4157_v52  ;;  %2136 = vmatmul.bf16.gmra.mxu1 %v4157_v52 }
 0x5c6   :  { %2185 = vmatmul.bf16.gmra.mxu2 %v4157_v52  ;;  %2234 = vmatmul.bf16.gmra.mxu3 %v4157_v52  ;;  %v5495_v52 = vor.u32 %v4201_v41, %v3953_v53 }
 0x5c8   :  { %2514 = vmatpush.bf16.msra.mxu0 %v5495_v52 }
 0x5d2   :  { %v1687_v61 = vpop.f32.mrf.mxu0  ;;  %v1701_v10 = vpop.f32.mrf.mxu1 }
 0x5d3   :  { %v1734_v16 = vadd.f32 %v1687_v61, %v407_v15  ;;  %v1735_v21 = vadd.f32 %v1701_v10, %v456_v54  ;;  %v5502_v15 = vor.u32 %v4202_v9, %v3961_v4  ;;  %v4197_v54 = vld [vmem:[#allocation9 + $0x2c] sm:$0xf0]  ;;  %v5524_v9 = vor.u32 %v4193_v60, %v3921_v59 }
 0x5d5   :  { %v1742_v36 = vmul.f32 0.5, %v1734_v16  ;;  %v1743_v38 = vmul.f32 0.5, %v1735_v21  ;;  %v5506_v16 = vor.u32 %v4197_v54, %v3937_v45  ;;  %v4195_v21 = vld [vmem:[#allocation9 + $0x24] sm:$0xf]  ;;  %2542 = vmatpush.bf16.msra.mxu2 %v5502_v15 }
 0x5d7   :  { %4419 = vtanh.f32 %v1742_v36  ;;  %v3939_v36 = vld [vmem:[#allocation9 + $0x30] sm:$0xf0]  ;;  %2515 = vmatpush.bf16.msra.mxu0 %v5506_v16 }
 0x5d8   :  { %4421 = vtanh.f32 %v1743_v38  ;;  %v6235_v38 = vld [vmem:[#allocation63_spill] sm:$0xff]  ;;  %v5511_v31 = vor.u32 %v4195_v21, %v3939_v36 }
 0x5d9   :  { %v1715_v12 = vpop.f32.mrf.mxu2  ;;  %v1729_v43 = vpop.f32.mrf.mxu3  ;;  %v507_v32 = vadd.f32 %v6235_v38, %v5099_v1 }
 0x5da   :  { %v1736_v20 = vadd.f32 %v1715_v12, %v505_v33  ;;  %v1737_v23 = vadd.f32 %v1729_v43, %v554_v25  ;;  %v1689_v7 = vpop.f32.mrf.mxu0  ;;  %v1703_v57 = vpop.f32.mrf.mxu1  ;;  %v4196_v25 = vld [vmem:[#allocation9 + $0x2c] sm:$0xf]  ;;  %v3945_v43 = vld [vmem:[#allocation9 + $0x28] sm:$0xf]  ;;  %2529 = vmatpush.bf16.msra.mxu1 %v5511_v31 }
 0x5db   :  { %v1738_v47 = vadd.f32 %v1689_v7, %v409_v34  ;;  %v1739_v49 = vadd.f32 %v1703_v57, %v458_v51  ;;  %v6236_v34 = vld [vmem:[#allocation64_spill] sm:$0xff]  ;;  %v5515_v12 = vor.u32 %v4196_v25, %v3947_v11  ;;  %2516 = vmatpush.bf16.msra.mxu0 %v5524_v9  ;;  %v3929_v25 = vld [vmem:[#allocation9 + $0x8] sm:$0xf]  ;;  %v4194_v11 = vld [vmem:[#allocation9 + $0x14] sm:$0xf0] }
 0x5dc   :  { %v1744_v29 = vmul.f32 0.5, %v1736_v20  ;;  %4423 = vtanh.f32 %v1737_v23  ;;  %v556_v8 = vadd.f32 %v6236_v34, %v5097_v0  ;;  %v4198_v20 = vld [vmem:[#allocation9 + $0x34] sm:$0xf0] }
 0x5dd   :  { %v4420_v17 = vpop.eup %4419  ;;  %v1745_v27 = vmul.f32 0.5, %v1738_v47  ;;  %v1746_v40 = vmul.f32 0.5, %v1739_v49  ;;  %v5518_v57 = vor.u32 %v4198_v20, %v3945_v43  ;;  %2557 = vmatpush.bf16.msra.mxu3 %v5515_v12  ;;  %v5537_v20 = vor.u32 %v4194_v11, %v3929_v25 }
 0x5de   :  { %v4422_v61 = vpop.eup %4421  ;;  %v1754_v10 = vmul.f32 0.5, %v4420_v17  ;;  %4425 = vtanh.f32 %v1744_v29  ;;  %v4191_v17 = vld [vmem:[#allocation9 + $0x4] sm:$0xf] }
 0x5df   :  { %v1755_v33 = vmul.f32 0.5, %v4422_v61  ;;  %4427 = vtanh.f32 %v1745_v27  ;;  %2543 = vmatpush.bf16.msra.mxu2 %v5518_v57  ;;  %v3923_v27 = vld [vmem:[#allocation9 + $0x10] sm:$0xf0]  ;;  %v3931_v61 = vld [vmem:[#allocation9 + $0x18] sm:$0xf0]  ;;  %2618 = vmatpush.bf16.msrb.mxu0 %v5423_v5 }
 0x5e0   :  { %v1760_v51 = vadd.f32 0.5, %v1754_v10  ;;  %4429 = vtanh.f32 %v1746_v40  ;;  %v5526_v54 = vor.u32 %v4191_v17, %v3923_v27 }
 0x5e1   :  { %v1761_v23 = vadd.f32 0.5, %v1755_v33  ;;  %v1717_v7 = vpop.f32.mrf.mxu2  ;;  %v1731_v1 = vpop.f32.mrf.mxu3 }
 0x5e2   :  { %v4424_v53 = vpop.eup %4423  ;;  %v1740_v41 = vadd.f32 %v1717_v7, %v507_v32  ;;  %v1741_v37 = vadd.f32 %v1731_v1, %v556_v8  ;;  %2530 = vmatpush.bf16.msra.mxu1 %v5526_v54 }
 0x5e3   :  { %v1768_v0 = vmul.f32 %v1761_v23, %v5416_v35  ;;  %v1770_v47 = vmul.f32 %v4424_v53, %v1760_v51  ;;  %v4192_v35 = vld [vmem:[#allocation9 + $0xc] sm:$0xf]  ;;  %2619 = vmatpush.bf16.msrb.mxu0 %v5434_v62  ;;  %2544 = vmatpush.bf16.msra.mxu2 %v5537_v20 }
 0x5e4   :  { %v4426_v49 = vpop.eup %4425  ;;  %v1747_v55 = vmul.f32 0.5, %v1740_v41  ;;  %4431 = vtanh.f32 %v1741_v37  ;;  %v5529_v21 = vor.u32 %v4192_v35, %v3931_v61 }
 0x5e5   :  { %v4428_v29 = vpop.eup %4427  ;;  %v1772_v4 = vadd.f32 %v1770_v47, %v1768_v0  ;;  %v1756_v36 = vmul.f32 0.5, %v4426_v49  ;;  %v5550_v0 = vpop.f32.mrf.mxu0 }
 0x5e6   :  { %v4430_v40 = vpop.eup %4429  ;;  %v1757_v45 = vmul.f32 0.5, %v4428_v29  ;;  %4433 = vtanh.f32 %v1747_v55  ;;  %2558 = vmatpush.bf16.msra.mxu3 %v5529_v21  ;;  %2632 = vmatpush.bf16.msrb.mxu1 %v5425_v22  ;;  %v5552_v47 = vpop.f32.mrf.mxu1 }
 0x5e7   :  { %4435 = vtanh.f32 %v1772_v4  ;;  %v1758_v10 = vmul.f32 0.5, %v4430_v40  ;;  %v1762_v43 = vadd.f32 0.5, %v1756_v36  ;;  %2646 = vmatpush.bf16.msrb.mxu2 %v5432_v42  ;;  %2620 = vmatpush.bf16.msrb.mxu0 %v5446_v28 }
 0x5e8   :  { %v1763_v38 = vadd.f32 0.5, %v1757_v45 }
 0x5e9   :  { %v1764_v32 = vadd.f32 0.5, %v1758_v10  ;;  %v5561_v55 = vpop.f32.mrf.mxu2  ;;  %v5563_v59 = vpop.f32.mrf.mxu3  ;;  %v6238_v10 = vmov 0  }
 0x5ea   :  { %v4432_v33 = vpop.eup %4431  ;;  %2660 = vmatpush.bf16.msrb.mxu3 %v5427_v26  ;;  %2633 = vmatpush.bf16.msrb.mxu1 %v5436_v2 }
 0x5eb   :  { %v1769_v34 = vmul.f32 %v1764_v32, %v5420_v56  ;;  %v1771_v8 = vmul.f32 %v4432_v33, %v1763_v38  ;;  %2647 = vmatpush.bf16.msrb.mxu2 %v5444_v24  ;;  %2621 = vmatpush.bf16.msrb.mxu0 %v5458_v46 }
 0x5ec   :  { %v4434_v51 = vpop.eup %4433 }
 0x5ed   :  { %v4436_v23 = vpop.eup %4435  ;;  %v1773_v7 = vadd.f32 %v1771_v8, %v1769_v34  ;;  %v1759_v56 = vmul.f32 0.5, %v4434_v51  ;;  %v5568_v60 = vpop.f32.mrf.mxu0 }
 0x5ee   :  { %v1776_v1 = vmul.f32 %v4436_v23, %v1762_v43  ;;  %2661 = vmatpush.bf16.msrb.mxu3 %v5439_v18  ;;  %2634 = vmatpush.bf16.msrb.mxu1 %v5448_v50  ;;  %v5570_v29 = vpop.f32.mrf.mxu1 }
 0x5ef   :  { %4437 = vtanh.f32 %v1773_v7  ;;  %v1765_v53 = vadd.f32 0.5, %v1759_v56  ;;  %2648 = vmatpush.bf16.msrb.mxu2 %v5456_v19  ;;  %2622 = vmatpush.bf16.msrb.mxu0 %v5471_v63 }
 0x5f1   :  { %v5579_v17 = vpop.f32.mrf.mxu2  ;;  %v5581_v27 = vpop.f32.mrf.mxu3 }
 0x5f2   :  { %2662 = vmatpush.bf16.msrb.mxu3 %v5451_v39  ;;  %2635 = vmatpush.bf16.msrb.mxu1 %v5460_v58 }
 0x5f3   :  { %2649 = vmatpush.bf16.msrb.mxu2 %v5468_v48  ;;  %2623 = vmatpush.bf16.msrb.mxu0 %v5495_v52 }
 0x5f5   :  { %v4438_v41 = vpop.eup %4437  ;;  %v5584_v40 = vpop.f32.mrf.mxu0 }
 0x5f6   :  { %v1777_v37 = vmul.f32 %v4438_v41, %v1765_v53  ;;  %2663 = vmatpush.bf16.msrb.mxu3 %v5463_v44  ;;  %2636 = vmatpush.bf16.msrb.mxu1 %v5473_v13  ;;  %v5586_v45 = vpop.f32.mrf.mxu1 }
 0x5f7   :  { %2650 = vmatpush.bf16.msrb.mxu2 %v5480_v30  ;;  %2624 = vmatpush.bf16.msrb.mxu0 %v5506_v16 }
 0x5f8   :  { %v4269_v49 = vpack.c.bf16 %v1777_v37, %v1776_v1 }
 0x5f9   :  { %v5589_v35 = vpop.f32.mrf.mxu2  ;;  %v5591_v61 = vpop.f32.mrf.mxu3 }
 0x5fa   :  { %4270 = vst [vmem:[#allocation3 + $0x38] sm:$0xff] %v4269_v49   ;;  %2664 = vmatpush.bf16.msrb.mxu3 %v5475_v14  ;;  %2637 = vmatpush.bf16.msrb.mxu1 %v5497_v3 }
 0x5fb   :  { %2651 = vmatpush.bf16.msrb.mxu2 %v5502_v15  ;;  %2625 = vmatpush.bf16.msrb.mxu0 %v5524_v9  ;;  %6237 = vst [vmem:[#allocation14_spill] sm:$0xff] %v5589_v35 }
 0x5fd   :  { %v5595_v36 = vpop.f32.mrf.mxu0 }
 0x5fe   :  { %2665 = vmatpush.bf16.msrb.mxu3 %v5499_v6  ;;  %2638 = vmatpush.bf16.msrb.mxu1 %v5511_v31  ;;  %v5597_v38 = vpop.f32.mrf.mxu1 }
 0x5ff   :  { %2652 = vmatpush.bf16.msrb.mxu2 %v5518_v57 }
 0x601   :  { %v4158_v4 = vld [vmem:[#allocation3 + $0x38] sm:$0xff]  ;;  %v5609_v32 = vpop.f32.mrf.mxu2  ;;  %v5611_v33 = vpop.f32.mrf.mxu3 }
 0x602   :  { %2666 = vmatpush.bf16.msrb.mxu3 %v5515_v12  ;;  %2092 = vmatmul.bf16.gmra.mxu0 %v4158_v4  ;;  %6239 = vst [vmem:[#allocation15_spill] sm:$0xff] %v5609_v32 }
 0x603   :  { %2141 = vmatmul.bf16.gmra.mxu1 %v4158_v4  ;;  %2190 = vmatmul.bf16.gmra.mxu2 %v4158_v4  ;;  %6240 = vst [vmem:[#allocation16_spill] sm:$0xff] %v5611_v33 }
 0x604   :  { %2239 = vmatmul.bf16.gmra.mxu3 %v4158_v4  ;;  %2639 = vmatpush.bf16.msrb.mxu1 %v5526_v54 }
 0x605   :  { %2653 = vmatpush.bf16.msrb.mxu2 %v5537_v20  ;;  %v5615_v25 = vpop.f32.mrf.mxu0 }
 0x606   :  { %2667 = vmatpush.bf16.msrb.mxu3 %v5529_v21  ;;  %6241 = vst [vmem:[#allocation17_spill] sm:$0xff] %v5615_v25  ;;  %v5617_v11 = vpop.f32.mrf.mxu1 }
 0x607   :  { %6242 = vst [vmem:[#allocation18_spill] sm:$0xff] %v5617_v11 }
 0x609   :  { %v5625_v34 = vpop.f32.mrf.mxu2  ;;  %v5627_v8 = vpop.f32.mrf.mxu3 }
 0x60a   :  { %6243 = vst [vmem:[#allocation20_spill] sm:$0xff] %v5625_v34 }
 0x60b   :  { %6244 = vst [vmem:[#allocation19_spill] sm:$0xff] %v5627_v8 }
 0x60d   :  { %v5633_v51 = vpop.f32.mrf.mxu0 }
 0x60e   :  { %6245 = vst [vmem:[#allocation21_spill] sm:$0xff] %v5633_v51  ;;  %v5635_v43 = vpop.f32.mrf.mxu1 }
 0x60f   :  { %6246 = vst [vmem:[#allocation22_spill] sm:$0xff] %v5635_v43 }
 0x611   :  { %v5645_v23 = vpop.f32.mrf.mxu2  ;;  %v5647_v7 = vpop.f32.mrf.mxu3 }
 0x612   :  { %2517 = vmatmul.bf16.vlgmr.msra.gmra.mxu0 %v6238_v10  ;;  %6247 = vst [vmem:[#allocation23_spill] sm:$0xff] %v5645_v23 }
 0x613   :  { %2531 = vmatmul.bf16.vlgmr.msra.gmra.mxu1 %v6238_v10  ;;  %2545 = vmatmul.bf16.vlgmr.msra.gmra.mxu2 %v6238_v10  ;;  %6248 = vst [vmem:[#allocation24_spill] sm:$0xff] %v5647_v7 }
 0x614   :  { %2559 = vmatmul.bf16.vlgmr.msra.gmra.mxu3 %v6238_v10  ;;  %2727 = vmatpush.bf16.msra.mxu0 %v5423_v5 }
 0x615   :  { %2741 = vmatpush.bf16.msra.mxu1 %v5425_v22  ;;  %2755 = vmatpush.bf16.msra.mxu2 %v5432_v42  ;;  %v5651_v1 = vpop.f32.mrf.mxu0 }
 0x616   :  { %2769 = vmatpush.bf16.msra.mxu3 %v5427_v26  ;;  %6249 = vst [vmem:[#allocation25_spill] sm:$0xff] %v5651_v1  ;;  %v5653_v56 = vpop.f32.mrf.mxu1 }
 0x617   :  { %6250 = vst [vmem:[#allocation26_spill] sm:$0xff] %v5653_v56 }
 0x618   :  { %2728 = vmatpush.bf16.msra.mxu0 %v5434_v62 }
 0x619   :  { %2742 = vmatpush.bf16.msra.mxu1 %v5436_v2  ;;  %2756 = vmatpush.bf16.msra.mxu2 %v5444_v24  ;;  %v5657_v53 = vpop.f32.mrf.mxu2  ;;  %v5659_v41 = vpop.f32.mrf.mxu3 }
 0x61a   :  { %2770 = vmatpush.bf16.msra.mxu3 %v5439_v18  ;;  %6251 = vst [vmem:[#allocation28_spill] sm:$0xff] %v5657_v53 }
 0x61b   :  { %6252 = vst [vmem:[#allocation27_spill] sm:$0xff] %v5659_v41 }
 0x61c   :  { %2729 = vmatpush.bf16.msra.mxu0 %v5446_v28 }
 0x61d   :  { %2743 = vmatpush.bf16.msra.mxu1 %v5448_v50  ;;  %2757 = vmatpush.bf16.msra.mxu2 %v5456_v19  ;;  %v5661_v37 = vpop.f32.mrf.mxu0 }
 0x61e   :  { %2771 = vmatpush.bf16.msra.mxu3 %v5451_v39  ;;  %6253 = vst [vmem:[#allocation29_spill] sm:$0xff] %v5661_v37  ;;  %v5663_v49 = vpop.f32.mrf.mxu1 }
 0x61f   :  { %6254 = vst [vmem:[#allocation30_spill] sm:$0xff] %v5663_v49 }
 0x620   :  { %2730 = vmatpush.bf16.msra.mxu0 %v5458_v46 }
 0x621   :  { %2744 = vmatpush.bf16.msra.mxu1 %v5460_v58  ;;  %2758 = vmatpush.bf16.msra.mxu2 %v5468_v48  ;;  %v5665_v4 = vpop.f32.mrf.mxu2  ;;  %v5667_v10 = vpop.f32.mrf.mxu3 }
 0x622   :  { %2772 = vmatpush.bf16.msra.mxu3 %v5463_v44  ;;  %6255 = vst [vmem:[#allocation31_spill] sm:$0xff] %v5665_v4 }
 0x623   :  { %6256 = vst [vmem:[#allocation32_spill] sm:$0xff] %v5667_v10 }
 0x624   :  { %2731 = vmatpush.bf16.msra.mxu0 %v5471_v63 }
 0x625   :  { %2745 = vmatpush.bf16.msra.mxu1 %v5473_v13  ;;  %2759 = vmatpush.bf16.msra.mxu2 %v5480_v30  ;;  %v5669_v7 = vpop.f32.mrf.mxu0 }
 0x626   :  { %2773 = vmatpush.bf16.msra.mxu3 %v5475_v14  ;;  %6257 = vst [vmem:[#allocation33_spill] sm:$0xff] %v5669_v7  ;;  %v5671_v1 = vpop.f32.mrf.mxu1 }
 0x627   :  { %6258 = vst [vmem:[#allocation34_spill] sm:$0xff] %v5671_v1 }
 0x628   :  { %2732 = vmatpush.bf16.msra.mxu0 %v5495_v52 }
 0x629   :  { %2746 = vmatpush.bf16.msra.mxu1 %v5497_v3  ;;  %2760 = vmatpush.bf16.msra.mxu2 %v5502_v15  ;;  %v5673_v56 = vpop.f32.mrf.mxu2  ;;  %v5675_v23 = vpop.f32.mrf.mxu3 }
 0x62a   :  { %2774 = vmatpush.bf16.msra.mxu3 %v5499_v6  ;;  %6259 = vst [vmem:[#allocation36_spill] sm:$0xff] %v5673_v56 }
 0x62b   :  { %6260 = vst [vmem:[#allocation35_spill] sm:$0xff] %v5675_v23 }
 0x62c   :  { %2733 = vmatpush.bf16.msra.mxu0 %v5506_v16 }
 0x62d   :  { %2747 = vmatpush.bf16.msra.mxu1 %v5511_v31  ;;  %2761 = vmatpush.bf16.msra.mxu2 %v5518_v57  ;;  %v5677_v34 = vpop.f32.mrf.mxu0 }
 0x62e   :  { %2775 = vmatpush.bf16.msra.mxu3 %v5515_v12  ;;  %6261 = vst [vmem:[#allocation37_spill] sm:$0xff] %v5677_v34  ;;  %v5679_v53 = vpop.f32.mrf.mxu1 }
 0x62f   :  { %6262 = vst [vmem:[#allocation38_spill] sm:$0xff] %v5679_v53 }
 0x630   :  { %2734 = vmatpush.bf16.msra.mxu0 %v5524_v9 }
 0x631   :  { %2748 = vmatpush.bf16.msra.mxu1 %v5526_v54  ;;  %2762 = vmatpush.bf16.msra.mxu2 %v5537_v20  ;;  %v5681_v41 = vpop.f32.mrf.mxu2  ;;  %v5683_v37 = vpop.f32.mrf.mxu3 }
 0x632   :  { %2776 = vmatpush.bf16.msra.mxu3 %v5529_v21  ;;  %6263 = vst [vmem:[#allocation39_spill] sm:$0xff] %v5681_v41 }
 0x633   :  { %6264 = vst [vmem:[#allocation40_spill] sm:$0xff] %v5683_v37 }
 0x635   :  { %v5685_v49 = vpop.f32.mrf.mxu0 }
 0x636   :  { %6265 = vst [vmem:[#allocation41_spill] sm:$0xff] %v5685_v49  ;;  %v5687_v4 = vpop.f32.mrf.mxu1 }
 0x637   :  { %6266 = vst [vmem:[#allocation42_spill] sm:$0xff] %v5687_v4 }
 0x639   :  { %v5689_v10 = vpop.f32.mrf.mxu2  ;;  %v5691_v7 = vpop.f32.mrf.mxu3 }
 0x63a   :  { %6267 = vst [vmem:[#allocation44_spill] sm:$0xff] %v5689_v10 }
 0x63b   :  { %6268 = vst [vmem:[#allocation43_spill] sm:$0xff] %v5691_v7 }
 0x63d   :  { %v5693_v1 = vpop.f32.mrf.mxu0 }
 0x63e   :  { %6269 = vst [vmem:[#allocation45_spill] sm:$0xff] %v5693_v1  ;;  %v5695_v56 = vpop.f32.mrf.mxu1 }
 0x63f   :  { %6270 = vst [vmem:[#allocation46_spill] sm:$0xff] %v5695_v56 }
 0x641   :  { %v5697_v23 = vpop.f32.mrf.mxu2  ;;  %v5699_v34 = vpop.f32.mrf.mxu3 }
 0x642   :  { %6271 = vst [vmem:[#allocation47_spill] sm:$0xff] %v5697_v23 }
 0x643   :  { %6272 = vst [vmem:[#allocation48_spill] sm:$0xff] %v5699_v34 }
 0x645   :  { %v5701_v53 = vpop.f32.mrf.mxu0 }
 0x646   :  { %6273 = vst [vmem:[#allocation49_spill] sm:$0xff] %v5701_v53  ;;  %v5703_v41 = vpop.f32.mrf.mxu1 }
 0x647   :  { %6274 = vst [vmem:[#allocation50_spill] sm:$0xff] %v5703_v41 }
 0x649   :  { %v5705_v37 = vpop.f32.mrf.mxu2  ;;  %v5707_v49 = vpop.f32.mrf.mxu3 }
 0x64a   :  { %6275 = vst [vmem:[#allocation52_spill] sm:$0xff] %v5705_v37  ;;  %v1831_v37 = vld [vmem:[%s6127_s6] sm:$0xf] }
 0x64b   :  { %6276 = vst [vmem:[#allocation51_spill] sm:$0xff] %v5707_v49  ;;  %v5744_v51 = vperm.slane %v1831_v37, 3  ;;  %v5746_v11 = vperm.slane %v1831_v37, 2 }
 0x64d   :  { %v5709_v4 = vpop.f32.mrf.mxu0  ;;  %6289 = vst [vmem:[#allocation65_spill] sm:$0xff] %v5746_v11 }
 0x64e   :  { %6277 = vst [vmem:[#allocation53_spill] sm:$0xff] %v5709_v4  ;;  %v5711_v10 = vpop.f32.mrf.mxu1 }
 0x64f   :  { %6278 = vst [vmem:[#allocation54_spill] sm:$0xff] %v5711_v10  ;;  %v5732_v10 = vperm.slane %v1831_v37, 0 }
 0x651   :  { %v5713_v7 = vpop.f32.mrf.mxu2  ;;  %v5715_v1 = vpop.f32.mrf.mxu3 }
 0x652   :  { %6279 = vst [vmem:[#allocation55_spill] sm:$0xff] %v5713_v7  ;;  %v5734_v7 = vperm.slane %v1831_v37, 1  ;;  %v2157_v37 = vadd.f32 %v5561_v55, %v5746_v11 }
 0x653   :  { %6280 = vst [vmem:[#allocation56_spill] sm:$0xff] %v5715_v1 }
 0x67f   :  { %v5717_v56 = vpop.f32.mrf.mxu0 }
 0x680   :  { %6281 = vst [vmem:[#allocation57_spill] sm:$0xff] %v5717_v56  ;;  %v5719_v23 = vpop.f32.mrf.mxu1  ;;  %v2059_v56 = vadd.f32 %v5550_v0, %v5732_v10  ;;  %v2206_v0 = vadd.f32 %v5563_v59, %v5744_v51 }
 0x681   :  { %6282 = vst [vmem:[#allocation58_spill] sm:$0xff] %v5719_v23 }
 0x686   :  { %v5721_v34 = vpop.f32.mrf.mxu2 }
 0x687   :  { %6283 = vst [vmem:[#allocation59_spill] sm:$0xff] %v5721_v34  ;;  %v5723_v53 = vpop.f32.mrf.mxu3  ;;  %v5728_v49 = vpop.f32.mrf.mxu0  ;;  %v2108_v34 = vadd.f32 %v5552_v47, %v5734_v7  ;;  %v2061_v47 = vadd.f32 %v5568_v60, %v5732_v10 }
 0x688   :  { %6284 = vst [vmem:[#allocation60_spill] sm:$0xff] %v5723_v53  ;;  %v5730_v4 = vpop.f32.mrf.mxu1 }
 0x689   :  { %6285 = vst [vmem:[#allocation61_spill] sm:$0xff] %v5728_v49 }
 0x68a   :  { %6286 = vst [vmem:[#allocation62_spill] sm:$0xff] %v5730_v4 }
 0x68e   :  { %v5740_v23 = vpop.f32.mrf.mxu2 }
 0x68f   :  { %6287 = vst [vmem:[#allocation63_spill] sm:$0xff] %v5740_v23  ;;  %v5742_v53 = vpop.f32.mrf.mxu3  ;;  %v2518_v1 = vpop.f32.mrf.mxu0 }
 0x690   :  { %6288 = vst [vmem:[#allocation64_spill] sm:$0xff] %v5742_v53  ;;  %v2532_v41 = vpop.f32.mrf.mxu1  ;;  %v2565_v43 = vadd.f32 %v2518_v1, %v2059_v56  ;;  %v2110_v53 = vadd.f32 %v5570_v29, %v5734_v7  ;;  %v2159_v29 = vadd.f32 %v5579_v17, %v5746_v11 }
 0x691   :  { %v2566_v49 = vadd.f32 %v2532_v41, %v2108_v34 }
 0x692   :  { %v2573_v4 = vmul.f32 0.5, %v2565_v43 }
 0x693   :  { %v2574_v8 = vmul.f32 0.5, %v2566_v49 }
 0x694   :  { %4439 = vtanh.f32 %v2573_v4 }
 0x695   :  { %4441 = vtanh.f32 %v2574_v8 }
 0x696   :  { %v2546_v23 = vpop.f32.mrf.mxu2 }
 0x697   :  { %v2560_v1 = vpop.f32.mrf.mxu3  ;;  %v2520_v56 = vpop.f32.mrf.mxu0  ;;  %v2567_v60 = vadd.f32 %v2546_v23, %v2157_v37 }
 0x698   :  { %v2568_v34 = vadd.f32 %v2560_v1, %v2206_v0  ;;  %v2534_v41 = vpop.f32.mrf.mxu1  ;;  %v2569_v43 = vadd.f32 %v2520_v56, %v2061_v47  ;;  %v2208_v0 = vadd.f32 %v5581_v27, %v5744_v51 }
 0x699   :  { %v2570_v49 = vadd.f32 %v2534_v41, %v2110_v53  ;;  %v2575_v56 = vmul.f32 0.5, %v2567_v60 }
 0x69a   :  { %4443 = vtanh.f32 %v2568_v34  ;;  %v4440_v4 = vpop.eup %4439  ;;  %v2576_v59 = vmul.f32 0.5, %v2569_v43 }
 0x69b   :  { %v2577_v8 = vmul.f32 0.5, %v2570_v49  ;;  %v4442_v25 = vpop.eup %4441  ;;  %v2585_v33 = vmul.f32 0.5, %v4440_v4 }
 0x69c   :  { %v2586_v32 = vmul.f32 0.5, %v4442_v25  ;;  %4445 = vtanh.f32 %v2576_v59 }
 0x69d   :  { %v2591_v47 = vadd.f32 0.5, %v2585_v33  ;;  %4447 = vtanh.f32 %v2577_v8 }
 0x69e   :  { %v2592_v53 = vadd.f32 0.5, %v2586_v32  ;;  %v2548_v1 = vpop.f32.mrf.mxu2 }
 0x69f   :  { %v2562_v55 = vpop.f32.mrf.mxu3  ;;  %v2571_v41 = vadd.f32 %v2548_v1, %v2159_v29 }
 0x6a0   :  { %v4444_v34 = vpop.eup %4443  ;;  %v2572_v43 = vadd.f32 %v2562_v55, %v2208_v0  ;;  %v2599_v49 = vmul.f32 0.0, %v2592_v53 }
 0x6a1   :  { %v2601_v4 = vmul.f32 %v4444_v34, %v2591_v47  ;;  %v2578_v23 = vmul.f32 0.5, %v2571_v41 }
 0x6a2   :  { %4449 = vtanh.f32 %v2572_v43  ;;  %v4446_v25 = vpop.eup %4445 }
 0x6a3   :  { %v5760_v37 = vadd.f32 %v2601_v4, %v2599_v49  ;;  %v4448_v17 = vpop.eup %4447  ;;  %4451 = vtanh.f32 %v2575_v56  ;;  %v2588_v59 = vmul.f32 0.5, %v4446_v25 }
 0x6a4   :  { %v2589_v27 = vmul.f32 0.5, %v4448_v17  ;;  %4453 = vtanh.f32 %v2578_v23 }
 0x6a5   :  { %v2594_v33 = vadd.f32 0.5, %v2588_v59  ;;  %4455 = vtanh.f32 %v5760_v37 }
 0x6a6   :  { %v2595_v32 = vadd.f32 0.5, %v2589_v27 }
 0x6a8   :  { %v4450_v8 = vpop.eup %4449  ;;  %v2600_v35 = vmul.f32 0.0, %v2595_v32  ;;  %v2066_v32 = vadd.f32 %v5595_v36, %v5732_v10 }
 0x6a9   :  { %v2602_v11 = vmul.f32 %v4450_v8, %v2594_v33  ;;  %v4452_v60 = vpop.eup %4451  ;;  %v2211_v33 = vadd.f32 %v5591_v61, %v5744_v51 }
 0x6aa   :  { %v4454_v29 = vpop.eup %4453  ;;  %v2587_v47 = vmul.f32 0.5, %v4452_v60 }
 0x6ab   :  { %v5763_v0 = vadd.f32 %v2602_v11, %v2600_v35  ;;  %v2590_v53 = vmul.f32 0.5, %v4454_v29  ;;  %v4456_v1 = vpop.eup %4455  ;;  %v2064_v35 = vadd.f32 %v5584_v40, %v5732_v10  ;;  %v2113_v11 = vadd.f32 %v5586_v45, %v5734_v7 }
 0x6ac   :  { %v2593_v55 = vadd.f32 0.5, %v2587_v47  ;;  %v2115_v40 = vadd.f32 %v5597_v38, %v5734_v7  ;;  %v6292_v38 = vld [vmem:[#allocation15_spill] sm:$0xff] }
 0x6ad   :  { %4457 = vtanh.f32 %v5763_v0  ;;  %v2596_v34 = vadd.f32 0.5, %v2590_v53 }
 0x6ae   :  { %v2607_v41 = vmul.f32 %v4456_v1, %v2593_v55  ;;  %v6290_v55 = vld [vmem:[#allocation65_spill] sm:$0xff] }
 0x6b3   :  { %v4458_v56 = vpop.eup %4457 }
 0x6b4   :  { %v2608_v43 = vmul.f32 %v4458_v56, %v2596_v34  ;;  %v6291_v34 = vld [vmem:[#allocation14_spill] sm:$0xff] }
 0x6b5   :  { %v2162_v56 = vadd.f32 %v6291_v34, %v6290_v55 }
 0x6b6   :  { %v2617_v49 = vpack.c.bf16 %v2608_v43, %v2607_v41 }
 0x6b8   :  { %2626 = vmatmul.bf16.vlgmr.msrb.gmra.mxu0 %v2617_v49  ;;  %2640 = vmatmul.bf16.vlgmr.msrb.gmra.mxu1 %v2617_v49 }
 0x6b9   :  { %2654 = vmatmul.bf16.vlgmr.msrb.gmra.mxu2 %v2617_v49  ;;  %2668 = vmatmul.bf16.vlgmr.msrb.gmra.mxu3 %v2617_v49 }
 0x6ba   :  { %2836 = vmatpush.bf16.msrb.mxu0 %v5423_v5  ;;  %2850 = vmatpush.bf16.msrb.mxu1 %v5425_v22 }
 0x6bb   :  { %2864 = vmatpush.bf16.msrb.mxu2 %v5432_v42  ;;  %2878 = vmatpush.bf16.msrb.mxu3 %v5427_v26 }
 0x6be   :  { %2837 = vmatpush.bf16.msrb.mxu0 %v5434_v62  ;;  %2851 = vmatpush.bf16.msrb.mxu1 %v5436_v2 }
 0x6bf   :  { %2865 = vmatpush.bf16.msrb.mxu2 %v5444_v24  ;;  %2879 = vmatpush.bf16.msrb.mxu3 %v5439_v18 }
 0x6c2   :  { %2838 = vmatpush.bf16.msrb.mxu0 %v5446_v28  ;;  %2852 = vmatpush.bf16.msrb.mxu1 %v5448_v50 }
 0x6c3   :  { %2866 = vmatpush.bf16.msrb.mxu2 %v5456_v19  ;;  %2880 = vmatpush.bf16.msrb.mxu3 %v5451_v39 }
 0x6c6   :  { %2839 = vmatpush.bf16.msrb.mxu0 %v5458_v46  ;;  %2853 = vmatpush.bf16.msrb.mxu1 %v5460_v58 }
 0x6c7   :  { %2867 = vmatpush.bf16.msrb.mxu2 %v5468_v48  ;;  %2881 = vmatpush.bf16.msrb.mxu3 %v5463_v44 }
 0x6ca   :  { %2840 = vmatpush.bf16.msrb.mxu0 %v5471_v63  ;;  %2854 = vmatpush.bf16.msrb.mxu1 %v5473_v13 }
 0x6cb   :  { %2868 = vmatpush.bf16.msrb.mxu2 %v5480_v30  ;;  %2882 = vmatpush.bf16.msrb.mxu3 %v5475_v14 }
 0x6ce   :  { %2841 = vmatpush.bf16.msrb.mxu0 %v5495_v52  ;;  %2855 = vmatpush.bf16.msrb.mxu1 %v5497_v3 }
 0x6cf   :  { %2869 = vmatpush.bf16.msrb.mxu2 %v5502_v15  ;;  %2883 = vmatpush.bf16.msrb.mxu3 %v5499_v6 }
 0x6d2   :  { %2842 = vmatpush.bf16.msrb.mxu0 %v5506_v16  ;;  %2856 = vmatpush.bf16.msrb.mxu1 %v5511_v31 }
 0x6d3   :  { %2870 = vmatpush.bf16.msrb.mxu2 %v5518_v57  ;;  %2884 = vmatpush.bf16.msrb.mxu3 %v5515_v12 }
 0x6d6   :  { %2843 = vmatpush.bf16.msrb.mxu0 %v5524_v9  ;;  %2857 = vmatpush.bf16.msrb.mxu1 %v5526_v54 }
 0x6d7   :  { %2871 = vmatpush.bf16.msrb.mxu2 %v5537_v20  ;;  %2885 = vmatpush.bf16.msrb.mxu3 %v5529_v21 }
 0x735   :  { %v2627_v4 = vpop.f32.mrf.mxu0  ;;  %v2641_v23 = vpop.f32.mrf.mxu1 }
 0x736   :  { %v2674_v25 = vadd.f32 %v2627_v4, %v2064_v35  ;;  %v2675_v17 = vadd.f32 %v2641_v23, %v2113_v11  ;;  %v2164_v4 = vadd.f32 %v6292_v38, %v6290_v55  ;;  %v6293_v23 = vld [vmem:[#allocation16_spill] sm:$0xff] }
 0x738   :  { %v2682_v59 = vmul.f32 0.5, %v2674_v25  ;;  %v2683_v27 = vmul.f32 0.5, %v2675_v17  ;;  %v2213_v25 = vadd.f32 %v6293_v23, %v5744_v51 }
 0x73a   :  { %4459 = vtanh.f32 %v2682_v59 }
 0x73b   :  { %4461 = vtanh.f32 %v2683_v27 }
 0x73c   :  { %v2655_v8 = vpop.f32.mrf.mxu2  ;;  %v2669_v60 = vpop.f32.mrf.mxu3 }
 0x73d   :  { %v2677_v45 = vadd.f32 %v2669_v60, %v2211_v33  ;;  %v2629_v29 = vpop.f32.mrf.mxu0  ;;  %v2643_v47 = vpop.f32.mrf.mxu1  ;;  %v2676_v36 = vadd.f32 %v2655_v8, %v2162_v56 }
 0x73e   :  { %v2678_v53 = vadd.f32 %v2629_v29, %v2066_v32  ;;  %v2679_v1 = vadd.f32 %v2643_v47, %v2115_v40 }
 0x73f   :  { %4463 = vtanh.f32 %v2677_v45  ;;  %v2684_v40 = vmul.f32 0.5, %v2676_v36 }
 0x740   :  { %v4460_v41 = vpop.eup %4459  ;;  %v2685_v61 = vmul.f32 0.5, %v2678_v53  ;;  %v2686_v43 = vmul.f32 0.5, %v2679_v1 }
 0x741   :  { %v4462_v49 = vpop.eup %4461  ;;  %v2694_v35 = vmul.f32 0.5, %v4460_v41 }
 0x742   :  { %v2695_v11 = vmul.f32 0.5, %v4462_v49  ;;  %4465 = vtanh.f32 %v2685_v61 }
 0x743   :  { %v2700_v17 = vadd.f32 0.5, %v2694_v35  ;;  %4467 = vtanh.f32 %v2686_v43 }
 0x744   :  { %v2701_v59 = vadd.f32 0.5, %v2695_v11  ;;  %v2657_v27 = vpop.f32.mrf.mxu2  ;;  %v2671_v33 = vpop.f32.mrf.mxu3 }
 0x745   :  { %v4464_v32 = vpop.eup %4463  ;;  %v2680_v60 = vadd.f32 %v2657_v27, %v2164_v4  ;;  %v2681_v45 = vadd.f32 %v2671_v33, %v2213_v25 }
 0x746   :  { %v2708_v29 = vmul.f32 %v2701_v59, %v5760_v37  ;;  %v2710_v8 = vmul.f32 %v4464_v32, %v2700_v17 }
 0x747   :  { %v2687_v47 = vmul.f32 0.5, %v2680_v60  ;;  %4469 = vtanh.f32 %v2681_v45  ;;  %v6295_v45 = vld [vmem:[#allocation18_spill] sm:$0xff] }
 0x748   :  { %v4466_v53 = vpop.eup %4465  ;;  %v5815_v1 = vadd.f32 %v2710_v8, %v2708_v29  ;;  %4471 = vtanh.f32 %v2684_v40  ;;  %v2118_v29 = vadd.f32 %v6295_v45, %v5734_v7 }
 0x749   :  { %v4468_v34 = vpop.eup %4467  ;;  %v2697_v56 = vmul.f32 0.5, %v4466_v53  ;;  %4473 = vtanh.f32 %v2687_v47 }
 0x74a   :  { %v2698_v41 = vmul.f32 0.5, %v4468_v34  ;;  %4475 = vtanh.f32 %v5815_v1 }
 0x74b   :  { %v2703_v61 = vadd.f32 0.5, %v2697_v56 }
 0x74c   :  { %v2704_v43 = vadd.f32 0.5, %v2698_v41 }
 0x74d   :  { %v4470_v49 = vpop.eup %4469 }
 0x74e   :  { %v2709_v35 = vmul.f32 %v2704_v43, %v5763_v0  ;;  %v2711_v36 = vmul.f32 %v4470_v49, %v2703_v61  ;;  %v4472_v11 = vpop.eup %4471  ;;  %v6294_v0 = vld [vmem:[#allocation17_spill] sm:$0xff]  ;;  %v6296_v61 = vld [vmem:[#allocation19_spill] sm:$0xff] }
 0x74f   :  { %v4474_v38 = vpop.eup %4473  ;;  %v2696_v4 = vmul.f32 0.5, %v4472_v11  ;;  %v2069_v60 = vadd.f32 %v6294_v0, %v5732_v10  ;;  %v2216_v43 = vadd.f32 %v6296_v61, %v5744_v51  ;;  %v6297_v49 = vld [vmem:[#allocation21_spill] sm:$0xff] }
 0x750   :  { %v5819_v37 = vadd.f32 %v2711_v36, %v2709_v35  ;;  %v2699_v23 = vmul.f32 0.5, %v4474_v38  ;;  %v4476_v25 = vpop.eup %4475  ;;  %v2071_v35 = vadd.f32 %v6297_v49, %v5732_v10  ;;  %v6298_v36 = vld [vmem:[#allocation22_spill] sm:$0xff] }
 0x751   :  { %v2702_v17 = vadd.f32 0.5, %v2696_v4  ;;  %v2120_v11 = vadd.f32 %v6298_v36, %v5734_v7 }
 0x752   :  { %4477 = vtanh.f32 %v5819_v37  ;;  %v2705_v59 = vadd.f32 0.5, %v2699_v23 }
 0x753   :  { %v2716_v33 = vmul.f32 %v4476_v25, %v2702_v17 }
 0x758   :  { %v4478_v27 = vpop.eup %4477 }
 0x759   :  { %v2717_v32 = vmul.f32 %v4478_v27, %v2705_v59 }
 0x75b   :  { %v2726_v40 = vpack.c.bf16 %v2717_v32, %v2716_v33  ;;  %v6299_v33 = vld [vmem:[#allocation20_spill] sm:$0xff] }
 0x75c   :  { %v2167_v32 = vadd.f32 %v6299_v33, %v6290_v55 }
 0x75d   :  { %2735 = vmatmul.bf16.vlgmr.msra.gmra.mxu0 %v2726_v40  ;;  %2749 = vmatmul.bf16.vlgmr.msra.gmra.mxu1 %v2726_v40 }
 0x75e   :  { %2763 = vmatmul.bf16.vlgmr.msra.gmra.mxu2 %v2726_v40  ;;  %2777 = vmatmul.bf16.vlgmr.msra.gmra.mxu3 %v2726_v40 }
 0x75f   :  { %2945 = vmatpush.bf16.msra.mxu0 %v5423_v5  ;;  %2959 = vmatpush.bf16.msra.mxu1 %v5425_v22 }
 0x760   :  { %2973 = vmatpush.bf16.msra.mxu2 %v5432_v42  ;;  %2987 = vmatpush.bf16.msra.mxu3 %v5427_v26 }
 0x763   :  { %2946 = vmatpush.bf16.msra.mxu0 %v5434_v62  ;;  %2960 = vmatpush.bf16.msra.mxu1 %v5436_v2 }
 0x764   :  { %2974 = vmatpush.bf16.msra.mxu2 %v5444_v24  ;;  %2988 = vmatpush.bf16.msra.mxu3 %v5439_v18 }
 0x767   :  { %2947 = vmatpush.bf16.msra.mxu0 %v5446_v28  ;;  %2961 = vmatpush.bf16.msra.mxu1 %v5448_v50 }
 0x768   :  { %2975 = vmatpush.bf16.msra.mxu2 %v5456_v19  ;;  %2989 = vmatpush.bf16.msra.mxu3 %v5451_v39 }
 0x76b   :  { %2948 = vmatpush.bf16.msra.mxu0 %v5458_v46  ;;  %2962 = vmatpush.bf16.msra.mxu1 %v5460_v58 }
 0x76c   :  { %2976 = vmatpush.bf16.msra.mxu2 %v5468_v48  ;;  %2990 = vmatpush.bf16.msra.mxu3 %v5463_v44 }
 0x76f   :  { %2949 = vmatpush.bf16.msra.mxu0 %v5471_v63  ;;  %2963 = vmatpush.bf16.msra.mxu1 %v5473_v13 }
 0x770   :  { %2977 = vmatpush.bf16.msra.mxu2 %v5480_v30  ;;  %2991 = vmatpush.bf16.msra.mxu3 %v5475_v14 }
 0x773   :  { %2950 = vmatpush.bf16.msra.mxu0 %v5495_v52  ;;  %2964 = vmatpush.bf16.msra.mxu1 %v5497_v3 }
 0x774   :  { %2978 = vmatpush.bf16.msra.mxu2 %v5502_v15  ;;  %2992 = vmatpush.bf16.msra.mxu3 %v5499_v6 }
 0x777   :  { %2951 = vmatpush.bf16.msra.mxu0 %v5506_v16  ;;  %2965 = vmatpush.bf16.msra.mxu1 %v5511_v31 }
 0x778   :  { %2979 = vmatpush.bf16.msra.mxu2 %v5518_v57  ;;  %2993 = vmatpush.bf16.msra.mxu3 %v5515_v12 }
 0x77b   :  { %2952 = vmatpush.bf16.msra.mxu0 %v5524_v9  ;;  %2966 = vmatpush.bf16.msra.mxu1 %v5526_v54 }
 0x77c   :  { %2980 = vmatpush.bf16.msra.mxu2 %v5537_v20  ;;  %2994 = vmatpush.bf16.msra.mxu3 %v5529_v21 }
 0x7da   :  { %v2736_v8 = vpop.f32.mrf.mxu0  ;;  %v2750_v47 = vpop.f32.mrf.mxu1 }
 0x7db   :  { %v2783_v53 = vadd.f32 %v2736_v8, %v2069_v60  ;;  %v2784_v34 = vadd.f32 %v2750_v47, %v2118_v29 }
 0x7dd   :  { %v2791_v56 = vmul.f32 0.5, %v2783_v53  ;;  %v2792_v41 = vmul.f32 0.5, %v2784_v34  ;;  %v6300_v53 = vld [vmem:[#allocation23_spill] sm:$0xff] }
 0x7de   :  { %v2169_v34 = vadd.f32 %v6300_v53, %v6290_v55 }
 0x7df   :  { %4479 = vtanh.f32 %v2791_v56  ;;  %v6301_v56 = vld [vmem:[#allocation24_spill] sm:$0xff] }
 0x7e0   :  { %4481 = vtanh.f32 %v2792_v41  ;;  %v2218_v41 = vadd.f32 %v6301_v56, %v5744_v51 }
 0x7e1   :  { %v2764_v38 = vpop.f32.mrf.mxu2  ;;  %v2778_v4 = vpop.f32.mrf.mxu3 }
 0x7e2   :  { %v2786_v23 = vadd.f32 %v2778_v4, %v2216_v43  ;;  %v2738_v25 = vpop.f32.mrf.mxu0  ;;  %v2752_v17 = vpop.f32.mrf.mxu1  ;;  %v2785_v8 = vadd.f32 %v2764_v38, %v2167_v32 }
 0x7e3   :  { %v2787_v59 = vadd.f32 %v2738_v25, %v2071_v35  ;;  %v2788_v27 = vadd.f32 %v2752_v17, %v2120_v11 }
 0x7e4   :  { %4483 = vtanh.f32 %v2786_v23  ;;  %v2793_v11 = vmul.f32 0.5, %v2785_v8 }
 0x7e5   :  { %v4480_v40 = vpop.eup %4479  ;;  %v2794_v0 = vmul.f32 0.5, %v2787_v59  ;;  %v2795_v60 = vmul.f32 0.5, %v2788_v27 }
 0x7e6   :  { %v4482_v45 = vpop.eup %4481  ;;  %v2803_v29 = vmul.f32 0.5, %v4480_v40 }
 0x7e7   :  { %v2804_v47 = vmul.f32 0.5, %v4482_v45  ;;  %4485 = vtanh.f32 %v2794_v0 }
 0x7e8   :  { %v2809_v61 = vadd.f32 0.5, %v2803_v29  ;;  %4487 = vtanh.f32 %v2795_v60 }
 0x7e9   :  { %v2810_v43 = vadd.f32 0.5, %v2804_v47  ;;  %v2766_v49 = vpop.f32.mrf.mxu2  ;;  %v2780_v35 = vpop.f32.mrf.mxu3 }
 0x7ea   :  { %v4484_v36 = vpop.eup %4483  ;;  %v2789_v4 = vadd.f32 %v2766_v49, %v2169_v34  ;;  %v2790_v23 = vadd.f32 %v2780_v35, %v2218_v41 }
 0x7eb   :  { %v2817_v25 = vmul.f32 %v2810_v43, %v5815_v1  ;;  %v2819_v38 = vmul.f32 %v4484_v36, %v2809_v61 }
 0x7ec   :  { %v2796_v17 = vmul.f32 0.5, %v2789_v4  ;;  %4489 = vtanh.f32 %v2790_v23  ;;  %v6303_v23 = vld [vmem:[#allocation26_spill] sm:$0xff] }
 0x7ed   :  { %v4486_v59 = vpop.eup %4485  ;;  %v5871_v27 = vadd.f32 %v2819_v38, %v2817_v25  ;;  %4491 = vtanh.f32 %v2793_v11  ;;  %v2123_v25 = vadd.f32 %v6303_v23, %v5734_v7 }
 0x7ee   :  { %v4488_v33 = vpop.eup %4487  ;;  %v2806_v32 = vmul.f32 0.5, %v4486_v59  ;;  %4493 = vtanh.f32 %v2796_v17 }
 0x7ef   :  { %v2807_v40 = vmul.f32 0.5, %v4488_v33  ;;  %4495 = vtanh.f32 %v5871_v27 }
 0x7f0   :  { %v2812_v0 = vadd.f32 0.5, %v2806_v32 }
 0x7f1   :  { %v2813_v60 = vadd.f32 0.5, %v2807_v40 }
 0x7f2   :  { %v4490_v45 = vpop.eup %4489 }
 0x7f3   :  { %v2818_v29 = vmul.f32 %v2813_v60, %v5819_v37  ;;  %v2820_v8 = vmul.f32 %v4490_v45, %v2812_v0  ;;  %v4492_v47 = vpop.eup %4491  ;;  %v6302_v37 = vld [vmem:[#allocation25_spill] sm:$0xff]  ;;  %v6304_v0 = vld [vmem:[#allocation27_spill] sm:$0xff] }
 0x7f4   :  { %v4494_v53 = vpop.eup %4493  ;;  %v2805_v34 = vmul.f32 0.5, %v4492_v47  ;;  %v2074_v4 = vadd.f32 %v6302_v37, %v5732_v10  ;;  %v2221_v60 = vadd.f32 %v6304_v0, %v5744_v51  ;;  %v6305_v45 = vld [vmem:[#allocation29_spill] sm:$0xff] }
 0x7f5   :  { %v5875_v1 = vadd.f32 %v2820_v8, %v2818_v29  ;;  %v2808_v56 = vmul.f32 0.5, %v4494_v53  ;;  %v4496_v41 = vpop.eup %4495  ;;  %v2076_v29 = vadd.f32 %v6305_v45, %v5732_v10  ;;  %v6306_v8 = vld [vmem:[#allocation30_spill] sm:$0xff] }
 0x7f6   :  { %v2811_v61 = vadd.f32 0.5, %v2805_v34  ;;  %v2125_v47 = vadd.f32 %v6306_v8, %v5734_v7 }
 0x7f7   :  { %4497 = vtanh.f32 %v5875_v1  ;;  %v2814_v43 = vadd.f32 0.5, %v2808_v56 }
 0x7f8   :  { %v2825_v35 = vmul.f32 %v4496_v41, %v2811_v61 }
 0x7fd   :  { %v4498_v49 = vpop.eup %4497 }
 0x7fe   :  { %v2826_v36 = vmul.f32 %v4498_v49, %v2814_v43 }
 0x800   :  { %v2835_v11 = vpack.c.bf16 %v2826_v36, %v2825_v35  ;;  %v6307_v35 = vld [vmem:[#allocation28_spill] sm:$0xff] }
 0x801   :  { %v2172_v36 = vadd.f32 %v6307_v35, %v6290_v55 }
 0x802   :  { %2844 = vmatmul.bf16.vlgmr.msrb.gmra.mxu0 %v2835_v11  ;;  %2858 = vmatmul.bf16.vlgmr.msrb.gmra.mxu1 %v2835_v11 }
 0x803   :  { %2872 = vmatmul.bf16.vlgmr.msrb.gmra.mxu2 %v2835_v11  ;;  %2886 = vmatmul.bf16.vlgmr.msrb.gmra.mxu3 %v2835_v11 }
 0x804   :  { %3054 = vmatpush.bf16.msrb.mxu0 %v5423_v5  ;;  %3068 = vmatpush.bf16.msrb.mxu1 %v5425_v22 }
 0x805   :  { %3082 = vmatpush.bf16.msrb.mxu2 %v5432_v42  ;;  %3096 = vmatpush.bf16.msrb.mxu3 %v5427_v26 }
 0x808   :  { %3055 = vmatpush.bf16.msrb.mxu0 %v5434_v62  ;;  %3069 = vmatpush.bf16.msrb.mxu1 %v5436_v2 }
 0x809   :  { %3083 = vmatpush.bf16.msrb.mxu2 %v5444_v24  ;;  %3097 = vmatpush.bf16.msrb.mxu3 %v5439_v18 }
 0x80c   :  { %3056 = vmatpush.bf16.msrb.mxu0 %v5446_v28  ;;  %3070 = vmatpush.bf16.msrb.mxu1 %v5448_v50 }
 0x80d   :  { %3084 = vmatpush.bf16.msrb.mxu2 %v5456_v19  ;;  %3098 = vmatpush.bf16.msrb.mxu3 %v5451_v39 }
 0x810   :  { %3057 = vmatpush.bf16.msrb.mxu0 %v5458_v46  ;;  %3071 = vmatpush.bf16.msrb.mxu1 %v5460_v58 }
 0x811   :  { %3085 = vmatpush.bf16.msrb.mxu2 %v5468_v48  ;;  %3099 = vmatpush.bf16.msrb.mxu3 %v5463_v44 }
 0x814   :  { %3058 = vmatpush.bf16.msrb.mxu0 %v5471_v63  ;;  %3072 = vmatpush.bf16.msrb.mxu1 %v5473_v13 }
 0x815   :  { %3086 = vmatpush.bf16.msrb.mxu2 %v5480_v30  ;;  %3100 = vmatpush.bf16.msrb.mxu3 %v5475_v14 }
 0x818   :  { %3059 = vmatpush.bf16.msrb.mxu0 %v5495_v52  ;;  %3073 = vmatpush.bf16.msrb.mxu1 %v5497_v3 }
 0x819   :  { %3087 = vmatpush.bf16.msrb.mxu2 %v5502_v15  ;;  %3101 = vmatpush.bf16.msrb.mxu3 %v5499_v6 }
 0x81c   :  { %3060 = vmatpush.bf16.msrb.mxu0 %v5506_v16  ;;  %3074 = vmatpush.bf16.msrb.mxu1 %v5511_v31 }
 0x81d   :  { %3088 = vmatpush.bf16.msrb.mxu2 %v5518_v57  ;;  %3102 = vmatpush.bf16.msrb.mxu3 %v5515_v12 }
 0x820   :  { %3061 = vmatpush.bf16.msrb.mxu0 %v5524_v9  ;;  %3075 = vmatpush.bf16.msrb.mxu1 %v5526_v54 }
 0x821   :  { %3089 = vmatpush.bf16.msrb.mxu2 %v5537_v20  ;;  %3103 = vmatpush.bf16.msrb.mxu3 %v5529_v21 }
 0x87f   :  { %v2845_v38 = vpop.f32.mrf.mxu0  ;;  %v2859_v17 = vpop.f32.mrf.mxu1 }
 0x880   :  { %v2892_v59 = vadd.f32 %v2845_v38, %v2074_v4  ;;  %v2893_v33 = vadd.f32 %v2859_v17, %v2123_v25 }
 0x882   :  { %v2900_v32 = vmul.f32 0.5, %v2892_v59  ;;  %v2901_v40 = vmul.f32 0.5, %v2893_v33  ;;  %v6308_v59 = vld [vmem:[#allocation31_spill] sm:$0xff] }
 0x883   :  { %v2174_v33 = vadd.f32 %v6308_v59, %v6290_v55 }
 0x884   :  { %4499 = vtanh.f32 %v2900_v32  ;;  %v6309_v32 = vld [vmem:[#allocation32_spill] sm:$0xff] }
 0x885   :  { %4501 = vtanh.f32 %v2901_v40  ;;  %v2223_v40 = vadd.f32 %v6309_v32, %v5744_v51 }
 0x886   :  { %v2873_v53 = vpop.f32.mrf.mxu2  ;;  %v2887_v34 = vpop.f32.mrf.mxu3 }
 0x887   :  { %v2895_v56 = vadd.f32 %v2887_v34, %v2221_v60  ;;  %v2847_v41 = vpop.f32.mrf.mxu0  ;;  %v2861_v61 = vpop.f32.mrf.mxu1  ;;  %v2894_v38 = vadd.f32 %v2873_v53, %v2172_v36 }
 0x888   :  { %v2896_v43 = vadd.f32 %v2847_v41, %v2076_v29  ;;  %v2897_v49 = vadd.f32 %v2861_v61, %v2125_v47 }
 0x889   :  { %4503 = vtanh.f32 %v2895_v56  ;;  %v2902_v47 = vmul.f32 0.5, %v2894_v38 }
 0x88a   :  { %v4500_v11 = vpop.eup %4499  ;;  %v2903_v37 = vmul.f32 0.5, %v2896_v43  ;;  %v2904_v4 = vmul.f32 0.5, %v2897_v49 }
 0x88b   :  { %v4502_v23 = vpop.eup %4501  ;;  %v2912_v25 = vmul.f32 0.5, %v4500_v11 }
 0x88c   :  { %v2913_v17 = vmul.f32 0.5, %v4502_v23  ;;  %4505 = vtanh.f32 %v2903_v37 }
 0x88d   :  { %v2918_v0 = vadd.f32 0.5, %v2912_v25  ;;  %4507 = vtanh.f32 %v2904_v4 }
 0x88e   :  { %v2919_v60 = vadd.f32 0.5, %v2913_v17  ;;  %v2875_v45 = vpop.f32.mrf.mxu2  ;;  %v2889_v29 = vpop.f32.mrf.mxu3 }
 0x88f   :  { %v4504_v8 = vpop.eup %4503  ;;  %v2898_v34 = vadd.f32 %v2875_v45, %v2174_v33  ;;  %v2899_v56 = vadd.f32 %v2889_v29, %v2223_v40 }
 0x890   :  { %v2926_v41 = vmul.f32 %v2919_v60, %v5871_v27  ;;  %v2928_v53 = vmul.f32 %v4504_v8, %v2918_v0 }
 0x891   :  { %v2905_v61 = vmul.f32 0.5, %v2898_v34  ;;  %4509 = vtanh.f32 %v2899_v56  ;;  %v6311_v56 = vld [vmem:[#allocation34_spill] sm:$0xff] }
 0x892   :  { %v4506_v43 = vpop.eup %4505  ;;  %v5927_v49 = vadd.f32 %v2928_v53, %v2926_v41  ;;  %4511 = vtanh.f32 %v2902_v47  ;;  %v2128_v41 = vadd.f32 %v6311_v56, %v5734_v7 }
 0x893   :  { %v4508_v35 = vpop.eup %4507  ;;  %v2915_v36 = vmul.f32 0.5, %v4506_v43  ;;  %4513 = vtanh.f32 %v2905_v61 }
 0x894   :  { %v2916_v11 = vmul.f32 0.5, %v4508_v35  ;;  %4515 = vtanh.f32 %v5927_v49 }
 0x895   :  { %v2921_v37 = vadd.f32 0.5, %v2915_v36 }
 0x896   :  { %v2922_v4 = vadd.f32 0.5, %v2916_v11 }
 0x897   :  { %v4510_v23 = vpop.eup %4509 }
 0x898   :  { %v2927_v25 = vmul.f32 %v2922_v4, %v5875_v1  ;;  %v2929_v38 = vmul.f32 %v4510_v23, %v2921_v37  ;;  %v4512_v17 = vpop.eup %4511  ;;  %v6310_v1 = vld [vmem:[#allocation33_spill] sm:$0xff]  ;;  %v6312_v37 = vld [vmem:[#allocation35_spill] sm:$0xff] }
 0x899   :  { %v4514_v59 = vpop.eup %4513  ;;  %v2914_v33 = vmul.f32 0.5, %v4512_v17  ;;  %v2079_v34 = vadd.f32 %v6310_v1, %v5732_v10  ;;  %v2226_v4 = vadd.f32 %v6312_v37, %v5744_v51  ;;  %v6313_v23 = vld [vmem:[#allocation37_spill] sm:$0xff] }
 0x89a   :  { %v5931_v27 = vadd.f32 %v2929_v38, %v2927_v25  ;;  %v2917_v32 = vmul.f32 0.5, %v4514_v59  ;;  %v4516_v40 = vpop.eup %4515  ;;  %v2081_v25 = vadd.f32 %v6313_v23, %v5732_v10  ;;  %v6314_v38 = vld [vmem:[#allocation38_spill] sm:$0xff] }
 0x89b   :  { %v2920_v0 = vadd.f32 0.5, %v2914_v33  ;;  %v2130_v17 = vadd.f32 %v6314_v38, %v5734_v7 }
 0x89c   :  { %4517 = vtanh.f32 %v5931_v27  ;;  %v2923_v60 = vadd.f32 0.5, %v2917_v32 }
 0x89d   :  { %v2934_v29 = vmul.f32 %v4516_v40, %v2920_v0 }
 0x8a2   :  { %v4518_v45 = vpop.eup %4517 }
 0x8a3   :  { %v2935_v8 = vmul.f32 %v4518_v45, %v2923_v60 }
 0x8a5   :  { %v2944_v47 = vpack.c.bf16 %v2935_v8, %v2934_v29  ;;  %v6315_v29 = vld [vmem:[#allocation36_spill] sm:$0xff] }
 0x8a6   :  { %v2177_v8 = vadd.f32 %v6315_v29, %v6290_v55 }
 0x8a7   :  { %2953 = vmatmul.bf16.vlgmr.msra.gmra.mxu0 %v2944_v47  ;;  %2967 = vmatmul.bf16.vlgmr.msra.gmra.mxu1 %v2944_v47 }
 0x8a8   :  { %2981 = vmatmul.bf16.vlgmr.msra.gmra.mxu2 %v2944_v47  ;;  %2995 = vmatmul.bf16.vlgmr.msra.gmra.mxu3 %v2944_v47 }
 0x8a9   :  { %3163 = vmatpush.bf16.msra.mxu0 %v5423_v5  ;;  %3177 = vmatpush.bf16.msra.mxu1 %v5425_v22 }
 0x8aa   :  { %3191 = vmatpush.bf16.msra.mxu2 %v5432_v42  ;;  %3205 = vmatpush.bf16.msra.mxu3 %v5427_v26 }
 0x8ad   :  { %3164 = vmatpush.bf16.msra.mxu0 %v5434_v62  ;;  %3178 = vmatpush.bf16.msra.mxu1 %v5436_v2 }
 0x8ae   :  { %3192 = vmatpush.bf16.msra.mxu2 %v5444_v24  ;;  %3206 = vmatpush.bf16.msra.mxu3 %v5439_v18 }
 0x8b1   :  { %3165 = vmatpush.bf16.msra.mxu0 %v5446_v28  ;;  %3179 = vmatpush.bf16.msra.mxu1 %v5448_v50 }
 0x8b2   :  { %3193 = vmatpush.bf16.msra.mxu2 %v5456_v19  ;;  %3207 = vmatpush.bf16.msra.mxu3 %v5451_v39 }
 0x8b5   :  { %3166 = vmatpush.bf16.msra.mxu0 %v5458_v46  ;;  %3180 = vmatpush.bf16.msra.mxu1 %v5460_v58 }
 0x8b6   :  { %3194 = vmatpush.bf16.msra.mxu2 %v5468_v48  ;;  %3208 = vmatpush.bf16.msra.mxu3 %v5463_v44 }
 0x8b9   :  { %3167 = vmatpush.bf16.msra.mxu0 %v5471_v63  ;;  %3181 = vmatpush.bf16.msra.mxu1 %v5473_v13 }
 0x8ba   :  { %3195 = vmatpush.bf16.msra.mxu2 %v5480_v30  ;;  %3209 = vmatpush.bf16.msra.mxu3 %v5475_v14 }
 0x8bd   :  { %3168 = vmatpush.bf16.msra.mxu0 %v5495_v52  ;;  %3182 = vmatpush.bf16.msra.mxu1 %v5497_v3 }
 0x8be   :  { %3196 = vmatpush.bf16.msra.mxu2 %v5502_v15  ;;  %3210 = vmatpush.bf16.msra.mxu3 %v5499_v6 }
 0x8c1   :  { %3169 = vmatpush.bf16.msra.mxu0 %v5506_v16  ;;  %3183 = vmatpush.bf16.msra.mxu1 %v5511_v31 }
 0x8c2   :  { %3197 = vmatpush.bf16.msra.mxu2 %v5518_v57  ;;  %3211 = vmatpush.bf16.msra.mxu3 %v5515_v12 }
 0x8c5   :  { %3170 = vmatpush.bf16.msra.mxu0 %v5524_v9  ;;  %3184 = vmatpush.bf16.msra.mxu1 %v5526_v54 }
 0x8c6   :  { %3198 = vmatpush.bf16.msra.mxu2 %v5537_v20  ;;  %3212 = vmatpush.bf16.msra.mxu3 %v5529_v21 }
 0x924   :  { %v2954_v53 = vpop.f32.mrf.mxu0  ;;  %v2968_v61 = vpop.f32.mrf.mxu1 }
 0x925   :  { %v3001_v43 = vadd.f32 %v2954_v53, %v2079_v34  ;;  %v3002_v35 = vadd.f32 %v2968_v61, %v2128_v41 }
 0x927   :  { %v3009_v36 = vmul.f32 0.5, %v3001_v43  ;;  %v3010_v11 = vmul.f32 0.5, %v3002_v35  ;;  %v6316_v43 = vld [vmem:[#allocation39_spill] sm:$0xff] }
 0x928   :  { %v2179_v35 = vadd.f32 %v6316_v43, %v6290_v55 }
 0x929   :  { %4519 = vtanh.f32 %v3009_v36  ;;  %v6317_v36 = vld [vmem:[#allocation40_spill] sm:$0xff] }
 0x92a   :  { %4521 = vtanh.f32 %v3010_v11  ;;  %v2228_v11 = vadd.f32 %v6317_v36, %v5744_v51 }
 0x92b   :  { %v2982_v59 = vpop.f32.mrf.mxu2  ;;  %v2996_v33 = vpop.f32.mrf.mxu3 }
 0x92c   :  { %v3004_v32 = vadd.f32 %v2996_v33, %v2226_v4  ;;  %v2956_v40 = vpop.f32.mrf.mxu0  ;;  %v2970_v0 = vpop.f32.mrf.mxu1  ;;  %v3003_v53 = vadd.f32 %v2982_v59, %v2177_v8 }
 0x92d   :  { %v3005_v60 = vadd.f32 %v2956_v40, %v2081_v25  ;;  %v3006_v45 = vadd.f32 %v2970_v0, %v2130_v17 }
 0x92e   :  { %4523 = vtanh.f32 %v3004_v32  ;;  %v3011_v17 = vmul.f32 0.5, %v3003_v53 }
 0x92f   :  { %v4520_v47 = vpop.eup %4519  ;;  %v3012_v1 = vmul.f32 0.5, %v3005_v60  ;;  %v3013_v34 = vmul.f32 0.5, %v3006_v45 }
 0x930   :  { %v4522_v56 = vpop.eup %4521  ;;  %v3021_v41 = vmul.f32 0.5, %v4520_v47 }
 0x931   :  { %v3022_v61 = vmul.f32 0.5, %v4522_v56  ;;  %4525 = vtanh.f32 %v3012_v1 }
 0x932   :  { %v3027_v37 = vadd.f32 0.5, %v3021_v41  ;;  %4527 = vtanh.f32 %v3013_v34 }
 0x933   :  { %v3028_v4 = vadd.f32 0.5, %v3022_v61  ;;  %v2984_v23 = vpop.f32.mrf.mxu2  ;;  %v2998_v25 = vpop.f32.mrf.mxu3 }
 0x934   :  { %v4524_v38 = vpop.eup %4523  ;;  %v3007_v33 = vadd.f32 %v2984_v23, %v2179_v35  ;;  %v3008_v32 = vadd.f32 %v2998_v25, %v2228_v11 }
 0x935   :  { %v3035_v40 = vmul.f32 %v3028_v4, %v5927_v49  ;;  %v3037_v59 = vmul.f32 %v4524_v38, %v3027_v37 }
 0x936   :  { %v3014_v0 = vmul.f32 0.5, %v3007_v33  ;;  %4529 = vtanh.f32 %v3008_v32  ;;  %v6325_v32 = vld [vmem:[#allocation48_spill] sm:$0xff] }
 0x937   :  { %v4526_v60 = vpop.eup %4525  ;;  %v5983_v45 = vadd.f32 %v3037_v59, %v3035_v40  ;;  %4531 = vtanh.f32 %v3011_v17  ;;  %v2233_v40 = vadd.f32 %v6325_v32, %v5744_v51 }
 0x938   :  { %v4528_v29 = vpop.eup %4527  ;;  %v3024_v8 = vmul.f32 0.5, %v4526_v60  ;;  %4533 = vtanh.f32 %v3014_v0 }
 0x939   :  { %v3025_v47 = vmul.f32 0.5, %v4528_v29  ;;  %4535 = vtanh.f32 %v5983_v45 }
 0x93a   :  { %v3030_v1 = vadd.f32 0.5, %v3024_v8 }
 0x93b   :  { %v3031_v34 = vadd.f32 0.5, %v3025_v47 }
 0x93c   :  { %v4530_v56 = vpop.eup %4529 }
 0x93d   :  { %v3036_v41 = vmul.f32 %v3031_v34, %v5931_v27  ;;  %v3038_v53 = vmul.f32 %v4530_v56, %v3030_v1  ;;  %v4532_v61 = vpop.eup %4531  ;;  %v6324_v27 = vld [vmem:[#allocation47_spill] sm:$0xff] }
 0x93e   :  { %v4534_v43 = vpop.eup %4533  ;;  %v3023_v35 = vmul.f32 0.5, %v4532_v61  ;;  %v2184_v33 = vadd.f32 %v6324_v27, %v6290_v55  ;;  %v6331_v27 = vld [vmem:[#allocation52_spill] sm:$0xff] }
 0x93f   :  { %v5987_v49 = vadd.f32 %v3038_v53, %v3036_v41  ;;  %v3026_v36 = vmul.f32 0.5, %v4534_v43  ;;  %v4536_v11 = vpop.eup %4535 }
 0x940   :  { %v3029_v37 = vadd.f32 0.5, %v3023_v35 }
 0x941   :  { %4537 = vtanh.f32 %v5987_v49  ;;  %v3032_v4 = vadd.f32 0.5, %v3026_v36 }
 0x942   :  { %v3043_v25 = vmul.f32 %v4536_v11, %v3029_v37 }
 0x947   :  { %v4538_v23 = vpop.eup %4537 }
 0x948   :  { %v3044_v38 = vmul.f32 %v4538_v23, %v3032_v4 }
 0x94a   :  { %v3053_v17 = vpack.c.bf16 %v3044_v38, %v3043_v25 }
 0x94c   :  { %3062 = vmatmul.bf16.vlgmr.msrb.gmra.mxu0 %v3053_v17  ;;  %3076 = vmatmul.bf16.vlgmr.msrb.gmra.mxu1 %v3053_v17 }
 0x94d   :  { %3090 = vmatmul.bf16.vlgmr.msrb.gmra.mxu2 %v3053_v17  ;;  %3104 = vmatmul.bf16.vlgmr.msrb.gmra.mxu3 %v3053_v17 }
 0x94e   :  { %3272 = vmatpush.bf16.msrb.mxu0 %v5423_v5  ;;  %3286 = vmatpush.bf16.msrb.mxu1 %v5425_v22  ;;  %v6318_v5 = vld [vmem:[#allocation41_spill] sm:$0xff] }
 0x94f   :  { %3300 = vmatpush.bf16.msrb.mxu2 %v5432_v42  ;;  %3314 = vmatpush.bf16.msrb.mxu3 %v5427_v26  ;;  %v2084_v22 = vadd.f32 %v6318_v5, %v5732_v10  ;;  %v6319_v26 = vld [vmem:[#allocation42_spill] sm:$0xff] }
 0x950   :  { %v2133_v42 = vadd.f32 %v6319_v26, %v5734_v7 }
 0x952   :  { %3273 = vmatpush.bf16.msrb.mxu0 %v5434_v62  ;;  %3287 = vmatpush.bf16.msrb.mxu1 %v5436_v2 }
 0x953   :  { %3301 = vmatpush.bf16.msrb.mxu2 %v5444_v24  ;;  %3315 = vmatpush.bf16.msrb.mxu3 %v5439_v18 }
 0x956   :  { %3274 = vmatpush.bf16.msrb.mxu0 %v5446_v28  ;;  %3288 = vmatpush.bf16.msrb.mxu1 %v5448_v50 }
 0x957   :  { %3302 = vmatpush.bf16.msrb.mxu2 %v5456_v19  ;;  %3316 = vmatpush.bf16.msrb.mxu3 %v5451_v39  ;;  %v6320_v39 = vld [vmem:[#allocation43_spill] sm:$0xff] }
 0x958   :  { %v2231_v19 = vadd.f32 %v6320_v39, %v5744_v51 }
 0x95a   :  { %3275 = vmatpush.bf16.msrb.mxu0 %v5458_v46  ;;  %3289 = vmatpush.bf16.msrb.mxu1 %v5460_v58  ;;  %v6321_v46 = vld [vmem:[#allocation45_spill] sm:$0xff] }
 0x95b   :  { %3303 = vmatpush.bf16.msrb.mxu2 %v5468_v48  ;;  %3317 = vmatpush.bf16.msrb.mxu3 %v5463_v44  ;;  %v2086_v58 = vadd.f32 %v6321_v46, %v5732_v10  ;;  %v6322_v44 = vld [vmem:[#allocation46_spill] sm:$0xff] }
 0x95c   :  { %v2135_v48 = vadd.f32 %v6322_v44, %v5734_v7 }
 0x95e   :  { %3276 = vmatpush.bf16.msrb.mxu0 %v5471_v63  ;;  %3290 = vmatpush.bf16.msrb.mxu1 %v5473_v13 }
 0x95f   :  { %3304 = vmatpush.bf16.msrb.mxu2 %v5480_v30  ;;  %3318 = vmatpush.bf16.msrb.mxu3 %v5475_v14 }
 0x962   :  { %3277 = vmatpush.bf16.msrb.mxu0 %v5495_v52  ;;  %3291 = vmatpush.bf16.msrb.mxu1 %v5497_v3 }
 0x963   :  { %3305 = vmatpush.bf16.msrb.mxu2 %v5502_v15  ;;  %3319 = vmatpush.bf16.msrb.mxu3 %v5499_v6  ;;  %v6323_v15 = vld [vmem:[#allocation44_spill] sm:$0xff] }
 0x966   :  { %3278 = vmatpush.bf16.msrb.mxu0 %v5506_v16  ;;  %3292 = vmatpush.bf16.msrb.mxu1 %v5511_v31  ;;  %v2182_v16 = vadd.f32 %v6323_v15, %v6290_v55  ;;  %v6330_v15 = vld [vmem:[#allocation54_spill] sm:$0xff] }
 0x967   :  { %3306 = vmatpush.bf16.msrb.mxu2 %v5518_v57  ;;  %3320 = vmatpush.bf16.msrb.mxu3 %v5515_v12 }
 0x96a   :  { %3279 = vmatpush.bf16.msrb.mxu0 %v5524_v9  ;;  %3293 = vmatpush.bf16.msrb.mxu1 %v5526_v54 }
 0x96b   :  { %3307 = vmatpush.bf16.msrb.mxu2 %v5537_v20  ;;  %3321 = vmatpush.bf16.msrb.mxu3 %v5529_v21 }
 0x9c9   :  { %v3063_v62 = vpop.f32.mrf.mxu0  ;;  %v3077_v2 = vpop.f32.mrf.mxu1 }
 0x9ca   :  { %v3110_v18 = vadd.f32 %v3063_v62, %v2084_v22  ;;  %v3111_v24 = vadd.f32 %v3077_v2, %v2133_v42 }
 0x9cc   :  { %v3118_v28 = vmul.f32 0.5, %v3110_v18  ;;  %v3119_v50 = vmul.f32 0.5, %v3111_v24 }
 0x9ce   :  { %4539 = vtanh.f32 %v3118_v28 }
 0x9cf   :  { %4541 = vtanh.f32 %v3119_v50 }
 0x9d0   :  { %v3091_v63 = vpop.f32.mrf.mxu2  ;;  %v3105_v13 = vpop.f32.mrf.mxu3 }
 0x9d1   :  { %v3113_v14 = vadd.f32 %v3105_v13, %v2231_v19  ;;  %v3065_v30 = vpop.f32.mrf.mxu0  ;;  %v3079_v52 = vpop.f32.mrf.mxu1  ;;  %v3112_v21 = vadd.f32 %v3091_v63, %v2182_v16  ;;  %v6327_v19 = vld [vmem:[#allocation50_spill] sm:$0xff]  ;;  %v2140_v16 = vadd.f32 %v6330_v15, %v5734_v7  ;;  %v4225_v15 = vld [vmem:[%s6128_s7 + $0x10] sm:$0xff] }
 0x9d2   :  { %v3114_v3 = vadd.f32 %v3065_v30, %v2086_v58  ;;  %v3115_v6 = vadd.f32 %v3079_v52, %v2135_v48  ;;  %v2138_v46 = vadd.f32 %v6327_v19, %v5734_v7  ;;  %v6328_v30 = vld [vmem:[#allocation51_spill] sm:$0xff] }
 0x9d3   :  { %4543 = vtanh.f32 %v3113_v14  ;;  %v3120_v47 = vmul.f32 0.5, %v3112_v21  ;;  %v2236_v52 = vadd.f32 %v6328_v30, %v5744_v51  ;;  %v4229_v30 = vld [vmem:[%s6128_s7 + $0x30] sm:$0xff] }
 0x9d4   :  { %v4540_v31 = vpop.eup %4539  ;;  %v3121_v12 = vmul.f32 0.5, %v3114_v3  ;;  %v3122_v57 = vmul.f32 0.5, %v3115_v6  ;;  %v6329_v3 = vld [vmem:[#allocation53_spill] sm:$0xff] }
 0x9d5   :  { %v4542_v9 = vpop.eup %4541  ;;  %v3130_v54 = vmul.f32 0.5, %v4540_v31  ;;  %v2091_v6 = vadd.f32 %v6329_v3, %v5732_v10  ;;  %v4227_v3 = vld [vmem:[%s6128_s7 + $0x20] sm:$0xff] }
 0x9d6   :  { %v3131_v20 = vmul.f32 0.5, %v4542_v9  ;;  %4545 = vtanh.f32 %v3121_v12 }
 0x9d7   :  { %v3136_v59 = vadd.f32 0.5, %v3130_v54  ;;  %4547 = vtanh.f32 %v3122_v57 }
 0x9d8   :  { %v3137_v0 = vadd.f32 0.5, %v3131_v20  ;;  %v3093_v60 = vpop.f32.mrf.mxu2  ;;  %v3107_v29 = vpop.f32.mrf.mxu3 }
 0x9d9   :  { %v4544_v8 = vpop.eup %4543  ;;  %v3116_v1 = vadd.f32 %v3093_v60, %v2184_v33  ;;  %v3117_v34 = vadd.f32 %v3107_v29, %v2233_v40  ;;  %v2187_v33 = vadd.f32 %v6331_v27, %v6290_v55 }
 0x9da   :  { %v3144_v56 = vmul.f32 %v3137_v0, %v5983_v45  ;;  %v3146_v41 = vmul.f32 %v4544_v8, %v3136_v59 }
 0x9db   :  { %v3123_v53 = vmul.f32 0.5, %v3116_v1  ;;  %4549 = vtanh.f32 %v3117_v34  ;;  %v6333_v34 = vld [vmem:[#allocation56_spill] sm:$0xff] }
 0x9dc   :  { %v4546_v61 = vpop.eup %4545  ;;  %v6039_v43 = vadd.f32 %v3146_v41, %v3144_v56  ;;  %4551 = vtanh.f32 %v3120_v47  ;;  %v6332_v47 = vld [vmem:[#allocation55_spill] sm:$0xff]  ;;  %v2238_v56 = vadd.f32 %v6333_v34, %v5744_v51 }
 0x9dd   :  { %v4548_v35 = vpop.eup %4547  ;;  %v3133_v36 = vmul.f32 0.5, %v4546_v61  ;;  %4553 = vtanh.f32 %v3123_v53  ;;  %v2189_v1 = vadd.f32 %v6332_v47, %v6290_v55 }
 0x9de   :  { %v3134_v11 = vmul.f32 0.5, %v4548_v35  ;;  %4555 = vtanh.f32 %v6039_v43 }
 0x9df   :  { %v3139_v37 = vadd.f32 0.5, %v3133_v36 }
 0x9e0   :  { %v3140_v4 = vadd.f32 0.5, %v3134_v11 }
 0x9e1   :  { %v4550_v23 = vpop.eup %4549 }
 0x9e2   :  { %v3145_v25 = vmul.f32 %v3140_v4, %v5987_v49  ;;  %v3147_v38 = vmul.f32 %v4550_v23, %v3139_v37  ;;  %v4552_v17 = vpop.eup %4551  ;;  %v6326_v49 = vld [vmem:[#allocation49_spill] sm:$0xff] }
 0x9e3   :  { %v4554_v5 = vpop.eup %4553  ;;  %v3132_v22 = vmul.f32 0.5, %v4552_v17  ;;  %v2089_v39 = vadd.f32 %v6326_v49, %v5732_v10 }
 0x9e4   :  { %v6043_v45 = vadd.f32 %v3147_v38, %v3145_v25  ;;  %v3135_v26 = vmul.f32 0.5, %v4554_v5  ;;  %v4556_v42 = vpop.eup %4555 }
 0x9e5   :  { %v3138_v62 = vadd.f32 0.5, %v3132_v22 }
 0x9e6   :  { %4557 = vtanh.f32 %v6043_v45  ;;  %v3141_v2 = vadd.f32 0.5, %v3135_v26 }
 0x9e7   :  { %v3152_v24 = vmul.f32 %v4556_v42, %v3138_v62 }
 0x9ec   :  { %v4558_v18 = vpop.eup %4557 }
 0x9ed   :  { %v3153_v28 = vmul.f32 %v4558_v18, %v3141_v2 }
 0x9ef   :  { %v3162_v50 = vpack.c.bf16 %v3153_v28, %v3152_v24 }
 0x9f1   :  { %3171 = vmatmul.bf16.vlgmr.msra.gmra.mxu0 %v3162_v50  ;;  %3185 = vmatmul.bf16.vlgmr.msra.gmra.mxu1 %v3162_v50 }
 0x9f2   :  { %3199 = vmatmul.bf16.vlgmr.msra.gmra.mxu2 %v3162_v50  ;;  %3213 = vmatmul.bf16.vlgmr.msra.gmra.mxu3 %v3162_v50 }
 0xa6e   :  { %v3172_v58 = vpop.f32.mrf.mxu0  ;;  %v3186_v44 = vpop.f32.mrf.mxu1 }
 0xa6f   :  { %v3219_v48 = vadd.f32 %v3172_v58, %v2089_v39  ;;  %v3220_v63 = vadd.f32 %v3186_v44, %v2138_v46 }
 0xa71   :  { %v3227_v13 = vmul.f32 0.5, %v3219_v48  ;;  %v3228_v14 = vmul.f32 0.5, %v3220_v63 }
 0xa73   :  { %4559 = vtanh.f32 %v3227_v13 }
 0xa74   :  { %4561 = vtanh.f32 %v3228_v14 }
 0xa75   :  { %v3200_v31 = vpop.f32.mrf.mxu2  ;;  %v3214_v12 = vpop.f32.mrf.mxu3 }
 0xa76   :  { %v3222_v57 = vadd.f32 %v3214_v12, %v2236_v52  ;;  %v3174_v9 = vpop.f32.mrf.mxu0  ;;  %v3188_v54 = vpop.f32.mrf.mxu1  ;;  %v3221_v29 = vadd.f32 %v3200_v31, %v2187_v33  ;;  %v4228_v52 = vld [vmem:[%s6128_s7 + $0x28] sm:$0xff]  ;;  %v6334_v31 = vld [vmem:[#allocation57_spill] sm:$0xff]  ;;  %v4223_v33 = vld [vmem:[%s6128_s7] sm:$0xff] }
 0xa77   :  { %v3223_v21 = vadd.f32 %v3174_v9, %v2091_v6  ;;  %v3224_v20 = vadd.f32 %v3188_v54, %v2140_v16  ;;  %v4226_v6 = vld [vmem:[%s6128_s7 + $0x18] sm:$0xff]  ;;  %v4224_v16 = vld [vmem:[%s6128_s7 + $0x8] sm:$0xff]  ;;  %v2094_v12 = vadd.f32 %v6334_v31, %v5732_v10 }
 0xa78   :  { %4563 = vtanh.f32 %v3222_v57  ;;  %v3229_v11 = vmul.f32 0.5, %v3221_v29  ;;  %v6335_v57 = vld [vmem:[#allocation58_spill] sm:$0xff] }
 0xa79   :  { %v4560_v32 = vpop.eup %4559  ;;  %v3230_v40 = vmul.f32 0.5, %v3223_v21  ;;  %v3231_v59 = vmul.f32 0.5, %v3224_v20  ;;  %v2143_v9 = vadd.f32 %v6335_v57, %v5734_v7 }
 0xa7a   :  { %v4562_v0 = vpop.eup %4561  ;;  %v3239_v60 = vmul.f32 0.5, %v4560_v32 }
 0xa7b   :  { %v3240_v8 = vmul.f32 0.5, %v4562_v0  ;;  %4565 = vtanh.f32 %v3230_v40 }
 0xa7c   :  { %v3245_v41 = vadd.f32 0.5, %v3239_v60  ;;  %4567 = vtanh.f32 %v3231_v59  ;;  %v6336_v59 = vld [vmem:[#allocation59_spill] sm:$0xff]  ;;  %v6337_v60 = vld [vmem:[#allocation60_spill] sm:$0xff] }
 0xa7d   :  { %v3246_v53 = vadd.f32 0.5, %v3240_v8  ;;  %v3202_v61 = vpop.f32.mrf.mxu2  ;;  %v3216_v35 = vpop.f32.mrf.mxu3  ;;  %v2192_v0 = vadd.f32 %v6336_v59, %v6290_v55  ;;  %v2241_v29 = vadd.f32 %v6337_v60, %v5744_v51  ;;  %v6338_v8 = vld [vmem:[#allocation61_spill] sm:$0xff] }
 0xa7e   :  { %v4564_v36 = vpop.eup %4563  ;;  %v3225_v37 = vadd.f32 %v3202_v61, %v2189_v1  ;;  %v3226_v4 = vadd.f32 %v3216_v35, %v2238_v56  ;;  %v2096_v47 = vadd.f32 %v6338_v8, %v5732_v10  ;;  %v6339_v1 = vld [vmem:[#allocation62_spill] sm:$0xff] }
 0xa7f   :  { %v3253_v23 = vmul.f32 %v3246_v53, %v6039_v43  ;;  %v3255_v25 = vmul.f32 %v4564_v36, %v3245_v41  ;;  %v2145_v34 = vadd.f32 %v6339_v1, %v5734_v7  ;;  %v6340_v7 = vld [vmem:[#allocation63_spill] sm:$0xff] }
 0xa80   :  { %v3232_v38 = vmul.f32 0.5, %v3225_v37  ;;  %4569 = vtanh.f32 %v3226_v4 }
 0xa81   :  { %v4566_v17 = vpop.eup %4565  ;;  %v6063_v5 = vadd.f32 %v3255_v25, %v3253_v23  ;;  %4571 = vtanh.f32 %v3229_v11 }
 0xa82   :  { %v4568_v22 = vpop.eup %4567  ;;  %v3242_v26 = vmul.f32 0.5, %v4566_v17  ;;  %4573 = vtanh.f32 %v3232_v38 }
 0xa83   :  { %v3243_v42 = vmul.f32 0.5, %v4568_v22  ;;  %4575 = vtanh.f32 %v6063_v5 }
 0xa84   :  { %v3248_v62 = vadd.f32 0.5, %v3242_v26  ;;  %v2194_v26 = vadd.f32 %v6340_v7, %v6290_v55 }
 0xa85   :  { %v3249_v2 = vadd.f32 0.5, %v3243_v42  ;;  %v6341_v42 = vld [vmem:[#allocation64_spill] sm:$0xff] }
 0xa86   :  { %v4570_v18 = vpop.eup %4569 }
 0xa87   :  { %v3254_v24 = vmul.f32 %v3249_v2, %v6043_v45  ;;  %v3256_v28 = vmul.f32 %v4570_v18, %v3248_v62  ;;  %v4572_v50 = vpop.eup %4571  ;;  %v4230_v45 = vld [vmem:[%s6128_s7 + $0x38] sm:$0xff]  ;;  %v2243_v62 = vadd.f32 %v6341_v42, %v5744_v51 }
 0xa88   :  { %v4574_v49 = vpop.eup %4573  ;;  %v3241_v39 = vmul.f32 0.5, %v4572_v50  ;;  %3441 = vmatpush.bf16.msra.mxu0 %v4230_v45 }
 0xa89   :  { %v6067_v43 = vadd.f32 %v3256_v28, %v3254_v24  ;;  %v3244_v19 = vmul.f32 0.5, %v4574_v49  ;;  %v4576_v46 = vpop.eup %4575 }
 0xa8a   :  { %v3247_v58 = vadd.f32 0.5, %v3241_v39 }
 0xa8b   :  { %4577 = vtanh.f32 %v6067_v43  ;;  %v3250_v44 = vadd.f32 0.5, %v3244_v19 }
 0xa8c   :  { %v3261_v63 = vmul.f32 %v4576_v46, %v3247_v58  ;;  %3442 = vmatpush.bf16.msra.mxu0 %v4229_v30 }
 0xa90   :  { %3443 = vmatpush.bf16.msra.mxu0 %v4228_v52 }
 0xa91   :  { %v4578_v48 = vpop.eup %4577 }
 0xa92   :  { %v3262_v13 = vmul.f32 %v4578_v48, %v3250_v44 }
 0xa94   :  { %v3271_v14 = vpack.c.bf16 %v3262_v13, %v3261_v63  ;;  %3444 = vmatpush.bf16.msra.mxu0 %v4227_v3 }
 0xa96   :  { %3280 = vmatmul.bf16.vlgmr.msrb.gmra.mxu0 %v3271_v14  ;;  %3294 = vmatmul.bf16.vlgmr.msrb.gmra.mxu1 %v3271_v14 }
 0xa97   :  { %3308 = vmatmul.bf16.vlgmr.msrb.gmra.mxu2 %v3271_v14  ;;  %3322 = vmatmul.bf16.vlgmr.msrb.gmra.mxu3 %v3271_v14 }
 0xa98   :  { %3445 = vmatpush.bf16.msra.mxu0 %v4226_v6 }
 0xa9c   :  { %3446 = vmatpush.bf16.msra.mxu0 %v4225_v15 }
 0xaa0   :  { %3447 = vmatpush.bf16.msra.mxu0 %v4224_v16 }
 0xaa4   :  { %3448 = vmatpush.bf16.msra.mxu0 %v4223_v33 }
 0xb13   :  { %v3281_v54 = vpop.f32.mrf.mxu0  ;;  %v3295_v21 = vpop.f32.mrf.mxu1 }
 0xb14   :  { %v3328_v20 = vadd.f32 %v3281_v54, %v2094_v12  ;;  %v3329_v27 = vadd.f32 %v3295_v21, %v2143_v9 }
 0xb16   :  { %v3336_v32 = vmul.f32 0.5, %v3328_v20  ;;  %v3337_v40 = vmul.f32 0.5, %v3329_v27  ;;  %v4278_v27 = vld [vmem:[%s6129_s8] ss:$0 sm:$0xff] }
 0xb18   :  { %4579 = vtanh.f32 %v3336_v32 }
 0xb19   :  { %4581 = vtanh.f32 %v3337_v40 }
 0xb1a   :  { %v3309_v56 = vpop.f32.mrf.mxu2  ;;  %v3323_v41 = vpop.f32.mrf.mxu3 }
 0xb1b   :  { %v3330_v53 = vadd.f32 %v3309_v56, %v2192_v0  ;;  %v3331_v61 = vadd.f32 %v3323_v41, %v2241_v29  ;;  %v3283_v35 = vpop.f32.mrf.mxu0  ;;  %v3297_v36 = vpop.f32.mrf.mxu1 }
 0xb1c   :  { %v3332_v11 = vadd.f32 %v3283_v35, %v2096_v47  ;;  %v3333_v37 = vadd.f32 %v3297_v36, %v2145_v34 }
 0xb1d   :  { %v3338_v4 = vmul.f32 0.5, %v3330_v53  ;;  %4583 = vtanh.f32 %v3331_v61 }
 0xb1e   :  { %v4580_v23 = vpop.eup %4579  ;;  %v3339_v25 = vmul.f32 0.5, %v3332_v11  ;;  %v3340_v38 = vmul.f32 0.5, %v3333_v37 }
 0xb1f   :  { %v4582_v17 = vpop.eup %4581  ;;  %v3348_v22 = vmul.f32 0.5, %v4580_v23  ;;  %4585 = vtanh.f32 %v3338_v4 }
 0xb20   :  { %v3349_v10 = vmul.f32 0.5, %v4582_v17  ;;  %4587 = vtanh.f32 %v3339_v25 }
 0xb21   :  { %v3354_v2 = vadd.f32 0.5, %v3348_v22  ;;  %4589 = vtanh.f32 %v3340_v38 }
 0xb22   :  { %v3355_v18 = vadd.f32 0.5, %v3349_v10  ;;  %v3311_v24 = vpop.f32.mrf.mxu2  ;;  %v3325_v28 = vpop.f32.mrf.mxu3 }
 0xb23   :  { %v4584_v50 = vpop.eup %4583  ;;  %v3334_v49 = vadd.f32 %v3311_v24, %v2194_v26  ;;  %v3335_v39 = vadd.f32 %v3325_v28, %v2243_v62 }
 0xb24   :  { %v3362_v19 = vmul.f32 %v3355_v18, %v6063_v5  ;;  %v3364_v46 = vmul.f32 %v4584_v50, %v3354_v2 }
 0xb25   :  { %v4586_v58 = vpop.eup %4585  ;;  %v3341_v44 = vmul.f32 0.5, %v3334_v49  ;;  %4591 = vtanh.f32 %v3335_v39 }
 0xb26   :  { %v4588_v48 = vpop.eup %4587  ;;  %v3366_v63 = vadd.f32 %v3364_v46, %v3362_v19  ;;  %v3350_v14 = vmul.f32 0.5, %v4586_v58 }
 0xb27   :  { %v4590_v55 = vpop.eup %4589  ;;  %v3351_v13 = vmul.f32 0.5, %v4588_v48  ;;  %4593 = vtanh.f32 %v3341_v44 }
 0xb28   :  { %4595 = vtanh.f32 %v3366_v63  ;;  %v3352_v51 = vmul.f32 0.5, %v4590_v55  ;;  %v3356_v5 = vadd.f32 0.5, %v3350_v14 }
 0xb29   :  { %v3357_v45 = vadd.f32 0.5, %v3351_v13 }
 0xb2a   :  { %v3358_v30 = vadd.f32 0.5, %v3352_v51 }
 0xb2b   :  { %v4592_v52 = vpop.eup %4591 }
 0xb2c   :  { %v3363_v3 = vmul.f32 %v3358_v30, %v6067_v43  ;;  %v3365_v6 = vmul.f32 %v4592_v52, %v3357_v45 }
 0xb2d   :  { %v4594_v15 = vpop.eup %4593 }
 0xb2e   :  { %v4596_v16 = vpop.eup %4595  ;;  %v3367_v31 = vadd.f32 %v3365_v6, %v3363_v3  ;;  %v3353_v57 = vmul.f32 0.5, %v4594_v15 }
 0xb2f   :  { %v3370_v12 = vmul.f32 %v4596_v16, %v3356_v5 }
 0xb30   :  { %4597 = vtanh.f32 %v3367_v31  ;;  %v3359_v9 = vadd.f32 0.5, %v3353_v57 }
 0xb36   :  { %v4598_v54 = vpop.eup %4597 }
 0xb37   :  { %v3371_v21 = vmul.f32 %v4598_v54, %v3359_v9 }
 0xb39   :  { %v3372_v20 = vpack.c.bf16 %v3371_v21, %v3370_v12 }
 0xb3b   :  { %3449 = vmatmul.bf16.vlgmr.msra.gmra.mxu0 %v3372_v20 }
 0xbb8   :  { %v3450_v33 = vpop.f32.mrf.mxu0 }
 0xbb9   :  { %v3451_v32 = vadd.f32 %v4278_v27, %v3450_v33 }
 0xbbb   :  { %3455 = vst [vmem:[%s6130_s9] sm:$0xff] %v3451_v32 }
 0xbc0   :  { %v3452_v43 = vpop.f32.mrf.mxu0 }
 0xbc1   :  { %v3453_v40 = vadd.f32 %v4278_v27, %v3452_v43 }
 0xbc3   :  { %3456 = vst [vmem:[%s6130_s9 + $0x8] sm:$0xff] %v3453_v40 }
 0xbc4   :  { %3461 = vsyncpa [#allocation5], 1 }
 0xbc5   :  { %3462 = vsyncpa [#allocation7], 1 }
 0xbc6   :  { %3463 = vsyncpa [#allocation10], 1 }

</bundles_post_ra>
